<compile_context>
chip_gen: v7x
topology: tpu7x:2x2x1
jax: 0.10.0
libtpu: 0.0.40
codegen_flags: <defaults>
</compile_context>

<pallas_src>
import jax
import jax.numpy as jnp
from jax.experimental import pallas as pl
from jax.experimental.pallas import tpu as pltpu

LRELU_SLOPE = 0.2
BN_EPS = 1e-5

_TM = 256                       # M-tile for the tiled (large-M) path
_FUSE_MAX_ROWS = 512            # use single fused kernel when M is this small
_FUSE_MAX_BYTES = 8 * 1024 * 1024
_VMEM_LIMIT = 32 * 1024 * 1024


def _vmem():
    return pl.BlockSpec(memory_space=pltpu.MemorySpace.VMEM)


def _round_up(x, m):
    return ((x + m - 1) // m) * m


# ----------------------------- Pallas kernels ------------------------------ #

def _make_fused_matmul_bn_lrelu_kernel(groups, inv_count):
    """bf16 matmul (f32 acc) + BatchNorm (batch stats) + LeakyReLU, one VMEM block.

    Output columns are laid out as (group, channel); BN stats are reduced over
    rows AND the `groups` column-groups (spatial positions / sub-pixel phases
    that share a channel).  `inv_count` = 1 / (num_rows_true * groups).
    """
    def kernel(a_ref, b_ref, g_ref, bta_ref, o_ref):
        y = jnp.dot(a_ref[...], b_ref[...], preferred_element_type=jnp.float32)
        c = g_ref.shape[1]
        col_sum = jnp.sum(y, axis=0, keepdims=True)          # (1, groups*c)
        col_sq = jnp.sum(y * y, axis=0, keepdims=True)
        ch_sum = col_sum[:, 0:c]
        ch_sq = col_sq[:, 0:c]
        for g in range(1, groups):                           # static unroll, small
            ch_sum = ch_sum + col_sum[:, g * c:(g + 1) * c]
            ch_sq = ch_sq + col_sq[:, g * c:(g + 1) * c]
        mean = ch_sum * inv_count
        var = jnp.maximum(ch_sq * inv_count - mean * mean, 0.0)
        scale = g_ref[...] * jax.lax.rsqrt(var + BN_EPS)
        shift = bta_ref[...] - mean * scale
        if groups > 1:                                       # broadcast back per group
            scale = jnp.concatenate([scale] * groups, axis=1)
            shift = jnp.concatenate([shift] * groups, axis=1)
        yn = y * scale + shift
        o_ref[...] = jnp.where(yn >= 0.0, yn, LRELU_SLOPE * yn)
    return kernel


def _matmul_stats_kernel(a_ref, b_ref, y_ref, s_ref):
    """Tiled pass 1: y tile = a @ b, plus per-tile column sum / sum-of-squares."""
    y = jnp.dot(a_ref[...], b_ref[...], preferred_element_type=jnp.float32)
    y_ref[...] = y
    s_ref[0, 0:1, :] = jnp.sum(y, axis=0, keepdims=True)
    s_ref[0, 1:2, :] = jnp.sum(y * y, axis=0, keepdims=True)


def _scale_shift_lrelu_kernel(y_ref, sc_ref, sh_ref, o_ref):
    """Tiled pass 2: folded BN affine (scale/shift per column) + LeakyReLU."""
    yn = y_ref[...] * sc_ref[...] + sh_ref[...]
    o_ref[...] = jnp.where(yn >= 0.0, yn, LRELU_SLOPE * yn)


def _matmul_bias_tanh_kernel(a_ref, b_ref, bias_ref, o_ref):
    """bf16 matmul (f32 acc) + bias + tanh."""
    y = jnp.dot(a_ref[...], b_ref[...], preferred_element_type=jnp.float32)
    o_ref[...] = jnp.tanh(y + bias_ref[...])


# ------------------------- matmul + BN dispatchers -------------------------- #

def _matmul_bn_lrelu(patches, w, gamma, beta, groups, m_true):
    """patches(M,K) bf16 @ w(K, groups*C) bf16 -> BN + LeakyReLU, f32 (M, groups*C)."""
    m, k = patches.shape
    nc = w.shape[1]
    c = nc // groups
    est_bytes = m * k * 2 + k * nc * 2 + 2 * m * nc * 4

    if m_true <= _FUSE_MAX_ROWS and est_bytes <= _FUSE_MAX_BYTES:
        # Small problem: one fused kernel, everything resident in VMEM.
        return pl.pallas_call(
            _make_fused_matmul_bn_lrelu_kernel(groups, 1.0 / float(m_true * groups)),
            out_shape=jax.ShapeDtypeStruct((m, nc), jnp.float32),
            in_specs=[_vmem()] * 4,
            out_specs=_vmem(),
        )(patches, w, gamma, beta)

    # Large problem: M-tiled two-pass BN (stats pass + normalize pass).
    tm = _TM
    mp = _round_up(m, tm)
    if mp != m:                                   # zero rows: no effect on sums
        patches = jnp.pad(patches, ((0, mp - m), (0, 0)))
    t = mp // tm

    y, part = pl.pallas_call(
        _matmul_stats_kernel,
        out_shape=(jax.ShapeDtypeStruct((mp, nc), jnp.float32),
                   jax.ShapeDtypeStruct((t, 2, nc), jnp.float32)),
        grid=(t,),
        in_specs=[pl.BlockSpec((tm, k), lambda i: (i, 0)),
                  pl.BlockSpec((k, nc), lambda i: (0, 0))],
        out_specs=(pl.BlockSpec((tm, nc), lambda i: (i, 0)),
                   pl.BlockSpec((1, 2, nc), lambda i: (i, 0, 0))),
        compiler_params=pltpu.CompilerParams(
            dimension_semantics=("parallel",), vmem_limit_bytes=_VMEM_LIMIT),
    )(patches, w)

    # Tiny per-channel reduction + BN affine folding in XLA (vectors of size C).
    tot = jnp.sum(part, axis=0).reshape(2, groups, c).sum(axis=1)    # (2, C)
    count = float(m_true * groups)
    mean = tot[0] / count
    var = jnp.maximum(tot[1] / count - mean * mean, 0.0)
    scale = gamma[0] * jax.lax.rsqrt(var + BN_EPS)
    shift = beta[0] - mean * scale
    scale = jnp.tile(scale, groups).reshape(1, nc)
    shift = jnp.tile(shift, groups).reshape(1, nc)

    out = pl.pallas_call(
        _scale_shift_lrelu_kernel,
        out_shape=jax.ShapeDtypeStruct((mp, nc), jnp.float32),
        grid=(t,),
        in_specs=[pl.BlockSpec((tm, nc), lambda i: (i, 0)),
                  pl.BlockSpec((1, nc), lambda i: (0, 0)),
                  pl.BlockSpec((1, nc), lambda i: (0, 0))],
        out_specs=pl.BlockSpec((tm, nc), lambda i: (i, 0)),
        compiler_params=pltpu.CompilerParams(
            dimension_semantics=("parallel",), vmem_limit_bytes=_VMEM_LIMIT),
    )(y, scale, shift)
    return out[:m_true]


def _matmul_bias_tanh(patches, w, bias, m_true):
    m, k = patches.shape
    nc = w.shape[1]
    if m_true <= _FUSE_MAX_ROWS:
        return pl.pallas_call(
            _matmul_bias_tanh_kernel,
            out_shape=jax.ShapeDtypeStruct((m, nc), jnp.float32),
            in_specs=[_vmem()] * 3,
            out_specs=_vmem(),
        )(patches, w, bias)

    tm = _TM
    mp = _round_up(m, tm)
    if mp != m:
        patches = jnp.pad(patches, ((0, mp - m), (0, 0)))
    t = mp // tm
    out = pl.pallas_call(
        _matmul_bias_tanh_kernel,
        out_shape=jax.ShapeDtypeStruct((mp, nc), jnp.float32),
        grid=(t,),
        in_specs=[pl.BlockSpec((tm, k), lambda i: (i, 0)),
                  pl.BlockSpec((k, nc), lambda i: (0, 0)),
                  pl.BlockSpec((1, nc), lambda i: (0, 0))],
        out_specs=pl.BlockSpec((tm, nc), lambda i: (i, 0)),
        compiler_params=pltpu.CompilerParams(
            dimension_semantics=("parallel",), vmem_limit_bytes=_VMEM_LIMIT),
    )(patches, w, bias)
    return out[:m_true]


# --------------------------- layout / layer glue ---------------------------- #

def _im2col3(x, ho, wo, dil):
    """x: NHWC (padded as needed).  3x3 patches, stride 1.  -> (N*ho*wo, 9*C)."""
    n, _, _, c = x.shape
    cols = []
    for ky in range(3):
        for kx in range(3):
            cols.append(x[:, ky * dil: ky * dil + ho, kx * dil: kx * dil + wo, :])
    p = jnp.stack(cols, axis=3)                        # (N, ho, wo, 9, C)
    return p.reshape(n * ho * wo, 9 * c)


def _dense_ct0_bn_lrelu(z, w0, gamma, beta):
    """ConvTranspose2d(4,1,0) on a 1x1 input == dense matmul.  -> (N,4,4,Cout)."""
    n = z.shape[0]
    cout = gamma.shape[1]
    y = _matmul_bn_lrelu(z.astype(jnp.bfloat16), w0, gamma, beta,
                         groups=16, m_true=n)          # (N, 16*Cout), cols = (pos, ch)
    return y.reshape(n, 4, 4, cout)


def _convT_stride2_bn_lrelu(x, w9, gamma, beta):
    """ConvTranspose2d(4, stride=2, pad=1, bias=False) + BN + LeakyReLU, NHWC.

    Sub-pixel decomposition: a 3x3-patch matmul on pad(x,1) producing 4*Cout
    phase channels, then depth-to-space.
    """
    n, h, wd, _ = x.shape
    cout = gamma.shape[1]
    xp = jnp.pad(x, ((0, 0), (1, 1), (1, 1), (0, 0))).astype(jnp.bfloat16)
    patches = _im2col3(xp, h, wd, 1)                   # (N*h*wd, 9*Cin)
    y = _matmul_bn_lrelu(patches, w9, gamma, beta,
                         groups=4, m_true=n * h * wd)  # (N*h*wd, 4*Cout), cols=(phase,ch)
    y = y.reshape(n, h, wd, 2, 2, cout)
    y = jnp.transpose(y, (0, 1, 3, 2, 4, 5))           # depth-to-space
    return y.reshape(n, 2 * h, 2 * wd, cout)


def _conv3x3_bn_lrelu(x, w, gamma, beta, dil, pad):
    n, h, wd, _ = x.shape
    if pad:
        x = jnp.pad(x, ((0, 0), (pad, pad), (pad, pad), (0, 0)))
    ho = h + 2 * pad - 2 * dil
    wo = wd + 2 * pad - 2 * dil
    patches = _im2col3(x.astype(jnp.bfloat16), ho, wo, dil)
    y = _matmul_bn_lrelu(patches, w, gamma, beta, groups=1, m_true=n * ho * wo)
    return y.reshape(n, ho, wo, -1)


def _conv3x3_bias_tanh(x, w, bias, pad):
    n, h, wd, _ = x.shape
    if pad:
        x = jnp.pad(x, ((0, 0), (pad, pad), (pad, pad), (0, 0)))
    ho = h + 2 * pad - 2
    wo = wd + 2 * pad - 2
    patches = _im2col3(x.astype(jnp.bfloat16), ho, wo, 1)
    y = _matmul_bias_tanh(patches, w, bias, m_true=n * ho * wo)
    return y.reshape(n, ho, wo, -1)


# --------------------------- parameter preparation -------------------------- #

def _prep_convT_subpixel(w):
    """ConvTranspose2d weight (Cin,Cout,4,4), stride 2, pad 1 -> (9*Cin, 4*Cout).

    Rows: (tap = oy*3+ox over pad(x,1), Cin).  Cols: (phase = py*2+px, Cout).
    Derived from  o = 2*i + k - 1:
      even output:  xp offset 1 -> k=1, offset 0 -> k=3
      odd  output:  xp offset 1 -> k=2, offset 2 -> k=0
    """
    cin, cout = w.shape[0], w.shape[1]
    tap = ({0: 3, 1: 1}, {1: 2, 2: 0})                 # tap[phase][xp_offset] = k
    zero = jnp.zeros((cin, cout), w.dtype)
    blocks = []
    for oy in range(3):
        for ox in range(3):
            phase_blocks = []
            for py in (0, 1):
                for px in (0, 1):
                    ky = tap[py].get(oy)
                    kx = tap[px].get(ox)
                    phase_blocks.append(zero if (ky is None or kx is None)
                                        else w[:, :, ky, kx])
            blocks.append(jnp.concatenate(phase_blocks, axis=1))   # (Cin, 4*Cout)
    return jnp.concatenate(blocks, axis=0).astype(jnp.bfloat16)    # (9*Cin, 4*Cout)


def _prep_conv_weight(w):
    """Conv2d weight (Cout,Cin,kh,kw) -> (kh*kw*Cin, Cout), im2col order, bf16."""
    cout, cin, kh, kw = w.shape
    return jnp.transpose(w, (2, 3, 1, 0)).reshape(kh * kw * cin, cout).astype(jnp.bfloat16)


def prepare_params(p):
    """One-time weight re-layout + bf16 cast (hoisted out of the forward pass)."""
    q = {}
    cin0 = p["ct0_w"].shape[0]
    # ct0: (Cin,Cout,4,4) -> (Cin, 16*Cout) with cols ordered (pos=ky*4+kx, ch)
    q["w0"] = jnp.transpose(p["ct0_w"], (0, 2, 3, 1)).reshape(cin0, -1).astype(jnp.bfloat16)
    for i in (1, 2, 3):
        q[f"w{i}"] = _prep_convT_subpixel(p[f"ct{i}_w"])
    for i in range(5):
        q[f"bn{i}_g"] = p[f"bn{i}_g"].reshape(1, -1).astype(jnp.float32)
        q[f"bn{i}_b"] = p[f"bn{i}_b"].reshape(1, -1).astype(jnp.float32)
    q["w4"] = _prep_conv_weight(p["c4_w"])
    q["w5"] = _prep_conv_weight(p["c5_w"])
    q["b5"] = p["c5_b"].reshape(1, -1).astype(jnp.float32)
    return q


# ------------------------------ Generator ---------------------------------- #

def init_generator_params(key, in_channels, out_channels, base_channel):
    bc = base_channel
    ks = jax.random.split(key, 16)

    def nrm(k, shape, scale=0.05):
        return scale * jax.random.normal(k, shape, dtype=jnp.float32)

    p = {}
    chans = [in_channels, bc * 8, bc * 4, bc * 2, bc]
    for i in range(4):  # 4 ConvTranspose2d(4x4) + BN blocks
        p[f"ct{i}_w"] = nrm(ks[2 * i], (chans[i], chans[i + 1], 4, 4))   # (Cin,Cout,kh,kw)
        p[f"bn{i}_g"] = 1.0 + 0.1 * jax.random.normal(ks[2 * i + 1], (chans[i + 1],), jnp.float32)
        p[f"bn{i}_b"] = 0.1 * jax.random.normal(ks[8 + i], (chans[i + 1],), jnp.float32)
    # Conv2d(bc, bc, 3, dilation=2, bias=False) + BN
    p["c4_w"] = nrm(ks[12], (bc, bc, 3, 3))                              # (Cout,Cin,kh,kw)
    p["bn4_g"] = 1.0 + 0.1 * jax.random.normal(ks[13], (bc,), jnp.float32)
    p["bn4_b"] = 0.1 * jax.random.normal(ks[14], (bc,), jnp.float32)
    # Conv2d(bc, out_channels, 3, padding=1) with bias
    p["c5_w"] = nrm(ks[15], (out_channels, bc, 3, 3))
    p["c5_b"] = 0.01 * jnp.arange(out_channels, dtype=jnp.float32)
    return p


def generator_forward(z_nchw, q):
    """z_nchw: (N, in_channels, 1, 1)  ->  (N, out_channels, 28, 28)."""
    n = z_nchw.shape[0]
    z = z_nchw.astype(jnp.float32).reshape(n, -1)                         # (N, Cin)
    x = _dense_ct0_bn_lrelu(z, q["w0"], q["bn0_g"], q["bn0_b"])           # (N,4,4,8bc)
    for i in (1, 2, 3):                                                    # 8,16,32
        x = _convT_stride2_bn_lrelu(x, q[f"w{i}"], q[f"bn{i}_g"], q[f"bn{i}_b"])
    x = _conv3x3_bn_lrelu(x, q["w4"], q["bn4_g"], q["bn4_b"], dil=2, pad=0)  # 32 -> 28
    x = _conv3x3_bias_tanh(x, q["w5"], q["b5"], pad=1)                       # 28 -> 28
    return jnp.transpose(x, (0, 3, 1, 2))                                    # NHWC -> NCHW


if __name__ == "__main__":
    N, IN_CH, OUT_CH, BASE_CH = 2, 16, 3, 8
    key = jax.random.PRNGKey(0)
    k_z, k_p = jax.random.split(key)
    z = jax.random.normal(k_z, (N, IN_CH, 1, 1), dtype=jnp.float32)

    params = init_generator_params(k_p, IN_CH, OUT_CH, BASE_CH)
    prepped = prepare_params(params)          # one-time weight re-layout / bf16 cast

    fwd = jax.jit(generator_forward)
    out = jax.block_until_ready(fwd(z, prepped))

    assert out.shape == (N, OUT_CH, 28, 28), out.shape
    assert bool(jnp.all(jnp.isfinite(out)))
    assert bool(jnp.max(jnp.abs(out)) <= 1.0 + 1e-6)  # tanh output range
    print("KERNEL_OK")
</pallas_src>

<mosaic_0001>
module attributes {stable_mosaic.version = 11 : i64} {
  func.func @kernel(%arg0: memref<2x16xbf16, #tpu.memory_space<vmem>>, %arg1: memref<16x1024xbf16, #tpu.memory_space<vmem>>, %arg2: memref<1x64xf32, #tpu.memory_space<vmem>>, %arg3: memref<1x64xf32, #tpu.memory_space<vmem>>, %arg4: memref<2x1024xf32, #tpu.memory_space<vmem>>) attributes {dimension_semantics = [], scalar_prefetch = 0 : i64, scratch_operands = 0 : i64, tpu.core_type = #tpu.core_type<tc>} {
    %c0 = arith.constant 0 : index
    %c0_0 = arith.constant 0 : index
    %0 = vector.load %arg0[%c0, %c0_0] : memref<2x16xbf16, #tpu.memory_space<vmem>>, vector<2x16xbf16>
    %c0_1 = arith.constant 0 : index
    %c0_2 = arith.constant 0 : index
    %1 = vector.load %arg1[%c0_1, %c0_2] : memref<16x1024xbf16, #tpu.memory_space<vmem>>, vector<16x1024xbf16>
    %cst = arith.constant dense<0.000000e+00> : vector<2x1024xf32>
    %2 = tpu.matmul %0, %1, %cst {dimension_numbers = #tpu.dot_dimension_numbers<[1], [0], [0], [1], [0, 0, 1, 1], [], []>} : vector<2x16xbf16>, vector<16x1024xbf16>, vector<2x1024xf32> -> vector<2x1024xf32>
    %cst_3 = arith.constant dense<0.000000e+00> : vector<1024xf32>
    %3 = vector.multi_reduction <add>, %2, %cst_3 [0] : vector<2x1024xf32> to vector<1024xf32>
    %4 = vector.shape_cast %3 : vector<1024xf32> to vector<1x1024xf32>
    %5 = arith.mulf %2, %2 : vector<2x1024xf32>
    %cst_4 = arith.constant dense<0.000000e+00> : vector<1024xf32>
    %6 = vector.multi_reduction <add>, %5, %cst_4 [0] : vector<2x1024xf32> to vector<1024xf32>
    %7 = vector.shape_cast %6 : vector<1024xf32> to vector<1x1024xf32>
    %8 = vector.extract_strided_slice %4 {offsets = [0, 0], sizes = [1, 64], strides = [1, 1]} : vector<1x1024xf32> to vector<1x64xf32>
    %9 = vector.extract_strided_slice %7 {offsets = [0, 0], sizes = [1, 64], strides = [1, 1]} : vector<1x1024xf32> to vector<1x64xf32>
    %10 = vector.extract_strided_slice %4 {offsets = [0, 64], sizes = [1, 64], strides = [1, 1]} : vector<1x1024xf32> to vector<1x64xf32>
    %11 = arith.addf %8, %10 : vector<1x64xf32>
    %12 = vector.extract_strided_slice %7 {offsets = [0, 64], sizes = [1, 64], strides = [1, 1]} : vector<1x1024xf32> to vector<1x64xf32>
    %13 = arith.addf %9, %12 : vector<1x64xf32>
    %14 = vector.extract_strided_slice %4 {offsets = [0, 128], sizes = [1, 64], strides = [1, 1]} : vector<1x1024xf32> to vector<1x64xf32>
    %15 = arith.addf %11, %14 : vector<1x64xf32>
    %16 = vector.extract_strided_slice %7 {offsets = [0, 128], sizes = [1, 64], strides = [1, 1]} : vector<1x1024xf32> to vector<1x64xf32>
    %17 = arith.addf %13, %16 : vector<1x64xf32>
    %18 = vector.extract_strided_slice %4 {offsets = [0, 192], sizes = [1, 64], strides = [1, 1]} : vector<1x1024xf32> to vector<1x64xf32>
    %19 = arith.addf %15, %18 : vector<1x64xf32>
    %20 = vector.extract_strided_slice %7 {offsets = [0, 192], sizes = [1, 64], strides = [1, 1]} : vector<1x1024xf32> to vector<1x64xf32>
    %21 = arith.addf %17, %20 : vector<1x64xf32>
    %22 = vector.extract_strided_slice %4 {offsets = [0, 256], sizes = [1, 64], strides = [1, 1]} : vector<1x1024xf32> to vector<1x64xf32>
    %23 = arith.addf %19, %22 : vector<1x64xf32>
    %24 = vector.extract_strided_slice %7 {offsets = [0, 256], sizes = [1, 64], strides = [1, 1]} : vector<1x1024xf32> to vector<1x64xf32>
    %25 = arith.addf %21, %24 : vector<1x64xf32>
    %26 = vector.extract_strided_slice %4 {offsets = [0, 320], sizes = [1, 64], strides = [1, 1]} : vector<1x1024xf32> to vector<1x64xf32>
    %27 = arith.addf %23, %26 : vector<1x64xf32>
    %28 = vector.extract_strided_slice %7 {offsets = [0, 320], sizes = [1, 64], strides = [1, 1]} : vector<1x1024xf32> to vector<1x64xf32>
    %29 = arith.addf %25, %28 : vector<1x64xf32>
    %30 = vector.extract_strided_slice %4 {offsets = [0, 384], sizes = [1, 64], strides = [1, 1]} : vector<1x1024xf32> to vector<1x64xf32>
    %31 = arith.addf %27, %30 : vector<1x64xf32>
    %32 = vector.extract_strided_slice %7 {offsets = [0, 384], sizes = [1, 64], strides = [1, 1]} : vector<1x1024xf32> to vector<1x64xf32>
    %33 = arith.addf %29, %32 : vector<1x64xf32>
    %34 = vector.extract_strided_slice %4 {offsets = [0, 448], sizes = [1, 64], strides = [1, 1]} : vector<1x1024xf32> to vector<1x64xf32>
    %35 = arith.addf %31, %34 : vector<1x64xf32>
    %36 = vector.extract_strided_slice %7 {offsets = [0, 448], sizes = [1, 64], strides = [1, 1]} : vector<1x1024xf32> to vector<1x64xf32>
    %37 = arith.addf %33, %36 : vector<1x64xf32>
    %38 = vector.extract_strided_slice %4 {offsets = [0, 512], sizes = [1, 64], strides = [1, 1]} : vector<1x1024xf32> to vector<1x64xf32>
    %39 = arith.addf %35, %38 : vector<1x64xf32>
    %40 = vector.extract_strided_slice %7 {offsets = [0, 512], sizes = [1, 64], strides = [1, 1]} : vector<1x1024xf32> to vector<1x64xf32>
    %41 = arith.addf %37, %40 : vector<1x64xf32>
    %42 = vector.extract_strided_slice %4 {offsets = [0, 576], sizes = [1, 64], strides = [1, 1]} : vector<1x1024xf32> to vector<1x64xf32>
    %43 = arith.addf %39, %42 : vector<1x64xf32>
    %44 = vector.extract_strided_slice %7 {offsets = [0, 576], sizes = [1, 64], strides = [1, 1]} : vector<1x1024xf32> to vector<1x64xf32>
    %45 = arith.addf %41, %44 : vector<1x64xf32>
    %46 = vector.extract_strided_slice %4 {offsets = [0, 640], sizes = [1, 64], strides = [1, 1]} : vector<1x1024xf32> to vector<1x64xf32>
    %47 = arith.addf %43, %46 : vector<1x64xf32>
    %48 = vector.extract_strided_slice %7 {offsets = [0, 640], sizes = [1, 64], strides = [1, 1]} : vector<1x1024xf32> to vector<1x64xf32>
    %49 = arith.addf %45, %48 : vector<1x64xf32>
    %50 = vector.extract_strided_slice %4 {offsets = [0, 704], sizes = [1, 64], strides = [1, 1]} : vector<1x1024xf32> to vector<1x64xf32>
    %51 = arith.addf %47, %50 : vector<1x64xf32>
    %52 = vector.extract_strided_slice %7 {offsets = [0, 704], sizes = [1, 64], strides = [1, 1]} : vector<1x1024xf32> to vector<1x64xf32>
    %53 = arith.addf %49, %52 : vector<1x64xf32>
    %54 = vector.extract_strided_slice %4 {offsets = [0, 768], sizes = [1, 64], strides = [1, 1]} : vector<1x1024xf32> to vector<1x64xf32>
    %55 = arith.addf %51, %54 : vector<1x64xf32>
    %56 = vector.extract_strided_slice %7 {offsets = [0, 768], sizes = [1, 64], strides = [1, 1]} : vector<1x1024xf32> to vector<1x64xf32>
    %57 = arith.addf %53, %56 : vector<1x64xf32>
    %58 = vector.extract_strided_slice %4 {offsets = [0, 832], sizes = [1, 64], strides = [1, 1]} : vector<1x1024xf32> to vector<1x64xf32>
    %59 = arith.addf %55, %58 : vector<1x64xf32>
    %60 = vector.extract_strided_slice %7 {offsets = [0, 832], sizes = [1, 64], strides = [1, 1]} : vector<1x1024xf32> to vector<1x64xf32>
    %61 = arith.addf %57, %60 : vector<1x64xf32>
    %62 = vector.extract_strided_slice %4 {offsets = [0, 896], sizes = [1, 64], strides = [1, 1]} : vector<1x1024xf32> to vector<1x64xf32>
    %63 = arith.addf %59, %62 : vector<1x64xf32>
    %64 = vector.extract_strided_slice %7 {offsets = [0, 896], sizes = [1, 64], strides = [1, 1]} : vector<1x1024xf32> to vector<1x64xf32>
    %65 = arith.addf %61, %64 : vector<1x64xf32>
    %66 = vector.extract_strided_slice %4 {offsets = [0, 960], sizes = [1, 64], strides = [1, 1]} : vector<1x1024xf32> to vector<1x64xf32>
    %67 = arith.addf %63, %66 : vector<1x64xf32>
    %68 = vector.extract_strided_slice %7 {offsets = [0, 960], sizes = [1, 64], strides = [1, 1]} : vector<1x1024xf32> to vector<1x64xf32>
    %69 = arith.addf %65, %68 : vector<1x64xf32>
    %cst_5 = arith.constant 3.125000e-02 : f32
    %70 = vector.broadcast %cst_5 : f32 to vector<1x64xf32>
    %71 = arith.mulf %67, %70 : vector<1x64xf32>
    %cst_6 = arith.constant 3.125000e-02 : f32
    %72 = vector.broadcast %cst_6 : f32 to vector<1x64xf32>
    %73 = arith.mulf %69, %72 : vector<1x64xf32>
    %74 = arith.mulf %71, %71 : vector<1x64xf32>
    %75 = arith.subf %73, %74 : vector<1x64xf32>
    %cst_7 = arith.constant 0.000000e+00 : f32
    %76 = vector.broadcast %cst_7 : f32 to vector<1x64xf32>
    %77 = arith.maximumf %75, %76 : vector<1x64xf32>
    %c0_8 = arith.constant 0 : index
    %c0_9 = arith.constant 0 : index
    %78 = vector.load %arg2[%c0_8, %c0_9] : memref<1x64xf32, #tpu.memory_space<vmem>>, vector<1x64xf32>
    %cst_10 = arith.constant 9.99999974E-6 : f32
    %79 = vector.broadcast %cst_10 : f32 to vector<1x64xf32>
    %80 = arith.addf %77, %79 : vector<1x64xf32>
    %81 = math.rsqrt %80 : vector<1x64xf32>
    %82 = arith.mulf %78, %81 : vector<1x64xf32>
    %c0_11 = arith.constant 0 : index
    %c0_12 = arith.constant 0 : index
    %83 = vector.load %arg3[%c0_11, %c0_12] : memref<1x64xf32, #tpu.memory_space<vmem>>, vector<1x64xf32>
    %84 = arith.mulf %71, %82 : vector<1x64xf32>
    %85 = arith.subf %83, %84 : vector<1x64xf32>
    %86 = tpu.concatenate %82, %82, %82, %82, %82, %82, %82, %82, %82, %82, %82, %82, %82, %82, %82, %82 in 1 : vector<1x64xf32>, vector<1x64xf32>, vector<1x64xf32>, vector<1x64xf32>, vector<1x64xf32>, vector<1x64xf32>, vector<1x64xf32>, vector<1x64xf32>, vector<1x64xf32>, vector<1x64xf32>, vector<1x64xf32>, vector<1x64xf32>, vector<1x64xf32>, vector<1x64xf32>, vector<1x64xf32>, vector<1x64xf32> -> vector<1x1024xf32>
    %87 = tpu.concatenate %85, %85, %85, %85, %85, %85, %85, %85, %85, %85, %85, %85, %85, %85, %85, %85 in 1 : vector<1x64xf32>, vector<1x64xf32>, vector<1x64xf32>, vector<1x64xf32>, vector<1x64xf32>, vector<1x64xf32>, vector<1x64xf32>, vector<1x64xf32>, vector<1x64xf32>, vector<1x64xf32>, vector<1x64xf32>, vector<1x64xf32>, vector<1x64xf32>, vector<1x64xf32>, vector<1x64xf32>, vector<1x64xf32> -> vector<1x1024xf32>
    %88 = vector.broadcast %86 : vector<1x1024xf32> to vector<2x1024xf32>
    %89 = arith.mulf %2, %88 : vector<2x1024xf32>
    %90 = vector.broadcast %87 : vector<1x1024xf32> to vector<2x1024xf32>
    %91 = arith.addf %89, %90 : vector<2x1024xf32>
    %cst_13 = arith.constant 0.000000e+00 : f32
    %92 = vector.broadcast %cst_13 : f32 to vector<2x1024xf32>
    %93 = arith.cmpf oge, %91, %92 : vector<2x1024xf32>
    %cst_14 = arith.constant 2.000000e-01 : f32
    %94 = vector.broadcast %cst_14 : f32 to vector<2x1024xf32>
    %95 = arith.mulf %94, %91 : vector<2x1024xf32>
    %96 = arith.select %93, %91, %95 : vector<2x1024xi1>, vector<2x1024xf32>
    %c0_15 = arith.constant 0 : index
    %c0_16 = arith.constant 0 : index
    %97 = vector.load %arg4[%c0_15, %c0_16] : memref<2x1024xf32, #tpu.memory_space<vmem>>, vector<2x1024xf32>
    tpu.vector_store %arg4[%c0_15, %c0_16], %96 {strides = array<i32>} : memref<2x1024xf32, #tpu.memory_space<vmem>>, vector<2x1024xf32>,
    return
  }
}

module attributes {stable_mosaic.version = 11 : i64} {
  func.func @kernel(%arg0: memref<32x576xbf16, #tpu.memory_space<vmem>>, %arg1: memref<576x128xbf16, #tpu.memory_space<vmem>>, %arg2: memref<1x32xf32, #tpu.memory_space<vmem>>, %arg3: memref<1x32xf32, #tpu.memory_space<vmem>>, %arg4: memref<32x128xf32, #tpu.memory_space<vmem>>) attributes {dimension_semantics = [], scalar_prefetch = 0 : i64, scratch_operands = 0 : i64, tpu.core_type = #tpu.core_type<tc>} {
    %c0 = arith.constant 0 : index
    %c0_0 = arith.constant 0 : index
    %0 = vector.load %arg0[%c0, %c0_0] : memref<32x576xbf16, #tpu.memory_space<vmem>>, vector<32x576xbf16>
    %c0_1 = arith.constant 0 : index
    %c0_2 = arith.constant 0 : index
    %1 = vector.load %arg1[%c0_1, %c0_2] : memref<576x128xbf16, #tpu.memory_space<vmem>>, vector<576x128xbf16>
    %cst = arith.constant dense<0.000000e+00> : vector<32x128xf32>
    %2 = tpu.matmul %0, %1, %cst {dimension_numbers = #tpu.dot_dimension_numbers<[1], [0], [0], [1], [0, 0, 1, 1], [], []>} : vector<32x576xbf16>, vector<576x128xbf16>, vector<32x128xf32> -> vector<32x128xf32>
    %cst_3 = arith.constant dense<0.000000e+00> : vector<128xf32>
    %3 = vector.multi_reduction <add>, %2, %cst_3 [0] : vector<32x128xf32> to vector<128xf32>
    %4 = vector.shape_cast %3 : vector<128xf32> to vector<1x128xf32>
    %5 = arith.mulf %2, %2 : vector<32x128xf32>
    %cst_4 = arith.constant dense<0.000000e+00> : vector<128xf32>
    %6 = vector.multi_reduction <add>, %5, %cst_4 [0] : vector<32x128xf32> to vector<128xf32>
    %7 = vector.shape_cast %6 : vector<128xf32> to vector<1x128xf32>
    %8 = vector.extract_strided_slice %4 {offsets = [0, 0], sizes = [1, 32], strides = [1, 1]} : vector<1x128xf32> to vector<1x32xf32>
    %9 = vector.extract_strided_slice %7 {offsets = [0, 0], sizes = [1, 32], strides = [1, 1]} : vector<1x128xf32> to vector<1x32xf32>
    %10 = vector.extract_strided_slice %4 {offsets = [0, 32], sizes = [1, 32], strides = [1, 1]} : vector<1x128xf32> to vector<1x32xf32>
    %11 = arith.addf %8, %10 : vector<1x32xf32>
    %12 = vector.extract_strided_slice %7 {offsets = [0, 32], sizes = [1, 32], strides = [1, 1]} : vector<1x128xf32> to vector<1x32xf32>
    %13 = arith.addf %9, %12 : vector<1x32xf32>
    %14 = vector.extract_strided_slice %4 {offsets = [0, 64], sizes = [1, 32], strides = [1, 1]} : vector<1x128xf32> to vector<1x32xf32>
    %15 = arith.addf %11, %14 : vector<1x32xf32>
    %16 = vector.extract_strided_slice %7 {offsets = [0, 64], sizes = [1, 32], strides = [1, 1]} : vector<1x128xf32> to vector<1x32xf32>
    %17 = arith.addf %13, %16 : vector<1x32xf32>
    %18 = vector.extract_strided_slice %4 {offsets = [0, 96], sizes = [1, 32], strides = [1, 1]} : vector<1x128xf32> to vector<1x32xf32>
    %19 = arith.addf %15, %18 : vector<1x32xf32>
    %20 = vector.extract_strided_slice %7 {offsets = [0, 96], sizes = [1, 32], strides = [1, 1]} : vector<1x128xf32> to vector<1x32xf32>
    %21 = arith.addf %17, %20 : vector<1x32xf32>
    %cst_5 = arith.constant 7.812500e-03 : f32
    %22 = vector.broadcast %cst_5 : f32 to vector<1x32xf32>
    %23 = arith.mulf %19, %22 : vector<1x32xf32>
    %cst_6 = arith.constant 7.812500e-03 : f32
    %24 = vector.broadcast %cst_6 : f32 to vector<1x32xf32>
    %25 = arith.mulf %21, %24 : vector<1x32xf32>
    %26 = arith.mulf %23, %23 : vector<1x32xf32>
    %27 = arith.subf %25, %26 : vector<1x32xf32>
    %cst_7 = arith.constant 0.000000e+00 : f32
    %28 = vector.broadcast %cst_7 : f32 to vector<1x32xf32>
    %29 = arith.maximumf %27, %28 : vector<1x32xf32>
    %c0_8 = arith.constant 0 : index
    %c0_9 = arith.constant 0 : index
    %30 = vector.load %arg2[%c0_8, %c0_9] : memref<1x32xf32, #tpu.memory_space<vmem>>, vector<1x32xf32>
    %cst_10 = arith.constant 9.99999974E-6 : f32
    %31 = vector.broadcast %cst_10 : f32 to vector<1x32xf32>
    %32 = arith.addf %29, %31 : vector<1x32xf32>
    %33 = math.rsqrt %32 : vector<1x32xf32>
    %34 = arith.mulf %30, %33 : vector<1x32xf32>
    %c0_11 = arith.constant 0 : index
    %c0_12 = arith.constant 0 : index
    %35 = vector.load %arg3[%c0_11, %c0_12] : memref<1x32xf32, #tpu.memory_space<vmem>>, vector<1x32xf32>
    %36 = arith.mulf %23, %34 : vector<1x32xf32>
    %37 = arith.subf %35, %36 : vector<1x32xf32>
    %38 = tpu.concatenate %34, %34, %34, %34 in 1 : vector<1x32xf32>, vector<1x32xf32>, vector<1x32xf32>, vector<1x32xf32> -> vector<1x128xf32>
    %39 = tpu.concatenate %37, %37, %37, %37 in 1 : vector<1x32xf32>, vector<1x32xf32>, vector<1x32xf32>, vector<1x32xf32> -> vector<1x128xf32>
    %40 = vector.broadcast %38 : vector<1x128xf32> to vector<32x128xf32>
    %41 = arith.mulf %2, %40 : vector<32x128xf32>
    %42 = vector.broadcast %39 : vector<1x128xf32> to vector<32x128xf32>
    %43 = arith.addf %41, %42 : vector<32x128xf32>
    %cst_13 = arith.constant 0.000000e+00 : f32
    %44 = vector.broadcast %cst_13 : f32 to vector<32x128xf32>
    %45 = arith.cmpf oge, %43, %44 : vector<32x128xf32>
    %cst_14 = arith.constant 2.000000e-01 : f32
    %46 = vector.broadcast %cst_14 : f32 to vector<32x128xf32>
    %47 = arith.mulf %46, %43 : vector<32x128xf32>
    %48 = arith.select %45, %43, %47 : vector<32x128xi1>, vector<32x128xf32>
    %c0_15 = arith.constant 0 : index
    %c0_16 = arith.constant 0 : index
    %49 = vector.load %arg4[%c0_15, %c0_16] : memref<32x128xf32, #tpu.memory_space<vmem>>, vector<32x128xf32>
    tpu.vector_store %arg4[%c0_15, %c0_16], %48 {strides = array<i32>} : memref<32x128xf32, #tpu.memory_space<vmem>>, vector<32x128xf32>,
    return
  }
}

module attributes {stable_mosaic.version = 11 : i64} {
  func.func @kernel(%arg0: memref<128x288xbf16, #tpu.memory_space<vmem>>, %arg1: memref<288x64xbf16, #tpu.memory_space<vmem>>, %arg2: memref<1x16xf32, #tpu.memory_space<vmem>>, %arg3: memref<1x16xf32, #tpu.memory_space<vmem>>, %arg4: memref<128x64xf32, #tpu.memory_space<vmem>>) attributes {dimension_semantics = [], scalar_prefetch = 0 : i64, scratch_operands = 0 : i64, tpu.core_type = #tpu.core_type<tc>} {
    %c0 = arith.constant 0 : index
    %c0_0 = arith.constant 0 : index
    %0 = vector.load %arg0[%c0, %c0_0] : memref<128x288xbf16, #tpu.memory_space<vmem>>, vector<128x288xbf16>
    %c0_1 = arith.constant 0 : index
    %c0_2 = arith.constant 0 : index
    %1 = vector.load %arg1[%c0_1, %c0_2] : memref<288x64xbf16, #tpu.memory_space<vmem>>, vector<288x64xbf16>
    %cst = arith.constant dense<0.000000e+00> : vector<128x64xf32>
    %2 = tpu.matmul %0, %1, %cst {dimension_numbers = #tpu.dot_dimension_numbers<[1], [0], [0], [1], [0, 0, 1, 1], [], []>} : vector<128x288xbf16>, vector<288x64xbf16>, vector<128x64xf32> -> vector<128x64xf32>
    %cst_3 = arith.constant dense<0.000000e+00> : vector<64xf32>
    %3 = vector.multi_reduction <add>, %2, %cst_3 [0] : vector<128x64xf32> to vector<64xf32>
    %4 = vector.shape_cast %3 : vector<64xf32> to vector<1x64xf32>
    %5 = arith.mulf %2, %2 : vector<128x64xf32>
    %cst_4 = arith.constant dense<0.000000e+00> : vector<64xf32>
    %6 = vector.multi_reduction <add>, %5, %cst_4 [0] : vector<128x64xf32> to vector<64xf32>
    %7 = vector.shape_cast %6 : vector<64xf32> to vector<1x64xf32>
    %8 = vector.extract_strided_slice %4 {offsets = [0, 0], sizes = [1, 16], strides = [1, 1]} : vector<1x64xf32> to vector<1x16xf32>
    %9 = vector.extract_strided_slice %7 {offsets = [0, 0], sizes = [1, 16], strides = [1, 1]} : vector<1x64xf32> to vector<1x16xf32>
    %10 = vector.extract_strided_slice %4 {offsets = [0, 16], sizes = [1, 16], strides = [1, 1]} : vector<1x64xf32> to vector<1x16xf32>
    %11 = arith.addf %8, %10 : vector<1x16xf32>
    %12 = vector.extract_strided_slice %7 {offsets = [0, 16], sizes = [1, 16], strides = [1, 1]} : vector<1x64xf32> to vector<1x16xf32>
    %13 = arith.addf %9, %12 : vector<1x16xf32>
    %14 = vector.extract_strided_slice %4 {offsets = [0, 32], sizes = [1, 16], strides = [1, 1]} : vector<1x64xf32> to vector<1x16xf32>
    %15 = arith.addf %11, %14 : vector<1x16xf32>
    %16 = vector.extract_strided_slice %7 {offsets = [0, 32], sizes = [1, 16], strides = [1, 1]} : vector<1x64xf32> to vector<1x16xf32>
    %17 = arith.addf %13, %16 : vector<1x16xf32>
    %18 = vector.extract_strided_slice %4 {offsets = [0, 48], sizes = [1, 16], strides = [1, 1]} : vector<1x64xf32> to vector<1x16xf32>
    %19 = arith.addf %15, %18 : vector<1x16xf32>
    %20 = vector.extract_strided_slice %7 {offsets = [0, 48], sizes = [1, 16], strides = [1, 1]} : vector<1x64xf32> to vector<1x16xf32>
    %21 = arith.addf %17, %20 : vector<1x16xf32>
    %cst_5 = arith.constant 0.001953125 : f32
    %22 = vector.broadcast %cst_5 : f32 to vector<1x16xf32>
    %23 = arith.mulf %19, %22 : vector<1x16xf32>
    %cst_6 = arith.constant 0.001953125 : f32
    %24 = vector.broadcast %cst_6 : f32 to vector<1x16xf32>
    %25 = arith.mulf %21, %24 : vector<1x16xf32>
    %26 = arith.mulf %23, %23 : vector<1x16xf32>
    %27 = arith.subf %25, %26 : vector<1x16xf32>
    %cst_7 = arith.constant 0.000000e+00 : f32
    %28 = vector.broadcast %cst_7 : f32 to vector<1x16xf32>
    %29 = arith.maximumf %27, %28 : vector<1x16xf32>
    %c0_8 = arith.constant 0 : index
    %c0_9 = arith.constant 0 : index
    %30 = vector.load %arg2[%c0_8, %c0_9] : memref<1x16xf32, #tpu.memory_space<vmem>>, vector<1x16xf32>
    %cst_10 = arith.constant 9.99999974E-6 : f32
    %31 = vector.broadcast %cst_10 : f32 to vector<1x16xf32>
    %32 = arith.addf %29, %31 : vector<1x16xf32>
    %33 = math.rsqrt %32 : vector<1x16xf32>
    %34 = arith.mulf %30, %33 : vector<1x16xf32>
    %c0_11 = arith.constant 0 : index
    %c0_12 = arith.constant 0 : index
    %35 = vector.load %arg3[%c0_11, %c0_12] : memref<1x16xf32, #tpu.memory_space<vmem>>, vector<1x16xf32>
    %36 = arith.mulf %23, %34 : vector<1x16xf32>
    %37 = arith.subf %35, %36 : vector<1x16xf32>
    %38 = tpu.concatenate %34, %34, %34, %34 in 1 : vector<1x16xf32>, vector<1x16xf32>, vector<1x16xf32>, vector<1x16xf32> -> vector<1x64xf32>
    %39 = tpu.concatenate %37, %37, %37, %37 in 1 : vector<1x16xf32>, vector<1x16xf32>, vector<1x16xf32>, vector<1x16xf32> -> vector<1x64xf32>
    %40 = vector.broadcast %38 : vector<1x64xf32> to vector<128x64xf32>
    %41 = arith.mulf %2, %40 : vector<128x64xf32>
    %42 = vector.broadcast %39 : vector<1x64xf32> to vector<128x64xf32>
    %43 = arith.addf %41, %42 : vector<128x64xf32>
    %cst_13 = arith.constant 0.000000e+00 : f32
    %44 = vector.broadcast %cst_13 : f32 to vector<128x64xf32>
    %45 = arith.cmpf oge, %43, %44 : vector<128x64xf32>
    %cst_14 = arith.constant 2.000000e-01 : f32
    %46 = vector.broadcast %cst_14 : f32 to vector<128x64xf32>
    %47 = arith.mulf %46, %43 : vector<128x64xf32>
    %48 = arith.select %45, %43, %47 : vector<128x64xi1>, vector<128x64xf32>
    %c0_15 = arith.constant 0 : index
    %c0_16 = arith.constant 0 : index
    %49 = vector.load %arg4[%c0_15, %c0_16] : memref<128x64xf32, #tpu.memory_space<vmem>>, vector<128x64xf32>
    tpu.vector_store %arg4[%c0_15, %c0_16], %48 {strides = array<i32>} : memref<128x64xf32, #tpu.memory_space<vmem>>, vector<128x64xf32>,
    return
  }
}

module attributes {stable_mosaic.version = 11 : i64} {
  func.func @kernel(%arg0: memref<512x144xbf16, #tpu.memory_space<vmem>>, %arg1: memref<144x32xbf16, #tpu.memory_space<vmem>>, %arg2: memref<1x8xf32, #tpu.memory_space<vmem>>, %arg3: memref<1x8xf32, #tpu.memory_space<vmem>>, %arg4: memref<512x32xf32, #tpu.memory_space<vmem>>) attributes {dimension_semantics = [], scalar_prefetch = 0 : i64, scratch_operands = 0 : i64, tpu.core_type = #tpu.core_type<tc>} {
    %c0 = arith.constant 0 : index
    %c0_0 = arith.constant 0 : index
    %0 = vector.load %arg0[%c0, %c0_0] : memref<512x144xbf16, #tpu.memory_space<vmem>>, vector<512x144xbf16>
    %c0_1 = arith.constant 0 : index
    %c0_2 = arith.constant 0 : index
    %1 = vector.load %arg1[%c0_1, %c0_2] : memref<144x32xbf16, #tpu.memory_space<vmem>>, vector<144x32xbf16>
    %cst = arith.constant dense<0.000000e+00> : vector<512x32xf32>
    %2 = tpu.matmul %0, %1, %cst {dimension_numbers = #tpu.dot_dimension_numbers<[1], [0], [0], [1], [0, 0, 1, 1], [], []>} : vector<512x144xbf16>, vector<144x32xbf16>, vector<512x32xf32> -> vector<512x32xf32>
    %cst_3 = arith.constant dense<0.000000e+00> : vector<32xf32>
    %3 = vector.multi_reduction <add>, %2, %cst_3 [0] : vector<512x32xf32> to vector<32xf32>
    %4 = vector.shape_cast %3 : vector<32xf32> to vector<1x32xf32>
    %5 = arith.mulf %2, %2 : vector<512x32xf32>
    %cst_4 = arith.constant dense<0.000000e+00> : vector<32xf32>
    %6 = vector.multi_reduction <add>, %5, %cst_4 [0] : vector<512x32xf32> to vector<32xf32>
    %7 = vector.shape_cast %6 : vector<32xf32> to vector<1x32xf32>
    %8 = vector.extract_strided_slice %4 {offsets = [0, 0], sizes = [1, 8], strides = [1, 1]} : vector<1x32xf32> to vector<1x8xf32>
    %9 = vector.extract_strided_slice %7 {offsets = [0, 0], sizes = [1, 8], strides = [1, 1]} : vector<1x32xf32> to vector<1x8xf32>
    %10 = vector.extract_strided_slice %4 {offsets = [0, 8], sizes = [1, 8], strides = [1, 1]} : vector<1x32xf32> to vector<1x8xf32>
    %11 = arith.addf %8, %10 : vector<1x8xf32>
    %12 = vector.extract_strided_slice %7 {offsets = [0, 8], sizes = [1, 8], strides = [1, 1]} : vector<1x32xf32> to vector<1x8xf32>
    %13 = arith.addf %9, %12 : vector<1x8xf32>
    %14 = vector.extract_strided_slice %4 {offsets = [0, 16], sizes = [1, 8], strides = [1, 1]} : vector<1x32xf32> to vector<1x8xf32>
    %15 = arith.addf %11, %14 : vector<1x8xf32>
    %16 = vector.extract_strided_slice %7 {offsets = [0, 16], sizes = [1, 8], strides = [1, 1]} : vector<1x32xf32> to vector<1x8xf32>
    %17 = arith.addf %13, %16 : vector<1x8xf32>
    %18 = vector.extract_strided_slice %4 {offsets = [0, 24], sizes = [1, 8], strides = [1, 1]} : vector<1x32xf32> to vector<1x8xf32>
    %19 = arith.addf %15, %18 : vector<1x8xf32>
    %20 = vector.extract_strided_slice %7 {offsets = [0, 24], sizes = [1, 8], strides = [1, 1]} : vector<1x32xf32> to vector<1x8xf32>
    %21 = arith.addf %17, %20 : vector<1x8xf32>
    %cst_5 = arith.constant 4.8828125E-4 : f32
    %22 = vector.broadcast %cst_5 : f32 to vector<1x8xf32>
    %23 = arith.mulf %19, %22 : vector<1x8xf32>
    %cst_6 = arith.constant 4.8828125E-4 : f32
    %24 = vector.broadcast %cst_6 : f32 to vector<1x8xf32>
    %25 = arith.mulf %21, %24 : vector<1x8xf32>
    %26 = arith.mulf %23, %23 : vector<1x8xf32>
    %27 = arith.subf %25, %26 : vector<1x8xf32>
    %cst_7 = arith.constant 0.000000e+00 : f32
    %28 = vector.broadcast %cst_7 : f32 to vector<1x8xf32>
    %29 = arith.maximumf %27, %28 : vector<1x8xf32>
    %c0_8 = arith.constant 0 : index
    %c0_9 = arith.constant 0 : index
    %30 = vector.load %arg2[%c0_8, %c0_9] : memref<1x8xf32, #tpu.memory_space<vmem>>, vector<1x8xf32>
    %cst_10 = arith.constant 9.99999974E-6 : f32
    %31 = vector.broadcast %cst_10 : f32 to vector<1x8xf32>
    %32 = arith.addf %29, %31 : vector<1x8xf32>
    %33 = math.rsqrt %32 : vector<1x8xf32>
    %34 = arith.mulf %30, %33 : vector<1x8xf32>
    %c0_11 = arith.constant 0 : index
    %c0_12 = arith.constant 0 : index
    %35 = vector.load %arg3[%c0_11, %c0_12] : memref<1x8xf32, #tpu.memory_space<vmem>>, vector<1x8xf32>
    %36 = arith.mulf %23, %34 : vector<1x8xf32>
    %37 = arith.subf %35, %36 : vector<1x8xf32>
    %38 = tpu.concatenate %34, %34, %34, %34 in 1 : vector<1x8xf32>, vector<1x8xf32>, vector<1x8xf32>, vector<1x8xf32> -> vector<1x32xf32>
    %39 = tpu.concatenate %37, %37, %37, %37 in 1 : vector<1x8xf32>, vector<1x8xf32>, vector<1x8xf32>, vector<1x8xf32> -> vector<1x32xf32>
    %40 = vector.broadcast %38 : vector<1x32xf32> to vector<512x32xf32>
    %41 = arith.mulf %2, %40 : vector<512x32xf32>
    %42 = vector.broadcast %39 : vector<1x32xf32> to vector<512x32xf32>
    %43 = arith.addf %41, %42 : vector<512x32xf32>
    %cst_13 = arith.constant 0.000000e+00 : f32
    %44 = vector.broadcast %cst_13 : f32 to vector<512x32xf32>
    %45 = arith.cmpf oge, %43, %44 : vector<512x32xf32>
    %cst_14 = arith.constant 2.000000e-01 : f32
    %46 = vector.broadcast %cst_14 : f32 to vector<512x32xf32>
    %47 = arith.mulf %46, %43 : vector<512x32xf32>
    %48 = arith.select %45, %43, %47 : vector<512x32xi1>, vector<512x32xf32>
    %c0_15 = arith.constant 0 : index
    %c0_16 = arith.constant 0 : index
    %49 = vector.load %arg4[%c0_15, %c0_16] : memref<512x32xf32, #tpu.memory_space<vmem>>, vector<512x32xf32>
    tpu.vector_store %arg4[%c0_15, %c0_16], %48 {strides = array<i32>} : memref<512x32xf32, #tpu.memory_space<vmem>>, vector<512x32xf32>,
    return
  }
}

module attributes {stable_mosaic.version = 11 : i64} {
  func.func @_matmul_stats_kernel(%arg0: i32, %arg1: memref<256x72xbf16, #tpu.memory_space<vmem>>, %arg2: memref<72x8xbf16, #tpu.memory_space<vmem>>, %arg3: memref<256x8xf32, #tpu.memory_space<vmem>>, %arg4: memref<1x2x8xf32, #tpu.memory_space<vmem>>) attributes {dimension_semantics = [#tpu.dimension_semantics<parallel>], iteration_bounds = array<i64: 7>, scalar_prefetch = 0 : i64, scratch_operands = 0 : i64, tpu.core_type = #tpu.core_type<tc>, window_params = [{transform_indices = @transform_0, window_bounds = array<i64: 256, 72>}, {pipeline_mode = #tpu.pipeline_mode<synchronous>, transform_indices = @transform_1, window_bounds = array<i64: 72, 8>}, {transform_indices = @transform_2, window_bounds = array<i64: 256, 8>}, {transform_indices = @transform_3, window_bounds = array<i64: 1, 2, 8>}]} {
    %c0 = arith.constant 0 : index
    %c0_0 = arith.constant 0 : index
    %0 = vector.load %arg1[%c0, %c0_0] : memref<256x72xbf16, #tpu.memory_space<vmem>>, vector<256x72xbf16>
    %c0_1 = arith.constant 0 : index
    %c0_2 = arith.constant 0 : index
    %1 = vector.load %arg2[%c0_1, %c0_2] : memref<72x8xbf16, #tpu.memory_space<vmem>>, vector<72x8xbf16>
    %cst = arith.constant dense<0.000000e+00> : vector<256x8xf32>
    %2 = tpu.matmul %0, %1, %cst {dimension_numbers = #tpu.dot_dimension_numbers<[1], [0], [0], [1], [0, 0, 1, 1], [], []>} : vector<256x72xbf16>, vector<72x8xbf16>, vector<256x8xf32> -> vector<256x8xf32>
    %c0_3 = arith.constant 0 : index
    %c0_4 = arith.constant 0 : index
    %3 = vector.load %arg3[%c0_3, %c0_4] : memref<256x8xf32, #tpu.memory_space<vmem>>, vector<256x8xf32>
    tpu.vector_store %arg3[%c0_3, %c0_4], %2 {strides = array<i32>} : memref<256x8xf32, #tpu.memory_space<vmem>>, vector<256x8xf32>,
    %cst_5 = arith.constant dense<0.000000e+00> : vector<8xf32>
    %4 = vector.multi_reduction <add>, %2, %cst_5 [0] : vector<256x8xf32> to vector<8xf32>
    %5 = vector.shape_cast %4 : vector<8xf32> to vector<1x8xf32>
    %c0_6 = arith.constant 0 : index
    %c0_7 = arith.constant 0 : index
    %c0_8 = arith.constant 0 : index
    %6 = vector.load %arg4[%c0_6, %c0_7, %c0_8] : memref<1x2x8xf32, #tpu.memory_space<vmem>>, vector<1x1x8xf32>
    %7 = vector.shape_cast %6 : vector<1x1x8xf32> to vector<1x8xf32>
    %8 = vector.shape_cast %5 : vector<1x8xf32> to vector<1x1x8xf32>
    tpu.vector_store %arg4[%c0_6, %c0_7, %c0_8], %8 {strides = array<i32>} : memref<1x2x8xf32, #tpu.memory_space<vmem>>, vector<1x1x8xf32>,
    %9 = arith.mulf %2, %2 : vector<256x8xf32>
    %cst_9 = arith.constant dense<0.000000e+00> : vector<8xf32>
    %10 = vector.multi_reduction <add>, %9, %cst_9 [0] : vector<256x8xf32> to vector<8xf32>
    %11 = vector.shape_cast %10 : vector<8xf32> to vector<1x8xf32>
    %c0_10 = arith.constant 0 : index
    %c1 = arith.constant 1 : index
    %c0_11 = arith.constant 0 : index
    %12 = vector.load %arg4[%c0_10, %c1, %c0_11] : memref<1x2x8xf32, #tpu.memory_space<vmem>>, vector<1x1x8xf32>
    %13 = vector.shape_cast %12 : vector<1x1x8xf32> to vector<1x8xf32>
    %14 = vector.shape_cast %11 : vector<1x8xf32> to vector<1x1x8xf32>
    tpu.vector_store %arg4[%c0_10, %c1, %c0_11], %14 {strides = array<i32>} : memref<1x2x8xf32, #tpu.memory_space<vmem>>, vector<1x1x8xf32>,
    return
  }
  func.func @transform_0(%arg0: i32) -> (i32, i32) {
    %c0_i32 = arith.constant 0 : i32
    %c0_i32_0 = arith.constant 0 : i32
    return %arg0, %c0_i32 : i32, i32
  }
  func.func @transform_1(%arg0: i32) -> (i32, i32) {
    %c0_i32 = arith.constant 0 : i32
    %c0_i32_0 = arith.constant 0 : i32
    %c0_i32_1 = arith.constant 0 : i32
    return %c0_i32, %c0_i32_0 : i32, i32
  }
  func.func @transform_2(%arg0: i32) -> (i32, i32) {
    %c0_i32 = arith.constant 0 : i32
    %c0_i32_0 = arith.constant 0 : i32
    return %arg0, %c0_i32 : i32, i32
  }
  func.func @transform_3(%arg0: i32) -> (i32, i32, i32) {
    %c0_i32 = arith.constant 0 : i32
    %c0_i32_0 = arith.constant 0 : i32
    %c0_i32_1 = arith.constant 0 : i32
    return %arg0, %c0_i32, %c0_i32_0 : i32, i32, i32
  }
}

module attributes {stable_mosaic.version = 11 : i64} {
  func.func @_scale_shift_lrelu_kernel(%arg0: i32, %arg1: memref<256x8xf32, #tpu.memory_space<vmem>>, %arg2: memref<1x8xf32, #tpu.memory_space<vmem>>, %arg3: memref<1x8xf32, #tpu.memory_space<vmem>>, %arg4: memref<256x8xf32, #tpu.memory_space<vmem>>) attributes {dimension_semantics = [#tpu.dimension_semantics<parallel>], iteration_bounds = array<i64: 7>, scalar_prefetch = 0 : i64, scratch_operands = 0 : i64, tpu.core_type = #tpu.core_type<tc>, window_params = [{transform_indices = @transform_0, window_bounds = array<i64: 256, 8>}, {pipeline_mode = #tpu.pipeline_mode<synchronous>, transform_indices = @transform_1, window_bounds = array<i64: 1, 8>}, {pipeline_mode = #tpu.pipeline_mode<synchronous>, transform_indices = @transform_2, window_bounds = array<i64: 1, 8>}, {transform_indices = @transform_3, window_bounds = array<i64: 256, 8>}]} {
    %c0 = arith.constant 0 : index
    %c0_0 = arith.constant 0 : index
    %0 = vector.load %arg1[%c0, %c0_0] : memref<256x8xf32, #tpu.memory_space<vmem>>, vector<256x8xf32>
    %c0_1 = arith.constant 0 : index
    %c0_2 = arith.constant 0 : index
    %1 = vector.load %arg2[%c0_1, %c0_2] : memref<1x8xf32, #tpu.memory_space<vmem>>, vector<1x8xf32>
    %2 = vector.broadcast %1 : vector<1x8xf32> to vector<256x8xf32>
    %3 = arith.mulf %0, %2 : vector<256x8xf32>
    %c0_3 = arith.constant 0 : index
    %c0_4 = arith.constant 0 : index
    %4 = vector.load %arg3[%c0_3, %c0_4] : memref<1x8xf32, #tpu.memory_space<vmem>>, vector<1x8xf32>
    %5 = vector.broadcast %4 : vector<1x8xf32> to vector<256x8xf32>
    %6 = arith.addf %3, %5 : vector<256x8xf32>
    %cst = arith.constant 0.000000e+00 : f32
    %7 = vector.broadcast %cst : f32 to vector<256x8xf32>
    %8 = arith.cmpf oge, %6, %7 : vector<256x8xf32>
    %cst_5 = arith.constant 2.000000e-01 : f32
    %9 = vector.broadcast %cst_5 : f32 to vector<256x8xf32>
    %10 = arith.mulf %9, %6 : vector<256x8xf32>
    %11 = arith.select %8, %6, %10 : vector<256x8xi1>, vector<256x8xf32>
    %c0_6 = arith.constant 0 : index
    %c0_7 = arith.constant 0 : index
    %12 = vector.load %arg4[%c0_6, %c0_7] : memref<256x8xf32, #tpu.memory_space<vmem>>, vector<256x8xf32>
    tpu.vector_store %arg4[%c0_6, %c0_7], %11 {strides = array<i32>} : memref<256x8xf32, #tpu.memory_space<vmem>>, vector<256x8xf32>,
    return
  }
  func.func @transform_0(%arg0: i32) -> (i32, i32) {
    %c0_i32 = arith.constant 0 : i32
    %c0_i32_0 = arith.constant 0 : i32
    return %arg0, %c0_i32 : i32, i32
  }
  func.func @transform_1(%arg0: i32) -> (i32, i32) {
    %c0_i32 = arith.constant 0 : i32
    %c0_i32_0 = arith.constant 0 : i32
    %c0_i32_1 = arith.constant 0 : i32
    return %c0_i32, %c0_i32_0 : i32, i32
  }
  func.func @transform_2(%arg0: i32) -> (i32, i32) {
    %c0_i32 = arith.constant 0 : i32
    %c0_i32_0 = arith.constant 0 : i32
    %c0_i32_1 = arith.constant 0 : i32
    return %c0_i32, %c0_i32_0 : i32, i32
  }
  func.func @transform_3(%arg0: i32) -> (i32, i32) {
    %c0_i32 = arith.constant 0 : i32
    %c0_i32_0 = arith.constant 0 : i32
    return %arg0, %c0_i32 : i32, i32
  }
}

module attributes {stable_mosaic.version = 11 : i64} {
  func.func @_matmul_bias_tanh_kernel(%arg0: i32, %arg1: memref<256x72xbf16, #tpu.memory_space<vmem>>, %arg2: memref<72x3xbf16, #tpu.memory_space<vmem>>, %arg3: memref<1x3xf32, #tpu.memory_space<vmem>>, %arg4: memref<256x3xf32, #tpu.memory_space<vmem>>) attributes {dimension_semantics = [#tpu.dimension_semantics<parallel>], iteration_bounds = array<i64: 7>, scalar_prefetch = 0 : i64, scratch_operands = 0 : i64, tpu.core_type = #tpu.core_type<tc>, window_params = [{transform_indices = @transform_0, window_bounds = array<i64: 256, 72>}, {pipeline_mode = #tpu.pipeline_mode<synchronous>, transform_indices = @transform_1, window_bounds = array<i64: 72, 3>}, {pipeline_mode = #tpu.pipeline_mode<synchronous>, transform_indices = @transform_2, window_bounds = array<i64: 1, 3>}, {transform_indices = @transform_3, window_bounds = array<i64: 256, 3>}]} {
    %c0 = arith.constant 0 : index
    %c0_0 = arith.constant 0 : index
    %0 = vector.load %arg1[%c0, %c0_0] : memref<256x72xbf16, #tpu.memory_space<vmem>>, vector<256x72xbf16>
    %c0_1 = arith.constant 0 : index
    %c0_2 = arith.constant 0 : index
    %1 = vector.load %arg2[%c0_1, %c0_2] : memref<72x3xbf16, #tpu.memory_space<vmem>>, vector<72x3xbf16>
    %cst = arith.constant dense<0.000000e+00> : vector<256x3xf32>
    %2 = tpu.matmul %0, %1, %cst {dimension_numbers = #tpu.dot_dimension_numbers<[1], [0], [0], [1], [0, 0, 1, 1], [], []>} : vector<256x72xbf16>, vector<72x3xbf16>, vector<256x3xf32> -> vector<256x3xf32>
    %c0_3 = arith.constant 0 : index
    %c0_4 = arith.constant 0 : index
    %3 = vector.load %arg3[%c0_3, %c0_4] : memref<1x3xf32, #tpu.memory_space<vmem>>, vector<1x3xf32>
    %4 = vector.broadcast %3 : vector<1x3xf32> to vector<256x3xf32>
    %5 = arith.addf %2, %4 : vector<256x3xf32>
    %6 = math.tanh %5 : vector<256x3xf32>
    %c0_5 = arith.constant 0 : index
    %c0_6 = arith.constant 0 : index
    %7 = vector.load %arg4[%c0_5, %c0_6] : memref<256x3xf32, #tpu.memory_space<vmem>>, vector<256x3xf32>
    tpu.vector_store %arg4[%c0_5, %c0_6], %6 {strides = array<i32>} : memref<256x3xf32, #tpu.memory_space<vmem>>, vector<256x3xf32>,
    return
  }
  func.func @transform_0(%arg0: i32) -> (i32, i32) {
    %c0_i32 = arith.constant 0 : i32
    %c0_i32_0 = arith.constant 0 : i32
    return %arg0, %c0_i32 : i32, i32
  }
  func.func @transform_1(%arg0: i32) -> (i32, i32) {
    %c0_i32 = arith.constant 0 : i32
    %c0_i32_0 = arith.constant 0 : i32
    %c0_i32_1 = arith.constant 0 : i32
    return %c0_i32, %c0_i32_0 : i32, i32
  }
  func.func @transform_2(%arg0: i32) -> (i32, i32) {
    %c0_i32 = arith.constant 0 : i32
    %c0_i32_0 = arith.constant 0 : i32
    %c0_i32_1 = arith.constant 0 : i32
    return %c0_i32, %c0_i32_0 : i32, i32
  }
  func.func @transform_3(%arg0: i32) -> (i32, i32) {
    %c0_i32 = arith.constant 0 : i32
    %c0_i32_0 = arith.constant 0 : i32
    return %arg0, %c0_i32 : i32, i32
  }
}

</mosaic_0001>

<bundles_post_ra>
// kernel: generator_forward.7
= control target key start
LH: loop header
LB: loop body
LE: loop exit
PB: predicated region body
PF: predicated region fallthrough
CT: control target
= control target key end

     0   :  { %9 = vsyncpa [#allocation3], 0  ;;  %s905_s0 = inlined_call_operand.vmem [shape: bf16[2,16], index: 0, kind: input, shape index: {}]   ;;  %s906_s1 = inlined_call_operand.hbm [shape: bf16[16,1024], index: 1, kind: input, shape index: {}]   ;;  %s907_s2 = inlined_call_operand.hbm [shape: f32[1,64], index: 2, kind: input, shape index: {}]   ;;  %s908_s3 = inlined_call_operand.hbm [shape: f32[1,64], index: 3, kind: input, shape index: {}]   ;;  %s909_s4 = inlined_call_operand.vmem [shape: f32[2,1024], index: 4, kind: output, shape index: {}]  }
   0x1   :  { %10 = vsyncpa [#allocation5], 0  ;;  %s710_s15 = smov [#allocation4]   ;;  %s711_s17 = smov [#allocation2]  }
   0x2   :  { %s31_s16 = sshll.u32 %s710_s15, 4  ;;  %s18_s18 = sshll.u32 %s711_s17, 4  ;;  %s32_s16 = int_to_ptr.vmem [resolvable:$true] %s31_s16  ;;  %s743_s18 = int_to_ptr.vmem [resolvable:$true] %s18_s18 }
   0x3   :  { %s640_s21 = scalar_lea.hbm %s907_s2, 16 }
   0x4   :  { %p641_p0 = scmp.ne.s32.totalorder %s907_s2, %s640_s21  ;;  %p644_p1 = scmp.lt.u32.totalorder %s640_s21, %s907_s2 }
   0x6   :  { %p646_p2 = pnand %p644_p1, %p641_p0 }
   0x8   :  { %649 = shalt.err (!%p646_p2)
}
   0x9   :  { %s650_s26 = scalar_lea.vmem %s32_s16, 16  ;;  %s654_s27 = scalar_lea.vmem %s32_s16, 32 }
   0xa   :  { %p651_p3 = scmp.ne.s32.totalorder %s32_s16, %s650_s26  ;;  %p655_p4 = scmp.lt.s32.totalorder %s32_s16, %s32_s16 }
   0xb   :  { %p656_p5 = scmp.lt.s32.totalorder %s654_s27, %s650_s26 }
   0xd   :  { %p657_p6 = por %p656_p5, %p655_p4 }
   0xf   :  { %p658_p7 = pnand %p657_p6, %p651_p3 }
  0x11   :  { %661 = shalt.err (!%p658_p7)
}
  0x12   :  { %34 = dma.hbm_to_vmem [thread:$0]  %s907_s2, 16, %s32_s16, [#allocation5]  }
  0x13   :  { %s662_s6 = scalar_lea.hbm %s906_s1, 1024 }
  0x14   :  { %p663_p8 = scmp.ne.s32.totalorder %s906_s1, %s662_s6  ;;  %p666_p9 = scmp.lt.u32.totalorder %s662_s6, %s906_s1 }
  0x16   :  { %p668_p10 = pnand %p666_p9, %p663_p8 }
  0x18   :  { %671 = shalt.err (!%p668_p10)
}
  0x19   :  { %s672_s11 = scalar_lea.vmem %s743_s18, 1024  ;;  %p677_p12 = scmp.lt.s32.totalorder %s743_s18, %s743_s18 }
  0x1a   :  { %p673_p11 = scmp.ne.s32.totalorder %s743_s18, %s672_s11  ;;  %p678_p13 = scmp.lt.s32.totalorder %s672_s11, %s672_s11 }
  0x1c   :  { %p679_p0 = por %p678_p13, %p677_p12 }
  0x1e   :  { %p680_p1 = pnand %p679_p0, %p673_p11 }
  0x20   :  { %683 = shalt.err (!%p680_p1)
}
  0x21   :  { %s712_s2 = smov 512   ;;  %s713_s12 = smov 32  }
  0x22   :  { %24 = dma.hbm_to_vmem [thread:$0]  %s906_s1, 1024, %s743_s18, [#allocation3], %s712_s2, %s712_s2, %s713_s12  }
  0x23   :  { %s714_s15 = smov [#allocation6]   ;;  %s684_s20 = scalar_lea.hbm %s908_s3, 16 }
  0x24   :  { %s41_s16 = sshll.u32 %s714_s15, 4  ;;  %p685_p2 = scmp.ne.s32.totalorder %s908_s3, %s684_s20  ;;  %s42_s16 = int_to_ptr.vmem [resolvable:$true] %s41_s16 }
  0x25   :  { %p688_p3 = scmp.lt.u32.totalorder %s684_s20, %s908_s3 }
  0x27   :  { %p690_p4 = pnand %p688_p3, %p685_p2 }
  0x29   :  { %693 = shalt.err (!%p690_p4)
}
  0x2a   :  { %s694_s25 = scalar_lea.vmem %s42_s16, 16  ;;  %s698_s1 = scalar_lea.vmem %s42_s16, 32 }
  0x2b   :  { %p695_p5 = scmp.ne.s32.totalorder %s42_s16, %s694_s25  ;;  %p699_p6 = scmp.lt.s32.totalorder %s42_s16, %s42_s16 }
  0x2c   :  { %p700_p7 = scmp.lt.s32.totalorder %s698_s1, %s694_s25 }
  0x2e   :  { %p701_p8 = por %p700_p7, %p699_p6 }
  0x30   :  { %p702_p9 = pnand %p701_p8, %p695_p5 }
  0x32   :  { %705 = shalt.err (!%p702_p9)
}
  0x33   :  { %44 = dma.hbm_to_vmem [thread:$0]  %s908_s3, 16, %s42_s16, [#allocation5]  }
  0x34   :  { %706 = dma.done.wait [#allocation3], 1024  }
  0x35   :  { %707 = vsyncadd [#allocation3], 4294966272 }
  0x36   :  { %708 = dma.done.wait [#allocation5], 32  }
  0x37   :  { %709 = vsyncadd [#allocation5], 4294967264  ;;  %v715_v0 = vmov 0   ;;  %v56_v1 = vld [vmem:[#allocation2] sm:$0xff]  ;;  %v57_v3 = vld [vmem:[#allocation2 + $0x8] sm:$0xff]  ;;  %vm104_vm0 = vcmask 130048  }
  0x38   :  { %140 = vmatprep.mubr.bf16.mxu0 %v715_v0  ;;  %181 = vmatprep.mubr.bf16.mxu1 %v715_v0  ;;  %v60_v2 = vld [vmem:[#allocation2 + $0x20] sm:$0xff]  ;;  %v61_v6 = vld [vmem:[#allocation2 + $0x28] sm:$0xff]  ;;  %v58_v7 = vld [vmem:[#allocation2 + $0x10] sm:$0xff]  ;;  %vm272_vm1 = vcmask 1041408   ;;  %vm507_vm2 = vcmask 523264  }
  0x39   :  { %v619_v4 = vcombine.high %v56_v1, %v60_v2  ;;  %v618_v5 = vcombine.low %v56_v1, %v60_v2  ;;  %v621_v8 = vcombine.high %v57_v3, %v61_v6  ;;  %v620_v9 = vcombine.low %v57_v3, %v61_v6  ;;  %v62_v10 = vld [vmem:[#allocation2 + $0x30] sm:$0xff]  ;;  %v59_v11 = vld [vmem:[#allocation2 + $0x18] sm:$0xff]  ;;  %v55_v15 = vld [vmem:[%s905_s0] sm:$0x1]  ;;  %s716_s0 = smov 64  }
  0x3a   :  { %v63_v12 = vld [vmem:[#allocation2 + $0x38] sm:$0xff]  ;;  %v623_v13 = vcombine.high %v58_v7, %v62_v10  ;;  %v622_v16 = vcombine.low %v58_v7, %v62_v10 }
  0x3b   :  { %108 = vmatprep.subr.bf16.mxu0 %v619_v4  ;;  %v625_v14 = vcombine.high %v59_v11, %v63_v12  ;;  %149 = vmatprep.subr.bf16.mxu1 %v621_v8  ;;  %v624_v17 = vcombine.low %v59_v11, %v63_v12 }
  0x3c   :  { %109 = vmatpush1.bf16.msra.mxu0 %v618_v5  ;;  %150 = vmatpush1.bf16.msra.mxu1 %v620_v9 }
  0x3d   :  { %190 = vmatprep.subr.bf16.mxu0 %v623_v13  ;;  %231 = vmatprep.subr.bf16.mxu1 %v625_v14 }
  0x3f   :  { %626 = vmatmul.mubr.msk.bf16.vlgmr.msra.gmra.mrb[0].mxu0 %vm104_vm0, %v55_v15  ;;  %627 = vmatmul.mubr.msk.bf16.vlgmr.msra.gmra.mrb[0].mxu1 %vm104_vm0, %v55_v15 }
  0x40   :  { %191 = vmatpush1.bf16.msra.mxu0 %v622_v16  ;;  %222 = vmatprep.mubr.bf16.mxu0 %v715_v0 }
  0x41   :  { %232 = vmatpush1.bf16.msra.mxu1 %v624_v17  ;;  %263 = vmatprep.mubr.bf16.mxu1 %v715_v0 }
  0x47   :  { %628 = vmatmul.mubr.msk.bf16.vlgmr.msra.gmra.mrb[4].mxu0 %vm104_vm0, %v55_v15  ;;  %629 = vmatmul.mubr.msk.bf16.vlgmr.msra.gmra.mrb[4].mxu1 %vm104_vm0, %v55_v15 }
 0x112   :  { %v789_v18 = vpop.f32.mrb[0].mxu0  ;;  %v797_v22 = vpop.f32.mrb[0].mxu1 }
 0x113   :  { %v273_v19 = vsel %vm272_vm1, %v789_v18, 0.0  ;;  %v329_v20 = vmul.f32 %v789_v18, %v789_v18  ;;  %v795_v21 = vpop.f32.mrb[1].mxu0  ;;  %v287_v27 = vsel %vm272_vm1, %v797_v22, 0.0  ;;  %v805_v28 = vpop.f32.mrb[1].mxu1  ;;  %v331_v33 = vmul.f32 %v797_v22, %v797_v22 }
 0x114   :  { %v274_v23 = vrot.slane %v273_v19, 4  ;;  %v280_v24 = vsel %vm272_vm1, %v795_v21, 0.0  ;;  %v330_v25 = vmul.f32 %v795_v21, %v795_v21  ;;  %v146_v26 = vpop.f32.mrb[2].mxu0  ;;  %v288_v32 = vrot.slane %v287_v27, 4  ;;  %v187_v34 = vpop.f32.mrb[2].mxu1 }
 0x115   :  { %v337_v29 = vsel %vm272_vm1, %v329_v20, 0.0  ;;  %v281_v30 = vrot.slane %v280_v24, 4  ;;  %v147_v31 = vpop.f32.mrb[3].mxu0  ;;  %v294_v38 = vsel %vm272_vm1, %v805_v28, 0.0  ;;  %v188_v39 = vpop.f32.mrb[3].mxu1  ;;  %v351_v41 = vsel %vm272_vm1, %v331_v33, 0.0 }
 0x116   :  { %v275_v35 = vadd.f32 %v274_v23, %v273_v19  ;;  %v338_v36 = vrot.slane %v337_v29, 4  ;;  %v344_v37 = vsel %vm272_vm1, %v330_v25, 0.0  ;;  %v295_v43 = vrot.slane %v294_v38, 4 }
 0x117   :  { %v282_v40 = vadd.f32 %v281_v30, %v280_v24  ;;  %v332_v44 = vmul.f32 %v805_v28, %v805_v28  ;;  %v345_v45 = vrot.slane %v344_v37, 4  ;;  %v289_v47 = vadd.f32 %v288_v32, %v287_v27 }
 0x118   :  { %v339_v42 = vadd.f32 %v338_v36, %v337_v29  ;;  %v276_v46 = vrot.slane %v275_v35, 2  ;;  %v352_v48 = vrot.slane %v351_v41, 4  ;;  %v296_v58 = vadd.f32 %v295_v43, %v294_v38 }
 0x119   :  { %v358_v49 = vsel %vm272_vm1, %v332_v44, 0.0  ;;  %v283_v51 = vrot.slane %v282_v40, 2  ;;  %v346_v0 = vadd.f32 %v345_v45, %v344_v37  ;;  %v290_v6 = vrot.slane %v289_v47, 2 }
 0x11a   :  { %v817_v50 = vpop.f32.mrb[4].mxu0  ;;  %v277_v55 = vadd.f32 %v276_v46, %v275_v35  ;;  %v340_v56 = vrot.slane %v339_v42, 2  ;;  %v825_v57 = vpop.f32.mrb[4].mxu1  ;;  %v359_v7 = vrot.slane %v358_v49, 4  ;;  %v353_v11 = vadd.f32 %v352_v48, %v351_v41 }
 0x11b   :  { %v301_v52 = vsel %vm272_vm1, %v817_v50, 0.0  ;;  %v333_v53 = vmul.f32 %v817_v50, %v817_v50  ;;  %v823_v54 = vpop.f32.mrb[5].mxu0  ;;  %v831_v63 = vpop.f32.mrb[5].mxu1  ;;  %v284_v9 = vadd.f32 %v283_v51, %v282_v40  ;;  %v297_v15 = vrot.slane %v296_v58, 2 }
 0x11c   :  { %v302_v59 = vrot.slane %v301_v52, 4  ;;  %v308_v60 = vsel %vm272_vm1, %v823_v54, 0.0  ;;  %v334_v61 = vmul.f32 %v823_v54, %v823_v54  ;;  %v228_v62 = vpop.f32.mrb[6].mxu0  ;;  %v278_v3 = vrot.slane %v277_v55, 1  ;;  %v269_v5 = vpop.f32.mrb[6].mxu1 }
 0x11d   :  { %v365_v1 = vsel %vm272_vm1, %v333_v53, 0.0  ;;  %v309_v2 = vrot.slane %v308_v60, 4  ;;  %v229_v4 = vpop.f32.mrb[7].mxu0  ;;  %v270_v10 = vpop.f32.mrb[7].mxu1  ;;  %v341_v14 = vadd.f32 %v340_v56, %v339_v42  ;;  %v285_v17 = vrot.slane %v284_v9, 1 }
 0x11e   :  { %v372_v8 = vsel %vm272_vm1, %v334_v61, 0.0  ;;  %v303_v12 = vadd.f32 %v302_v59, %v301_v52  ;;  %v835_v13 = vadd.f32 %v278_v3, %v277_v55  ;;  %v366_v16 = vrot.slane %v365_v1, 4 }
 0x11f   :  { %v315_v19 = vsel %vm272_vm1, %v825_v57, 0.0  ;;  %v310_v20 = vadd.f32 %v309_v2, %v308_v60  ;;  %v373_v23 = vrot.slane %v372_v8, 4  ;;  %v342_v24 = vrot.slane %v341_v14, 1 }
 0x120   :  { %394 = vrot.lane.b32.xlu0 %v835_v13, %s716_s0  ;;  %v316_v25 = vrot.slane %v315_v19, 4  ;;  %v360_v26 = vadd.f32 %v359_v7, %v358_v49  ;;  %v841_v27 = vadd.f32 %v285_v17, %v284_v9  ;;  %v335_v29 = vmul.f32 %v825_v57, %v825_v57 }
 0x121   :  { %v347_v30 = vrot.slane %v346_v0, 2  ;;  %v304_v31 = vrot.slane %v303_v12, 2  ;;  %v845_v32 = vadd.f32 %v342_v24, %v341_v14  ;;  %v322_v33 = vsel %vm272_vm1, %v831_v63, 0.0 }
 0x122   :  { %v336_v34 = vmul.f32 %v831_v63, %v831_v63  ;;  %406 = vrot.lane.b32.xlu1 %v841_v27, %s716_s0  ;;  %v379_v35 = vsel %vm272_vm1, %v335_v29, 0.0  ;;  %v291_v37 = vadd.f32 %v290_v6, %v289_v47  ;;  %v354_v38 = vrot.slane %v353_v11, 2 }
 0x123   :  { %v348_v36 = vadd.f32 %v347_v30, %v346_v0  ;;  %v367_v39 = vadd.f32 %v366_v16, %v365_v1  ;;  %v311_v40 = vrot.slane %v310_v20, 2  ;;  %v374_v41 = vadd.f32 %v373_v23, %v372_v8 }
 0x124   :  { %399 = vrot.lane.b32.xlu0 %v845_v32, %s716_s0  ;;  %v317_v42 = vadd.f32 %v316_v25, %v315_v19  ;;  %v323_v44 = vrot.slane %v322_v33, 4  ;;  %v292_v45 = vrot.slane %v291_v37, 1  ;;  %v355_v46 = vadd.f32 %v354_v38, %v353_v11 }
 0x125   :  { %v349_v43 = vrot.slane %v348_v36, 1  ;;  %v380_v48 = vrot.slane %v379_v35, 4  ;;  %v386_v49 = vsel %vm272_vm1, %v336_v34, 0.0  ;;  %v298_v51 = vadd.f32 %v297_v15, %v296_v58 }
 0x126   :  { %v361_v52 = vrot.slane %v360_v26, 2  ;;  %v859_v47 = vadd.f32 %v292_v45, %v291_v37  ;;  %v356_v55 = vrot.slane %v355_v46, 1  ;;  %v305_v60 = vadd.f32 %v304_v31, %v303_v12 }
 0x127   :  { %v857_v53 = vadd.f32 %v349_v43, %v348_v36  ;;  %v299_v56 = vrot.slane %v298_v51, 1  ;;  %v368_v61 = vrot.slane %v367_v39, 2  ;;  %v318_v62 = vrot.slane %v317_v42, 2 }
 0x128   :  { %v362_v59 = vadd.f32 %v361_v52, %v360_v26  ;;  %v324_v0 = vadd.f32 %v323_v44, %v322_v33  ;;  %v387_v1 = vrot.slane %v386_v49, 4  ;;  %418 = vrot.lane.b32.xlu0 %v859_v47, %s716_s0  ;;  %v381_v58 = vadd.f32 %v380_v48, %v379_v35 }
 0x129   :  { %411 = vrot.lane.b32.xlu1 %v857_v53, %s716_s0  ;;  %v357_v2 = vadd.f32 %v356_v55, %v355_v46  ;;  %v312_v3 = vadd.f32 %v311_v40, %v310_v20  ;;  %v375_v4 = vrot.slane %v374_v41, 2  ;;  %v300_v5 = vadd.f32 %v299_v56, %v298_v51 }
 0x12a   :  { %v363_v6 = vrot.slane %v362_v59, 1  ;;  %v306_v7 = vrot.slane %v305_v60, 1  ;;  %v369_v8 = vadd.f32 %v368_v61, %v367_v39  ;;  %v325_v9 = vrot.slane %v324_v0, 2 }
 0x12b   :  { %v388_v10 = vadd.f32 %v387_v1, %v386_v49  ;;  %v313_v11 = vrot.slane %v312_v3, 1  ;;  %v376_v12 = vadd.f32 %v375_v4, %v374_v41  ;;  %v319_v14 = vadd.f32 %v318_v62, %v317_v42 }
 0x12c   :  { %430 = vrot.lane.b32.xlu0 %v300_v5, %s716_s0  ;;  %v364_v15 = vadd.f32 %v363_v6, %v362_v59  ;;  %v307_v16 = vadd.f32 %v306_v7, %v305_v60  ;;  %v370_v17 = vrot.slane %v369_v8, 1  ;;  %v382_v19 = vrot.slane %v381_v58, 2 }
 0x12d   :  { %423 = vrot.lane.b32.xlu1 %v357_v2, %s716_s0  ;;  %v314_v20 = vadd.f32 %v313_v11, %v312_v3  ;;  %v320_v23 = vrot.slane %v319_v14, 1  ;;  %v326_v24 = vadd.f32 %v325_v9, %v324_v0  ;;  %v377_v26 = vrot.slane %v376_v12, 1 }
 0x12e   :  { %v371_v25 = vadd.f32 %v370_v17, %v369_v8  ;;  %v383_v29 = vadd.f32 %v382_v19, %v381_v58  ;;  %v389_v30 = vrot.slane %v388_v10, 2 }
 0x12f   :  { %v321_v31 = vadd.f32 %v320_v23, %v319_v14  ;;  %v378_v33 = vadd.f32 %v377_v26, %v376_v12  ;;  %v327_v35 = vrot.slane %v326_v24, 1 }
 0x130   :  { %442 = vrot.lane.b32.xlu0 %v307_v16, %s716_s0  ;;  %v384_v34 = vrot.slane %v383_v29, 1  ;;  %v390_v36 = vadd.f32 %v389_v30, %v388_v10 }
 0x131   :  { %435 = vrot.lane.b32.xlu1 %v364_v15, %s716_s0  ;;  %v328_v38 = vadd.f32 %v327_v35, %v326_v24 }
 0x132   :  { %v385_v37 = vadd.f32 %v384_v34, %v383_v29  ;;  %v391_v39 = vrot.slane %v390_v36, 1 }
 0x134   :  { %454 = vrot.lane.b32.xlu0 %v314_v20, %s716_s0  ;;  %v392_v40 = vadd.f32 %v391_v39, %v390_v36 }
 0x135   :  { %447 = vrot.lane.b32.xlu1 %v371_v25, %s716_s0 }
 0x138   :  { %466 = vrot.lane.b32.xlu0 %v321_v31, %s716_s0 }
 0x139   :  { %459 = vrot.lane.b32.xlu1 %v378_v33, %s716_s0 }
 0x13c   :  { %478 = vrot.lane.b32.xlu0 %v328_v38, %s716_s0 }
 0x13d   :  { %471 = vrot.lane.b32.xlu1 %v385_v37, %s716_s0 }
 0x141   :  { %483 = vrot.lane.b32.xlu1 %v392_v40, %s716_s0 }
 0x192   :  { %v395_v41 = vpop.permute.xlu0 %394 }
 0x193   :  { %v397_v42 = vadd.f32 %v395_v41, %v835_v13 }
 0x194   :  { %v407_v43 = vpop.permute.xlu1 %406 }
 0x195   :  { %v403_v44 = vadd.f32 %v397_v42, %v841_v27  ;;  %v492_v42 = vld [vmem:[#allocation4] sm:$0x1] }
 0x196   :  { %v400_v45 = vpop.permute.xlu0 %399 }
 0x197   :  { %v409_v46 = vadd.f32 %v407_v43, %v403_v44  ;;  %v402_v48 = vadd.f32 %v400_v45, %v845_v32  ;;  %v496_v44 = vld [vmem:[#allocation6] sm:$0x1] }
 0x199   :  { %v404_v49 = vadd.f32 %v402_v48, %v857_v53  ;;  %v415_v51 = vadd.f32 %v409_v46, %v859_v47 }
 0x19a   :  { %v419_v55 = vpop.permute.xlu0 %418 }
 0x19b   :  { %v412_v52 = vpop.permute.xlu1 %411  ;;  %v421_v59 = vadd.f32 %v419_v55, %v415_v51 }
 0x19c   :  { %v414_v56 = vadd.f32 %v412_v52, %v404_v49  ;;  %v717_v52 = vmov 1983009808  }
 0x19d   :  { %v427_v61 = vadd.f32 %v421_v59, %v300_v5  ;;  %v577_v55 = vunpack.c.l.s4 %v717_v52 }
 0x19e   :  { %v416_v60 = vadd.f32 %v414_v56, %v357_v2  ;;  %v431_v0 = vpop.permute.xlu0 %430 }
 0x19f   :  { %v424_v62 = vpop.permute.xlu1 %423  ;;  %v433_v1 = vadd.f32 %v431_v0, %v427_v61 }
 0x1a0   :  { %v426_v13 = vadd.f32 %v424_v62, %v416_v60  ;;  %v578_v60 = vunpack.c.0.s8 %v577_v55 }
 0x1a1   :  { %v439_v27 = vadd.f32 %v433_v1, %v307_v16 }
 0x1a2   :  { %v428_v58 = vadd.f32 %v426_v13, %v364_v15  ;;  %v443_v4 = vpop.permute.xlu0 %442 }
 0x1a3   :  { %v436_v3 = vpop.permute.xlu1 %435  ;;  %v445_v32 = vadd.f32 %v443_v4, %v439_v27 }
 0x1a4   :  { %v438_v6 = vadd.f32 %v436_v3, %v428_v58 }
 0x1a5   :  { %v451_v53 = vadd.f32 %v445_v32, %v314_v20 }
 0x1a6   :  { %v440_v7 = vadd.f32 %v438_v6, %v371_v25  ;;  %v455_v47 = vpop.permute.xlu0 %454 }
 0x1a7   :  { %v448_v8 = vpop.permute.xlu1 %447  ;;  %v457_v10 = vadd.f32 %v455_v47, %v451_v53 }
 0x1a8   :  { %v450_v9 = vadd.f32 %v448_v8, %v440_v7 }
 0x1a9   :  { %v463_v12 = vadd.f32 %v457_v10, %v321_v31  ;;  %v500_v31 = vlaneseq }
 0x1aa   :  { %v452_v11 = vadd.f32 %v450_v9, %v378_v33  ;;  %v467_v5 = vpop.permute.xlu0 %466 }
 0x1ab   :  { %v460_v2 = vpop.permute.xlu1 %459  ;;  %v469_v17 = vadd.f32 %v467_v5, %v463_v12  ;;  %v501_v41 = vshrl.u32 %v500_v31, 7 }
 0x1ac   :  { %v462_v14 = vadd.f32 %v460_v2, %v452_v11 }
 0x1ad   :  { %v475_v23 = vadd.f32 %v469_v17, %v328_v38  ;;  %v502_v43 = vsub.s32 0, %v501_v41 }
 0x1ae   :  { %v464_v19 = vadd.f32 %v462_v14, %v385_v37  ;;  %v479_v16 = vpop.permute.xlu0 %478 }
 0x1af   :  { %v472_v15 = vpop.permute.xlu1 %471  ;;  %v481_v26 = vadd.f32 %v479_v16, %v475_v23 }
 0x1b0   :  { %v474_v24 = vadd.f32 %v472_v15, %v464_v19 }
 0x1b1   :  { %v487_v29 = vmul.f32 0.03125, %v481_v26 }
 0x1b2   :  { %v476_v30 = vadd.f32 %v474_v24, %v392_v40 }
 0x1b3   :  { %v484_v25 = vpop.permute.xlu1 %483  ;;  %v489_v34 = vmul.f32 %v487_v29, %v487_v29 }
 0x1b4   :  { %v486_v20 = vadd.f32 %v484_v25, %v476_v30 }
 0x1b6   :  { %v488_v35 = vmul.f32 0.03125, %v486_v20 }
 0x1b8   :  { %v490_v36 = vsub.f32 %v488_v35, %v489_v34 }
 0x1ba   :  { %v491_v39 = vmax.f32 %v490_v36, 0.0 }
 0x1bc   :  { %v493_v33 = vadd.f32 1e-05, %v491_v39 }
 0x1be   :  { %638 = vrsqrt.f32 %v493_v33 }
 0x1c8   :  { %v639_v37 = vpop.eup %638 }
 0x1c9   :  { %v495_v38 = vmul.f32 %v639_v37, %v492_v42 }
 0x1cb   :  { %v503_v45 = vrot.slane %v495_v38, %v502_v43  ;;  %v497_v46 = vmul.f32 %v495_v38, %v487_v29 }
 0x1cd   :  { %504 = vrot.lane.b32.xlu0 %v503_v45, %s716_s0  ;;  %v498_v40 = vsub.f32 %v496_v44, %v497_v46 }
 0x1cf   :  { %v513_v48 = vrot.slane %v498_v40, %v502_v43 }
 0x1d1   :  { %514 = vrot.lane.b32.xlu1 %v513_v48, %s716_s0 }
 0x23f   :  { %v505_v49 = vpop.permute.xlu0 %504 }
 0x240   :  { %v508_v51 = vsel %vm507_vm2, %v495_v38, %v505_v49 }
 0x241   :  { %v521_v56 = vrot.slane %v508_v51, %v502_v43 }
 0x243   :  { %v515_v59 = vpop.permute.xlu1 %514  ;;  %v522_v61 = vmul.f32 %v521_v56, %v789_v18  ;;  %v523_v0 = vmul.f32 %v521_v56, %v795_v21  ;;  %v524_v13 = vmul.f32 %v521_v56, %v797_v22  ;;  %v525_v1 = vmul.f32 %v521_v56, %v805_v28 }
 0x244   :  { %v517_v62 = vsel %vm507_vm2, %v498_v40, %v515_v59  ;;  %v526_v27 = vmul.f32 %v521_v56, %v817_v50  ;;  %v527_v3 = vmul.f32 %v521_v56, %v823_v54  ;;  %v528_v4 = vmul.f32 %v521_v56, %v825_v57 }
 0x245   :  { %v533_v58 = vrot.slane %v517_v62, %v502_v43  ;;  %v529_v6 = vmul.f32 %v521_v56, %v831_v63  ;;  %v581_v54 = vsub.s32 %v578_v60, %v501_v41 }
 0x247   :  { %v534_v32 = vadd.f32 %v533_v58, %v522_v61  ;;  %v535_v7 = vadd.f32 %v533_v58, %v523_v0  ;;  %v536_v53 = vadd.f32 %v533_v58, %v524_v13  ;;  %v537_v18 = vadd.f32 %v533_v58, %v525_v1 }
 0x248   :  { %v538_v8 = vadd.f32 %v533_v58, %v526_v27  ;;  %v539_v47 = vadd.f32 %v533_v58, %v527_v3  ;;  %v540_v21 = vadd.f32 %v533_v58, %v528_v4  ;;  %v541_v9 = vadd.f32 %v533_v58, %v529_v6 }
 0x249   :  { %vm542_vm3 = vcmp.ge.f32.partialorder %v534_v32, 0.0  ;;  %vm543_vm4 = vcmp.ge.f32.partialorder %v535_v7, 0.0  ;;  %vm544_vm5 = vcmp.ge.f32.partialorder %v536_v53, 0.0  ;;  %vm545_vm6 = vcmp.ge.f32.partialorder %v537_v18, 0.0 }
 0x24a   :  { %vm546_vm7 = vcmp.ge.f32.partialorder %v538_v8, 0.0  ;;  %vm547_vm8 = vcmp.ge.f32.partialorder %v539_v47, 0.0  ;;  %vm548_vm9 = vcmp.ge.f32.partialorder %v540_v21, 0.0  ;;  %vm549_vm10 = vcmp.ge.f32.partialorder %v541_v9, 0.0 }
 0x24b   :  { %v550_v22 = vmul.f32 0.2, %v534_v32  ;;  %v551_v28 = vmul.f32 0.2, %v535_v7  ;;  %v552_v50 = vmul.f32 0.2, %v536_v53 }
 0x24c   :  { %v553_v57 = vmul.f32 0.2, %v537_v18  ;;  %v554_v63 = vmul.f32 0.2, %v538_v8  ;;  %v555_v10 = vmul.f32 0.2, %v539_v47 }
 0x24d   :  { %v556_v11 = vmul.f32 0.2, %v540_v21  ;;  %v557_v12 = vmul.f32 0.2, %v541_v9  ;;  %v558_v2 = vsel %vm542_vm3, %v534_v32, %v550_v22  ;;  %v559_v5 = vsel %vm543_vm4, %v535_v7, %v551_v28 }
 0x24e   :  { %v560_v14 = vsel %vm544_vm5, %v536_v53, %v552_v50  ;;  %v561_v17 = vsel %vm545_vm6, %v537_v18, %v553_v57  ;;  %v562_v19 = vsel %vm546_vm7, %v538_v8, %v554_v63  ;;  %v563_v23 = vsel %vm547_vm8, %v539_v47, %v555_v10 }
 0x24f   :  { %v564_v15 = vsel %vm548_vm9, %v540_v21, %v556_v11  ;;  %v565_v16 = vsel %vm549_vm10, %v541_v9, %v557_v12  ;;  %v574_v24 = vcombine.low %v558_v2, %v559_v5  ;;  %v575_v26 = vcombine.low %v560_v14, %v561_v17 }
 0x250   :  { %v591_v29 = vcombine.low %v562_v19, %v563_v23  ;;  %v592_v30 = vcombine.low %v564_v15, %v565_v16 }
 0x251   :  { %v582_v25 = vrot.slane %v574_v24, %v581_v54  ;;  %v589_v20 = vrot.slane %v575_v26, %v581_v54 }
 0x252   :  { %v599_v34 = vrot.slane %v591_v29, %v581_v54  ;;  %v606_v35 = vrot.slane %v592_v30, %v581_v54 }
 0x253   :  { %v590_v36 = vcombine.low %v582_v25, %v589_v20 }
 0x254   :  { %v607_v39 = vcombine.low %v599_v34, %v606_v35 }
 0x255   :  { %610 = vst [vmem:[%s909_s4] sm:$0xff] %v590_v36 }
 0x256   :  { %611 = vst [vmem:[%s909_s4 + $0x8] sm:$0xff] %v607_v39 }
 0x257   :  { %616 = vsyncpa [#allocation3], 1 }
 0x258   :  { %617 = vsyncpa [#allocation5], 1 }

// kernel: generator_forward.8
= control target key start
LH: loop header
LB: loop body
LE: loop exit
PB: predicated region body
PF: predicated region fallthrough
CT: control target
= control target key end

     0   :  { %9 = vsyncpa [#allocation3], 0  ;;  %s1103_s0 = inlined_call_operand.vmem [shape: bf16[32,576], index: 0, kind: input, shape index: {}]   ;;  %s1104_s1 = inlined_call_operand.hbm [shape: bf16[576,128], index: 1, kind: input, shape index: {}]   ;;  %s1105_s2 = inlined_call_operand.hbm [shape: f32[1,32], index: 2, kind: input, shape index: {}]   ;;  %s1106_s3 = inlined_call_operand.hbm [shape: f32[1,32], index: 3, kind: input, shape index: {}]   ;;  %s1107_s4 = inlined_call_operand.vmem [shape: f32[32,128], index: 4, kind: output, shape index: {}]  }
   0x1   :  { %10 = vsyncpa [#allocation5], 0  ;;  %s944_s15 = smov [#allocation4]   ;;  %s945_s17 = smov [#allocation2]  }
   0x2   :  { %s31_s16 = sshll.u32 %s944_s15, 4  ;;  %s18_s18 = sshll.u32 %s945_s17, 4  ;;  %s32_s16 = int_to_ptr.vmem [resolvable:$true] %s31_s16  ;;  %s976_s18 = int_to_ptr.vmem [resolvable:$true] %s18_s18 }
   0x3   :  { %s874_s21 = scalar_lea.hbm %s1105_s2, 16 }
   0x4   :  { %p875_p0 = scmp.ne.s32.totalorder %s1105_s2, %s874_s21  ;;  %p878_p1 = scmp.lt.u32.totalorder %s874_s21, %s1105_s2 }
   0x6   :  { %p880_p2 = pnand %p878_p1, %p875_p0 }
   0x8   :  { %883 = shalt.err (!%p880_p2)
}
   0x9   :  { %s884_s26 = scalar_lea.vmem %s32_s16, 16  ;;  %s888_s27 = scalar_lea.vmem %s32_s16, 32 }
   0xa   :  { %p885_p3 = scmp.ne.s32.totalorder %s32_s16, %s884_s26  ;;  %p889_p4 = scmp.lt.s32.totalorder %s32_s16, %s32_s16 }
   0xb   :  { %p890_p5 = scmp.lt.s32.totalorder %s888_s27, %s884_s26 }
   0xd   :  { %p891_p6 = por %p890_p5, %p889_p4 }
   0xf   :  { %p892_p7 = pnand %p891_p6, %p885_p3 }
  0x11   :  { %895 = shalt.err (!%p892_p7)
}
  0x12   :  { %34 = dma.hbm_to_vmem [thread:$0]  %s1105_s2, 16, %s32_s16, [#allocation5]  }
  0x13   :  { %s896_s6 = scalar_lea.hbm %s1104_s1, 4608 }
  0x14   :  { %p897_p8 = scmp.ne.s32.totalorder %s1104_s1, %s896_s6  ;;  %p900_p9 = scmp.lt.u32.totalorder %s896_s6, %s1104_s1 }
  0x16   :  { %p902_p10 = pnand %p900_p9, %p897_p8 }
  0x18   :  { %905 = shalt.err (!%p902_p10)
}
  0x19   :  { %s906_s11 = scalar_lea.vmem %s976_s18, 4608  ;;  %p911_p12 = scmp.lt.s32.totalorder %s976_s18, %s976_s18 }
  0x1a   :  { %p907_p11 = scmp.ne.s32.totalorder %s976_s18, %s906_s11  ;;  %p912_p13 = scmp.lt.s32.totalorder %s906_s11, %s906_s11 }
  0x1c   :  { %p913_p0 = por %p912_p13, %p911_p12 }
  0x1e   :  { %p914_p1 = pnand %p913_p0, %p907_p11 }
  0x20   :  { %917 = shalt.err (!%p914_p1)
}
  0x21   :  { %s946_s2 = smov 64   ;;  %s947_s12 = smov 4  }
  0x22   :  { %24 = dma.hbm_to_vmem [thread:$0]  %s1104_s1, 4608, %s976_s18, [#allocation3], %s946_s2, %s946_s2, %s947_s12  }
  0x23   :  { %s948_s15 = smov [#allocation6]   ;;  %s918_s20 = scalar_lea.hbm %s1106_s3, 16 }
  0x24   :  { %s41_s16 = sshll.u32 %s948_s15, 4  ;;  %p919_p2 = scmp.ne.s32.totalorder %s1106_s3, %s918_s20  ;;  %s42_s16 = int_to_ptr.vmem [resolvable:$true] %s41_s16 }
  0x25   :  { %p922_p3 = scmp.lt.u32.totalorder %s918_s20, %s1106_s3 }
  0x27   :  { %p924_p4 = pnand %p922_p3, %p919_p2 }
  0x29   :  { %927 = shalt.err (!%p924_p4)
}
  0x2a   :  { %s928_s25 = scalar_lea.vmem %s42_s16, 16  ;;  %s932_s1 = scalar_lea.vmem %s42_s16, 32 }
  0x2b   :  { %p929_p5 = scmp.ne.s32.totalorder %s42_s16, %s928_s25  ;;  %p933_p6 = scmp.lt.s32.totalorder %s42_s16, %s42_s16 }
  0x2c   :  { %p934_p7 = scmp.lt.s32.totalorder %s932_s1, %s928_s25 }
  0x2e   :  { %p935_p8 = por %p934_p7, %p933_p6 }
  0x30   :  { %p936_p9 = pnand %p935_p8, %p929_p5 }
  0x32   :  { %939 = shalt.err (!%p936_p9)
}
  0x33   :  { %44 = dma.hbm_to_vmem [thread:$0]  %s1106_s3, 16, %s42_s16, [#allocation5]  }
  0x34   :  { %940 = dma.done.wait [#allocation3], 4608  }
  0x35   :  { %941 = vsyncadd [#allocation3], 4294962688 }
  0x36   :  { %942 = dma.done.wait [#allocation5], 32  }
  0x37   :  { %943 = vsyncadd [#allocation5], 4294967264  ;;  %v822_v0 = vld [vmem:[#allocation2 + $0x40] sm:$0xff]   ;;  %v826_v4 = vld [vmem:[#allocation2 + $0x48] sm:$0xff]   ;;  %vm405_vm0 = vcmask 523264   ;;  %s950_s21 = smov 32  }
  0x38   :  { %v823_v1 = vld [vmem:[#allocation2 + $0xc0] sm:$0xff]   ;;  %741 = vmatprep.subr.bf16.mxu0 %v822_v0  ;;  %v827_v5 = vld [vmem:[#allocation2 + $0xc8] sm:$0xff]   ;;  %v830_v8 = vld [vmem:[#allocation2 + $0x50] sm:$0xff]   ;;  %vm633_vm1 = vcmask 261120   ;;  %vm636_vm2 = vcmask 785408  }
  0x39   :  { %v824_v2 = vld [vmem:[#allocation2] sm:$0xff]   ;;  %769 = vmatprep.subr.bf16.mxu1 %v823_v1  ;;  %v828_v6 = vld [vmem:[#allocation2 + $0x8] sm:$0xff]   ;;  %v831_v9 = vld [vmem:[#allocation2 + $0xd0] sm:$0xff]  }
  0x3a   :  { %v825_v3 = vld [vmem:[#allocation2 + $0x80] sm:$0xff]   ;;  %742 = vmatpush3.bf16.msra.mxu0 %v824_v2  ;;  %v829_v7 = vld [vmem:[#allocation2 + $0x88] sm:$0xff]   ;;  %v832_v10 = vld [vmem:[#allocation2 + $0x10] sm:$0xff]  }
  0x3b   :  { %770 = vmatpush3.bf16.msra.mxu1 %v825_v3  ;;  %743 = vmatprep.subr.bf16.mxu0 %v826_v4  ;;  %v833_v11 = vld [vmem:[#allocation2 + $0x90] sm:$0xff]   ;;  %v834_v12 = vld [vmem:[#allocation2 + $0x58] sm:$0xff]   ;;  %v838_v16 = vld [vmem:[#allocation2 + $0x60] sm:$0xff]  }
  0x3c   :  { %771 = vmatprep.subr.bf16.mxu1 %v827_v5  ;;  %v835_v13 = vld [vmem:[#allocation2 + $0xd8] sm:$0xff]   ;;  %v839_v17 = vld [vmem:[#allocation2 + $0xe0] sm:$0xff]   ;;  %v842_v20 = vld [vmem:[#allocation2 + $0x68] sm:$0xff]  }
  0x3d   :  { %v836_v14 = vld [vmem:[#allocation2 + $0x18] sm:$0xff]   ;;  %v840_v18 = vld [vmem:[#allocation2 + $0x20] sm:$0xff]   ;;  %v843_v21 = vld [vmem:[#allocation2 + $0xe8] sm:$0xff]  }
  0x3e   :  { %744 = vmatpush3.bf16.msra.mxu0 %v828_v6  ;;  %v837_v15 = vld [vmem:[#allocation2 + $0x98] sm:$0xff]   ;;  %v841_v19 = vld [vmem:[#allocation2 + $0xa0] sm:$0xff]   ;;  %v844_v22 = vld [vmem:[#allocation2 + $0x28] sm:$0xff]  }
  0x3f   :  { %772 = vmatpush3.bf16.msra.mxu1 %v829_v7  ;;  %745 = vmatprep.subr.bf16.mxu0 %v830_v8  ;;  %v845_v23 = vld [vmem:[#allocation2 + $0xa8] sm:$0xff]   ;;  %v846_v24 = vld [vmem:[#allocation2 + $0x70] sm:$0xff]   ;;  %v850_v28 = vld [vmem:[#allocation2 + $0x78] sm:$0xff]  }
  0x40   :  { %773 = vmatprep.subr.bf16.mxu1 %v831_v9  ;;  %v847_v25 = vld [vmem:[#allocation2 + $0xf0] sm:$0xff]   ;;  %v851_v29 = vld [vmem:[#allocation2 + $0xf8] sm:$0xff]   ;;  %v859_v35 = vld [vmem:[%s1103_s0 + $0xc] ss:$20 sps:$4 sm:$0xff]  }
  0x41   :  { %v848_v26 = vld [vmem:[#allocation2 + $0x30] sm:$0xff]   ;;  %v852_v30 = vld [vmem:[#allocation2 + $0x38] sm:$0xff]   ;;  %v860_v36 = vld [vmem:[#allocation2 + $0x100] sm:$0xff]   ;;  %493 = vmatprep.mubr.bf16.mxu1 %v859_v35 }
  0x42   :  { %746 = vmatpush3.bf16.msra.mxu0 %v832_v10  ;;  %v849_v27 = vld [vmem:[#allocation2 + $0xb0] sm:$0xff]   ;;  %v853_v31 = vld [vmem:[#allocation2 + $0xb8] sm:$0xff]   ;;  %v861_v37 = vld [vmem:[#allocation2 + $0x108] sm:$0xff]  }
  0x43   :  { %774 = vmatpush3.bf16.msra.mxu1 %v833_v11  ;;  %747 = vmatprep.subr.bf16.mxu0 %v834_v12  ;;  %v854_v32 = vld [vmem:[%s1103_s0] ss:$20 sps:$4 sm:$0xff]   ;;  %v856_v33 = vld [vmem:[%s1103_s0 + $0x4] ss:$20 sps:$4 sm:$0xff]   ;;  %v857_v34 = vld [vmem:[%s1103_s0 + $0x8] ss:$20 sps:$4 sm:$0xff]  }
  0x44   :  { %775 = vmatprep.subr.bf16.mxu1 %v835_v13  ;;  %444 = vmatprep.mubr.bf16.mxu0 %v856_v33  ;;  %v862_v38 = vld [vmem:[%s1103_s0 + $0x2c] ss:$20 sps:$4 sm:$0xff]   ;;  %v864_v39 = vld [vmem:[%s1103_s0 + $0x34] ss:$20 sps:$4 sm:$0xff]   ;;  %v867_v42 = vld [vmem:[%s1103_s0 + $0x30] ss:$20 sps:$4 sm:$0xff]  }
  0x45   :  { %v866_v40 = vld [vmem:[%s1103_s0 + $0x28] ss:$20 sps:$4 sm:$0xff]   ;;  %v868_v41 = vld [vmem:[#allocation2 + $0x110] sm:$0xff]   ;;  %v871_v45 = vld [vmem:[%s1103_s0 + $0x38] ss:$20 sps:$4 sm:$0xff]  }
  0x46   :  { %748 = vmatpush3.bf16.msra.mxu0 %v836_v14  ;;  %v870_v43 = vld [vmem:[%s1103_s0 + $0x10] ss:$20 sps:$4 sm:$0xff]   ;;  %v869_v44 = vld [vmem:[#allocation2 + $0x118] sm:$0xff]   ;;  %s949_s0 = smov 96  }
  0x47   :  { %776 = vmatpush3.bf16.msra.mxu1 %v837_v15  ;;  %749 = vmatprep.subr.bf16.mxu0 %v838_v16 }
  0x48   :  { %777 = vmatprep.subr.bf16.mxu1 %v839_v17 }
  0x4a   :  { %750 = vmatpush3.bf16.msra.mxu0 %v840_v18 }
  0x4b   :  { %778 = vmatpush3.bf16.msra.mxu1 %v841_v19  ;;  %751 = vmatprep.subr.bf16.mxu0 %v842_v20 }
  0x4c   :  { %779 = vmatprep.subr.bf16.mxu1 %v843_v21 }
  0x4e   :  { %752 = vmatpush3.bf16.msra.mxu0 %v844_v22 }
  0x4f   :  { %780 = vmatpush3.bf16.msra.mxu1 %v845_v23  ;;  %753 = vmatprep.subr.bf16.mxu0 %v846_v24 }
  0x50   :  { %781 = vmatprep.subr.bf16.mxu1 %v847_v25 }
  0x52   :  { %754 = vmatpush3.bf16.msra.mxu0 %v848_v26 }
  0x53   :  { %782 = vmatpush3.bf16.msra.mxu1 %v849_v27  ;;  %755 = vmatprep.subr.bf16.mxu0 %v850_v28 }
  0x54   :  { %783 = vmatprep.subr.bf16.mxu1 %v851_v29 }
  0x56   :  { %756 = vmatpush3.bf16.msra.mxu0 %v852_v30 }
  0x57   :  { %784 = vmatpush3.bf16.msra.mxu1 %v853_v31  ;;  %803 = vmatprep.subr.bf16.mxu0 %v860_v36 }
  0x59   :  { %445 = vmatmul.mubr.bf16.vlgmr.msra.gmra.mrb[0].mxu0 %v854_v32 }
  0x5a   :  { %494 = vmatmul.mubr.bf16.vlgmr.msra.gmra.mrb[0].mxu1 %v857_v34  ;;  %804 = vmatpush3.bf16.msra.mxu0 %v860_v36 }
  0x5b   :  { %805 = vmatprep.subr.bf16.mxu0 %v861_v37  ;;  %452 = vmatprep.mubr.bf16.mxu0 %v862_v38 }
  0x5c   :  { %501 = vmatprep.mubr.bf16.mxu1 %v864_v39 }
  0x5e   :  { %806 = vmatpush3.bf16.msra.mxu0 %v861_v37 }
  0x5f   :  { %807 = vmatprep.subr.bf16.mxu0 %v868_v41 }
  0x61   :  { %453 = vmatmul.mubr.bf16.gmra.mrb[4].mxu0 %v866_v40 }
  0x62   :  { %502 = vmatmul.mubr.bf16.gmra.mrb[4].mxu1 %v867_v42  ;;  %811 = vmatprep.mubr.msk.bf16.mxu0 %vm405_vm0, %v870_v43 }
  0x63   :  { %808 = vmatpush3.bf16.msra.mxu0 %v868_v41 }
  0x64   :  { %809 = vmatprep.subr.bf16.mxu0 %v869_v44 }
  0x67   :  { %810 = vmatpush3.bf16.msra.mxu0 %v869_v44 }
  0x6a   :  { %812 = vmatmul.mubr.msk.bf16.vlgmr.msra.gmra.mrb[8].mxu0 %vm405_vm0, %v871_v45 }
 0x12c   :  { %v757_v46 = vpop.f32.mrb[0].mxu0 }
 0x12d   :  { %v785_v47 = vpop.f32.mrb[0].mxu1  ;;  %v758_v48 = vpop.f32.mrb[1].mxu0 }
 0x12e   :  { %v759_v49 = vadd.f32 %v758_v48, %v757_v46  ;;  %v786_v50 = vpop.f32.mrb[1].mxu1  ;;  %v760_v51 = vpop.f32.mrb[2].mxu0 }
 0x12f   :  { %v787_v52 = vadd.f32 %v786_v50, %v785_v47  ;;  %v788_v53 = vpop.f32.mrb[2].mxu1  ;;  %v761_v54 = vpop.f32.mrb[3].mxu0 }
 0x130   :  { %v762_v55 = vadd.f32 %v761_v54, %v760_v51  ;;  %v789_v56 = vpop.f32.mrb[3].mxu1 }
 0x131   :  { %v790_v57 = vadd.f32 %v789_v56, %v788_v53  ;;  %v496_v58 = vadd.f32 %v787_v52, %v759_v49 }
 0x133   :  { %v499_v59 = vadd.f32 %v790_v57, %v762_v55 }
 0x134   :  { %v763_v60 = vpop.f32.mrb[4].mxu0 }
 0x135   :  { %v791_v61 = vpop.f32.mrb[4].mxu1  ;;  %v764_v62 = vpop.f32.mrb[5].mxu0 }
 0x136   :  { %v765_v63 = vadd.f32 %v764_v62, %v763_v60  ;;  %v792_v0 = vpop.f32.mrb[5].mxu1  ;;  %v766_v1 = vpop.f32.mrb[6].mxu0  ;;  %v612_v60 = vld [vmem:[#allocation4] sm:$0x1] }
 0x137   :  { %v793_v2 = vadd.f32 %v792_v0, %v791_v61  ;;  %v794_v3 = vpop.f32.mrb[6].mxu1  ;;  %v767_v4 = vpop.f32.mrb[7].mxu0  ;;  %v616_v0 = vld [vmem:[#allocation6] sm:$0x1] }
 0x138   :  { %v768_v5 = vadd.f32 %v767_v4, %v766_v1  ;;  %v795_v6 = vpop.f32.mrb[7].mxu1 }
 0x139   :  { %v796_v7 = vadd.f32 %v795_v6, %v794_v3  ;;  %v504_v8 = vadd.f32 %v793_v2, %v765_v63 }
 0x13b   :  { %v507_v9 = vadd.f32 %v796_v7, %v768_v5 }
 0x13d   :  { %v813_v10 = vpop.f32.mrb[8].mxu0 }
 0x13e   :  { %v1053_v11 = vadd.f32 %v813_v10, %v504_v8  ;;  %v544_v12 = vpop.f32.mrb[9].mxu0 }
 0x13f   :  { %v1055_v13 = vadd.f32 %v544_v12, %v496_v58  ;;  %v814_v14 = vpop.f32.mrb[10].mxu0  ;;  %v620_v58 = vlaneseq }
 0x140   :  { %v1057_v15 = vadd.f32 %v814_v14, %v507_v9  ;;  %v547_v16 = vpop.f32.mrb[11].mxu0  ;;  %v570_v21 = vmul.f32 %v1053_v11, %v1053_v11 }
 0x141   :  { %v1059_v17 = vadd.f32 %v547_v16, %v499_v59  ;;  %v568_v18 = vmul.f32 %v1055_v13, %v1055_v13  ;;  %v621_v59 = vshrl.u32 %v620_v58, 7 }
 0x142   :  { %v571_v24 = vmul.f32 %v1057_v15, %v1057_v15 }
 0x143   :  { %v559_v19 = vadd.f32 %v1059_v17, %v1055_v13  ;;  %v569_v20 = vmul.f32 %v1059_v17, %v1059_v17  ;;  %v622_v61 = vsub.s32 0, %v621_v59 }
 0x145   :  { %v560_v22 = vadd.f32 %v559_v19, %v1053_v11  ;;  %v572_v23 = vadd.f32 %v569_v20, %v568_v18 }
 0x147   :  { %v561_v25 = vadd.f32 %v560_v22, %v1057_v15  ;;  %v573_v26 = vadd.f32 %v572_v23, %v570_v21 }
 0x149   :  { %v562_v27 = vrot.slane %v561_v25, 4  ;;  %v574_v28 = vadd.f32 %v573_v26, %v571_v24 }
 0x14b   :  { %v563_v29 = vadd.f32 %v562_v27, %v561_v25  ;;  %v575_v30 = vrot.slane %v574_v28, 4 }
 0x14d   :  { %v564_v31 = vrot.slane %v563_v29, 2  ;;  %v576_v32 = vadd.f32 %v575_v30, %v574_v28 }
 0x14f   :  { %v565_v33 = vadd.f32 %v564_v31, %v563_v29  ;;  %v577_v34 = vrot.slane %v576_v32, 2 }
 0x151   :  { %v566_v35 = vrot.slane %v565_v33, 1  ;;  %v578_v36 = vadd.f32 %v577_v34, %v576_v32 }
 0x153   :  { %v567_v37 = vadd.f32 %v566_v35, %v565_v33  ;;  %v579_v38 = vrot.slane %v578_v36, 1 }
 0x155   :  { %591 = vrot.lane.b32.xlu1 %v567_v37, %s946_s2  ;;  %582 = vrot.lane.b32.xlu0 %v567_v37, %s949_s0  ;;  %v580_v39 = vadd.f32 %v579_v38, %v578_v36 }
 0x159   :  { %595 = vrot.lane.b32.xlu1 %v580_v39, %s946_s2  ;;  %587 = vrot.lane.b32.xlu0 %v580_v39, %s949_s0 }
 0x15d   :  { %603 = vrot.lane.b32.xlu1 %v580_v39, %s950_s21  ;;  %599 = vrot.lane.b32.xlu0 %v567_v37, %s950_s21 }
 0x1c7   :  { %v592_v40 = vpop.permute.xlu1 %591  ;;  %v583_v41 = vpop.permute.xlu0 %582 }
 0x1c8   :  { %v585_v42 = vadd.f32 %v583_v41, %v567_v37 }
 0x1ca   :  { %v594_v47 = vadd.f32 %v592_v40, %v585_v42 }
 0x1cb   :  { %v596_v43 = vpop.permute.xlu1 %595  ;;  %v588_v44 = vpop.permute.xlu0 %587 }
 0x1cc   :  { %v590_v45 = vadd.f32 %v588_v44, %v580_v39 }
 0x1ce   :  { %v598_v46 = vadd.f32 %v596_v43, %v590_v45 }
 0x1cf   :  { %v604_v48 = vpop.permute.xlu1 %603  ;;  %v600_v49 = vpop.permute.xlu0 %599 }
 0x1d0   :  { %v606_v50 = vadd.f32 %v604_v48, %v598_v46  ;;  %v602_v51 = vadd.f32 %v600_v49, %v594_v47 }
 0x1d2   :  { %v607_v52 = vmul.f32 0.0078125, %v602_v51  ;;  %v608_v53 = vmul.f32 0.0078125, %v606_v50 }
 0x1d4   :  { %v609_v54 = vmul.f32 %v607_v52, %v607_v52 }
 0x1d6   :  { %v610_v55 = vsub.f32 %v608_v53, %v609_v54 }
 0x1d8   :  { %v611_v56 = vmax.f32 %v610_v55, 0.0 }
 0x1da   :  { %v613_v57 = vadd.f32 1e-05, %v611_v56 }
 0x1dc   :  { %872 = vrsqrt.f32 %v613_v57 }
 0x1e6   :  { %v873_v62 = vpop.eup %872 }
 0x1e7   :  { %v615_v63 = vmul.f32 %v873_v62, %v612_v60 }
 0x1e9   :  { %v617_v1 = vmul.f32 %v615_v63, %v607_v52  ;;  %v623_v2 = vrot.slane %v615_v63, %v622_v61 }
 0x1eb   :  { %v618_v3 = vsub.f32 %v616_v0, %v617_v1  ;;  %627 = vrot.lane.b32.xlu1 %v623_v2, %s946_s2  ;;  %624 = vrot.lane.b32.xlu0 %v623_v2, %s950_s21 }
 0x1ed   :  { %v642_v4 = vrot.slane %v618_v3, %v622_v61 }
 0x1ef   :  { %630 = vrot.lane.b32.xlu0 %v623_v2, %s949_s0  ;;  %643 = vrot.lane.b32.xlu1 %v642_v4, %s950_s21 }
 0x1f3   :  { %646 = vrot.lane.b32.xlu0 %v642_v4, %s946_s2  ;;  %649 = vrot.lane.b32.xlu1 %v642_v4, %s949_s0 }
 0x25d   :  { %v628_v5 = vpop.permute.xlu1 %627  ;;  %v625_v6 = vpop.permute.xlu0 %624 }
 0x25e   :  { %v634_v7 = vsel %vm633_vm1, %v615_v63, %v625_v6 }
 0x25f   :  { %v635_v8 = vsel %vm405_vm0, %v634_v7, %v628_v5 }
 0x261   :  { %v631_v9 = vpop.permute.xlu0 %630  ;;  %v644_v10 = vpop.permute.xlu1 %643 }
 0x262   :  { %v637_v12 = vsel %vm636_vm2, %v635_v8, %v631_v9  ;;  %v652_v16 = vsel %vm633_vm1, %v618_v3, %v644_v10 }
 0x263   :  { %v658_v14 = vrot.slane %v637_v12, %v622_v61 }
 0x265   :  { %v647_v18 = vpop.permute.xlu0 %646  ;;  %v650_v19 = vpop.permute.xlu1 %649  ;;  %v659_v21 = vmul.f32 %v658_v14, %v1055_v13  ;;  %v660_v23 = vmul.f32 %v658_v14, %v1059_v17  ;;  %v661_v24 = vmul.f32 %v658_v14, %v1053_v11  ;;  %v662_v25 = vmul.f32 %v658_v14, %v1057_v15 }
 0x266   :  { %v653_v20 = vsel %vm405_vm0, %v652_v16, %v647_v18 }
 0x267   :  { %v654_v22 = vsel %vm636_vm2, %v653_v20, %v650_v19 }
 0x268   :  { %v666_v26 = vrot.slane %v654_v22, %v622_v61 }
 0x26a   :  { %v667_v27 = vadd.f32 %v666_v26, %v659_v21  ;;  %v668_v28 = vadd.f32 %v666_v26, %v660_v23  ;;  %v669_v29 = vadd.f32 %v666_v26, %v661_v24  ;;  %v670_v30 = vadd.f32 %v666_v26, %v662_v25 }
 0x26c   :  { %vm671_vm3 = vcmp.ge.f32.partialorder %v667_v27, 0.0  ;;  %vm672_vm4 = vcmp.ge.f32.partialorder %v668_v28, 0.0  ;;  %vm673_vm5 = vcmp.ge.f32.partialorder %v669_v29, 0.0  ;;  %vm674_vm6 = vcmp.ge.f32.partialorder %v670_v30, 0.0 }
 0x26d   :  { %v675_v31 = vmul.f32 0.2, %v667_v27  ;;  %v676_v32 = vmul.f32 0.2, %v668_v28  ;;  %v677_v33 = vmul.f32 0.2, %v669_v29 }
 0x26e   :  { %v678_v13 = vmul.f32 0.2, %v670_v30 }
 0x26f   :  { %v679_v34 = vsel %vm671_vm3, %v667_v27, %v675_v31  ;;  %v680_v35 = vsel %vm672_vm4, %v668_v28, %v676_v32  ;;  %v681_v17 = vsel %vm673_vm5, %v669_v29, %v677_v33 }
 0x270   :  { %v682_v36 = vsel %vm674_vm6, %v670_v30, %v678_v13  ;;  %683 = vst [vmem:[%s1107_s4] sm:$0xff] %v679_v34  ;;  %684 = vst [vmem:[%s1107_s4 + $0x8] sm:$0xff] %v680_v35 }
 0x271   :  { %685 = vst [vmem:[%s1107_s4 + $0x10] sm:$0xff] %v681_v17  ;;  %686 = vst [vmem:[%s1107_s4 + $0x18] sm:$0xff] %v682_v36 }
 0x272   :  { %691 = vsyncpa [#allocation3], 1 }
 0x273   :  { %692 = vsyncpa [#allocation5], 1 }

// kernel: generator_forward.9
= control target key start
LH: loop header
LB: loop body
LE: loop exit
PB: predicated region body
PF: predicated region fallthrough
CT: control target
= control target key end

     0   :  { %vm314_vm0 = vcmask 261120   ;;  %vm1424_vm1 = vcmask 523264   ;;  %s1025_s19 = smov 112   ;;  %s1026_s20 = smov 80   ;;  %vm676_vm2 = vcmask 130048   ;;  %vm679_vm3 = vcmask 392192   ;;  %s1419_s1 = inlined_call_operand.vmem [shape: bf16[288,64], index: 1, kind: input, shape index: {}]   ;;  %s1420_s0 = inlined_call_operand.vmem [shape: bf16[128,288], index: 0, kind: input, shape index: {}]   ;;  %s1421_s2 = inlined_call_operand.vmem [shape: f32[1,16], index: 2, kind: input, shape index: {}]   ;;  %s1422_s3 = inlined_call_operand.vmem [shape: f32[1,16], index: 3, kind: input, shape index: {}]   ;;  %s1423_s4 = inlined_call_operand.vmem [shape: f32[128,64], index: 4, kind: output, shape index: {}]  }
   0x1   :  { %v972_v0 = vld [vmem:[%s1419_s1 + $0x40] sm:$0xff]   ;;  %v974_v2 = vld [vmem:[%s1419_s1 + $0x48] sm:$0xff]   ;;  %v976_v4 = vld [vmem:[%s1419_s1 + $0x50] sm:$0xff]   ;;  %s1027_s25 = smov 32   ;;  %s1028_s26 = smov 16  }
   0x2   :  { %v973_v1 = vld [vmem:[%s1419_s1] sm:$0xff]   ;;  %856 = vmatprep.subr.bf16.mxu0 %v972_v0  ;;  %950 = vmatprep.subr.bf16.mxu1 %v972_v0  ;;  %v975_v3 = vld [vmem:[%s1419_s1 + $0x8] sm:$0xff]   ;;  %v977_v5 = vld [vmem:[%s1419_s1 + $0x10] sm:$0xff]   ;;  %s1029_s27 = smov 48  }
   0x3   :  { %857 = vmatpush3.bf16.msra.mxu0 %v973_v1  ;;  %958 = vmatpush3.bf16.msra.mxu1 %v973_v1  ;;  %v978_v6 = vld [vmem:[%s1419_s1 + $0x58] sm:$0xff]   ;;  %v980_v8 = vld [vmem:[%s1419_s1 + $0x60] sm:$0xff]   ;;  %v982_v10 = vld [vmem:[%s1419_s1 + $0x68] sm:$0xff]  }
   0x4   :  { %858 = vmatprep.subr.bf16.mxu0 %v974_v2  ;;  %951 = vmatprep.subr.bf16.mxu1 %v974_v2  ;;  %v979_v7 = vld [vmem:[%s1419_s1 + $0x18] sm:$0xff]   ;;  %v981_v9 = vld [vmem:[%s1419_s1 + $0x20] sm:$0xff]   ;;  %v983_v13 = vld [vmem:[%s1419_s1 + $0x28] sm:$0xff]  }
   0x5   :  { %v990_v11 = vld [vmem:[%s1420_s0 + $0x4] ss:$12 sps:$4 sm:$0xff]   ;;  %v993_v12 = vld [vmem:[%s1420_s0 + $0x94] ss:$12 sps:$4 sm:$0xff]   ;;  %v986_v16 = vld [vmem:[%s1419_s1 + $0x78] sm:$0xff]  }
   0x6   :  { %v984_v14 = vld [vmem:[%s1419_s1 + $0x70] sm:$0xff]   ;;  %371 = vmatprep.mubr.bf16.mxu0 %v990_v11  ;;  %419 = vmatprep.mubr.bf16.mxu1 %v993_v12  ;;  %v987_v17 = vld [vmem:[%s1419_s1 + $0x38] sm:$0xff]   ;;  %v988_v18 = vld [vmem:[%s1420_s0] ss:$12 sps:$4 sm:$0xff]  }
   0x7   :  { %859 = vmatpush3.bf16.msra.mxu0 %v975_v3  ;;  %959 = vmatpush3.bf16.msra.mxu1 %v975_v3  ;;  %v985_v15 = vld [vmem:[%s1419_s1 + $0x30] sm:$0xff]   ;;  %v994_v19 = vld [vmem:[%s1419_s1 + $0x80] sm:$0xff]   ;;  %v995_v21 = vld [vmem:[%s1420_s0 + $0x1c] ss:$12 sps:$4 sm:$0xff]  }
   0x8   :  { %860 = vmatprep.subr.bf16.mxu0 %v976_v4  ;;  %952 = vmatprep.subr.bf16.mxu1 %v976_v4  ;;  %v991_v20 = vld [vmem:[%s1420_s0 + $0x90] ss:$12 sps:$4 sm:$0xff]   ;;  %v997_v22 = vld [vmem:[%s1420_s0 + $0xac] ss:$12 sps:$4 sm:$0xff]   ;;  %v1000_v25 = vld [vmem:[%s1420_s0 + $0xa8] ss:$12 sps:$4 sm:$0xff]  }
   0x9   :  { %v1001_v23 = vld [vmem:[%s1419_s1 + $0x88] sm:$0xff]   ;;  %v999_v24 = vld [vmem:[%s1420_s0 + $0x18] ss:$12 sps:$4 sm:$0xff]   ;;  %v1002_v26 = vld [vmem:[%s1420_s0 + $0x34] ss:$12 sps:$4 sm:$0xff]  }
   0xa   :  { %v1004_v27 = vld [vmem:[%s1420_s0 + $0x8] ss:$12 sps:$4 sm:$0xff]   ;;  %v1005_v28 = vld [vmem:[%s1420_s0 + $0x30] ss:$12 sps:$4 sm:$0xff]   ;;  %v1006_v29 = vld [vmem:[%s1420_s0 + $0x20] ss:$12 sps:$4 sm:$0xff]  }
   0xb   :  { %861 = vmatpush3.bf16.msra.mxu0 %v977_v5  ;;  %960 = vmatpush3.bf16.msra.mxu1 %v977_v5  ;;  %v1007_v30 = vld [vmem:[%s1420_s0 + $0x4c] ss:$12 sps:$4 sm:$0xff]   ;;  %v1010_v32 = vld [vmem:[%s1420_s0 + $0x48] ss:$12 sps:$4 sm:$0xff]   ;;  %v1011_v33 = vld [vmem:[%s1420_s0 + $0x50] ss:$12 sps:$4 sm:$0xff]  }
   0xc   :  { %862 = vmatprep.subr.bf16.mxu0 %v978_v6  ;;  %953 = vmatprep.subr.bf16.mxu1 %v978_v6  ;;  %v1009_v31 = vld [vmem:[%s1420_s0 + $0x38] ss:$12 sps:$4 sm:$0xff]   ;;  %v1014_v35 = vld [vmem:[%s1420_s0 + $0x68] ss:$12 sps:$4 sm:$0xff]   ;;  %v1015_v36 = vld [vmem:[%s1420_s0 + $0x60] ss:$12 sps:$4 sm:$0xff]  }
   0xd   :  { %v1012_v34 = vld [vmem:[%s1420_s0 + $0x64] ss:$12 sps:$4 sm:$0xff]   ;;  %v1016_v37 = vld [vmem:[%s1420_s0 + $0x80] ss:$12 sps:$4 sm:$0xff]   ;;  %v1017_v38 = vld [vmem:[%s1420_s0 + $0x7c] ss:$12 sps:$4 sm:$0xff]  }
   0xe   :  { %v1019_v39 = vld [vmem:[%s1420_s0 + $0x98] ss:$12 sps:$4 sm:$0xff]   ;;  %v1021_v41 = vld [vmem:[%s1420_s0 + $0xb0] ss:$12 sps:$4 sm:$0xff]  }
   0xf   :  { %863 = vmatpush3.bf16.msra.mxu0 %v979_v7  ;;  %961 = vmatpush3.bf16.msra.mxu1 %v979_v7  ;;  %v1020_v40 = vld [vmem:[%s1420_s0 + $0x78] ss:$12 sps:$4 sm:$0xff]   ;;  %s1024_s0 = smov 96  }
  0x10   :  { %864 = vmatprep.subr.bf16.mxu0 %v980_v8  ;;  %954 = vmatprep.subr.bf16.mxu1 %v980_v8 }
  0x13   :  { %865 = vmatpush3.bf16.msra.mxu0 %v981_v9  ;;  %962 = vmatpush3.bf16.msra.mxu1 %v981_v9 }
  0x14   :  { %866 = vmatprep.subr.bf16.mxu0 %v982_v10  ;;  %955 = vmatprep.subr.bf16.mxu1 %v982_v10 }
  0x17   :  { %867 = vmatpush3.bf16.msra.mxu0 %v983_v13  ;;  %963 = vmatpush3.bf16.msra.mxu1 %v983_v13 }
  0x18   :  { %868 = vmatprep.subr.bf16.mxu0 %v984_v14  ;;  %956 = vmatprep.subr.bf16.mxu1 %v984_v14 }
  0x1b   :  { %869 = vmatpush3.bf16.msra.mxu0 %v985_v15  ;;  %964 = vmatpush3.bf16.msra.mxu1 %v985_v15 }
  0x1c   :  { %870 = vmatprep.subr.bf16.mxu0 %v986_v16  ;;  %957 = vmatprep.subr.bf16.mxu1 %v986_v16 }
  0x1f   :  { %871 = vmatpush3.bf16.msra.mxu0 %v987_v17  ;;  %965 = vmatpush3.bf16.msra.mxu1 %v987_v17 }
  0x20   :  { %930 = vmatprep.subr.bf16.mxu1 %v994_v19 }
  0x22   :  { %372 = vmatmul.mubr.bf16.vlgmr.msra.gmra.mrb[0].mxu0 %v988_v18  ;;  %420 = vmatmul.mubr.bf16.vlgmr.msra.gmra.mrb[0].mxu1 %v991_v20 }
  0x23   :  { %931 = vmatpush3.bf16.msra.mxu1 %v994_v19  ;;  %379 = vmatprep.mubr.bf16.mxu0 %v995_v21 }
  0x24   :  { %427 = vmatprep.mubr.bf16.mxu1 %v997_v22  ;;  %932 = vmatprep.subr.bf16.mxu1 %v1001_v23 }
  0x27   :  { %933 = vmatpush3.bf16.msra.mxu1 %v1001_v23 }
  0x2a   :  { %380 = vmatmul.mubr.bf16.gmra.mrb[4].mxu0 %v999_v24  ;;  %428 = vmatmul.mubr.bf16.gmra.mrb[4].mxu1 %v1000_v25 }
  0x2b   :  { %387 = vmatprep.mubr.bf16.mxu0 %v1002_v26  ;;  %934 = vmatprep.mubr.msk.bf16.mxu1 %vm314_vm0, %v1004_v27 }
  0x32   :  { %388 = vmatmul.mubr.bf16.gmra.mrb[8].mxu0 %v1005_v28  ;;  %935 = vmatmul.mubr.msk.bf16.vlgmr.msra.gmra.mrb[8].mxu1 %vm314_vm0, %v1006_v29 }
  0x33   :  { %395 = vmatprep.mubr.bf16.mxu0 %v1007_v30  ;;  %938 = vmatprep.mubr.msk.bf16.mxu1 %vm314_vm0, %v1009_v31 }
  0x3a   :  { %396 = vmatmul.mubr.bf16.gmra.mrb[12].mxu0 %v1010_v32  ;;  %939 = vmatmul.mubr.msk.bf16.gmra.mrb[12].mxu1 %vm314_vm0, %v1011_v33 }
  0x3b   :  { %403 = vmatprep.mubr.bf16.mxu0 %v1012_v34  ;;  %942 = vmatprep.mubr.msk.bf16.mxu1 %vm314_vm0, %v1014_v35 }
  0x42   :  { %404 = vmatmul.mubr.bf16.gmra.mrb[16].mxu0 %v1015_v36  ;;  %943 = vmatmul.mubr.msk.bf16.gmra.mrb[16].mxu1 %vm314_vm0, %v1016_v37 }
  0x43   :  { %411 = vmatprep.mubr.bf16.mxu0 %v1017_v38  ;;  %946 = vmatprep.mubr.msk.bf16.mxu1 %vm314_vm0, %v1019_v39 }
  0x4a   :  { %412 = vmatmul.mubr.bf16.gmra.mrb[20].mxu0 %v1020_v40  ;;  %947 = vmatmul.mubr.msk.bf16.gmra.mrb[20].mxu1 %vm314_vm0, %v1021_v41 }
  0xf5   :  { %v872_v42 = vpop.f32.mrb[0].mxu0  ;;  %v908_v43 = vpop.f32.mrb[0].mxu1 }
  0xf6   :  { %v873_v44 = vpop.f32.mrb[1].mxu0  ;;  %v909_v45 = vpop.f32.mrb[1].mxu1 }
  0xf7   :  { %v874_v46 = vadd.f32 %v873_v44, %v872_v42  ;;  %v875_v47 = vpop.f32.mrb[2].mxu0  ;;  %v1189_v48 = vadd.f32 %v909_v45, %v908_v43  ;;  %v911_v49 = vpop.f32.mrb[2].mxu1 }
  0xf8   :  { %v876_v50 = vpop.f32.mrb[3].mxu0  ;;  %v912_v51 = vpop.f32.mrb[3].mxu1 }
  0xf9   :  { %v877_v52 = vadd.f32 %v876_v50, %v875_v47  ;;  %v1191_v53 = vadd.f32 %v912_v51, %v911_v49 }
  0xfd   :  { %v878_v54 = vpop.f32.mrb[4].mxu0  ;;  %v914_v55 = vpop.f32.mrb[4].mxu1 }
  0xfe   :  { %v879_v56 = vpop.f32.mrb[5].mxu0  ;;  %v915_v57 = vpop.f32.mrb[5].mxu1 }
  0xff   :  { %v880_v58 = vadd.f32 %v879_v56, %v878_v54  ;;  %v881_v59 = vpop.f32.mrb[6].mxu0  ;;  %v1193_v60 = vadd.f32 %v915_v57, %v914_v55  ;;  %v917_v61 = vpop.f32.mrb[6].mxu1 }
 0x100   :  { %v882_v62 = vpop.f32.mrb[7].mxu0  ;;  %v918_v63 = vpop.f32.mrb[7].mxu1 }
 0x101   :  { %v883_v0 = vadd.f32 %v882_v62, %v881_v59  ;;  %v1195_v1 = vadd.f32 %v918_v63, %v917_v61 }
 0x105   :  { %v884_v2 = vpop.f32.mrb[8].mxu0  ;;  %v936_v3 = vpop.f32.mrb[8].mxu1 }
 0x106   :  { %v1197_v4 = vadd.f32 %v936_v3, %v880_v58  ;;  %v885_v5 = vpop.f32.mrb[9].mxu0  ;;  %v470_v6 = vpop.f32.mrb[9].mxu1 }
 0x107   :  { %v886_v7 = vadd.f32 %v885_v5, %v884_v2  ;;  %v1199_v8 = vadd.f32 %v874_v46, %v470_v6  ;;  %v887_v9 = vpop.f32.mrb[10].mxu0  ;;  %v937_v10 = vpop.f32.mrb[10].mxu1 }
 0x108   :  { %v1201_v11 = vadd.f32 %v937_v10, %v883_v0  ;;  %v888_v12 = vpop.f32.mrb[11].mxu0  ;;  %v473_v13 = vpop.f32.mrb[11].mxu1  ;;  %v573_v17 = vmul.f32 %v1197_v4, %v1197_v4  ;;  %v537_v23 = vsel %vm1424_vm1, %v1197_v4, 0.0 }
 0x109   :  { %v571_v14 = vmul.f32 %v1199_v8, %v1199_v8  ;;  %v889_v15 = vadd.f32 %v888_v12, %v887_v9  ;;  %v1205_v16 = vadd.f32 %v877_v52, %v473_v13  ;;  %v534_v18 = vsel %vm1424_vm1, %v1199_v8, 0.0 }
 0x10a   :  { %v574_v21 = vmul.f32 %v1201_v11, %v1201_v11  ;;  %v590_v32 = vsel %vm1424_vm1, %v573_v17, 0.0  ;;  %v539_v33 = vsel %vm1424_vm1, %v1201_v11, 0.0 }
 0x10b   :  { %v535_v19 = vsel %vm1424_vm1, %v1205_v16, 0.0  ;;  %v572_v20 = vmul.f32 %v1205_v16, %v1205_v16  ;;  %v587_v24 = vsel %vm1424_vm1, %v571_v14, 0.0 }
 0x10c   :  { %v536_v22 = vadd.f32 %v535_v19, %v534_v18  ;;  %v592_v38 = vsel %vm1424_vm1, %v574_v21, 0.0 }
 0x10d   :  { %v588_v25 = vsel %vm1424_vm1, %v572_v20, 0.0  ;;  %v890_v26 = vpop.f32.mrb[12].mxu0  ;;  %v940_v27 = vpop.f32.mrb[12].mxu1 }
 0x10e   :  { %v538_v28 = vadd.f32 %v537_v23, %v536_v22  ;;  %v589_v29 = vadd.f32 %v588_v25, %v587_v24  ;;  %v891_v30 = vpop.f32.mrb[13].mxu0  ;;  %v486_v31 = vpop.f32.mrb[13].mxu1 }
 0x10f   :  { %v892_v34 = vadd.f32 %v891_v30, %v890_v26  ;;  %v1224_v35 = vadd.f32 %v886_v7, %v486_v31  ;;  %v893_v36 = vpop.f32.mrb[14].mxu0  ;;  %v941_v37 = vpop.f32.mrb[14].mxu1 }
 0x110   :  { %v591_v39 = vadd.f32 %v590_v32, %v589_v29  ;;  %v540_v40 = vadd.f32 %v539_v33, %v538_v28  ;;  %v894_v41 = vpop.f32.mrb[15].mxu0  ;;  %v489_v42 = vpop.f32.mrb[15].mxu1 }
 0x111   :  { %v1227_v43 = vadd.f32 %v940_v27, %v892_v34  ;;  %v541_v44 = vsel %vm1424_vm1, %v1224_v35, 0.0  ;;  %v575_v45 = vmul.f32 %v1224_v35, %v1224_v35  ;;  %v895_v46 = vadd.f32 %v894_v41, %v893_v36 }
 0x112   :  { %v542_v47 = vadd.f32 %v541_v44, %v540_v40  ;;  %v593_v49 = vadd.f32 %v592_v38, %v591_v39  ;;  %v1233_v50 = vadd.f32 %v889_v15, %v489_v42 }
 0x113   :  { %v594_v51 = vsel %vm1424_vm1, %v575_v45, 0.0  ;;  %v1236_v52 = vadd.f32 %v941_v37, %v895_v46  ;;  %v577_v57 = vmul.f32 %v1227_v43, %v1227_v43  ;;  %v545_v2 = vsel %vm1424_vm1, %v1227_v43, 0.0 }
 0x114   :  { %v595_v54 = vadd.f32 %v594_v51, %v593_v49  ;;  %v543_v55 = vsel %vm1424_vm1, %v1233_v50, 0.0  ;;  %v576_v56 = vmul.f32 %v1233_v50, %v1233_v50 }
 0x115   :  { %v544_v58 = vadd.f32 %v543_v55, %v542_v47  ;;  %v896_v59 = vpop.f32.mrb[16].mxu0  ;;  %v944_v61 = vpop.f32.mrb[16].mxu1  ;;  %v598_v13 = vsel %vm1424_vm1, %v577_v57, 0.0  ;;  %v578_v14 = vmul.f32 %v1236_v52, %v1236_v52  ;;  %v547_v19 = vsel %vm1424_vm1, %v1236_v52, 0.0 }
 0x116   :  { %v596_v62 = vsel %vm1424_vm1, %v576_v56, 0.0  ;;  %v897_v63 = vpop.f32.mrb[17].mxu0  ;;  %v502_v0 = vpop.f32.mrb[17].mxu1 }
 0x117   :  { %v597_v3 = vadd.f32 %v596_v62, %v595_v54  ;;  %v898_v5 = vadd.f32 %v897_v63, %v896_v59  ;;  %v899_v6 = vpop.f32.mrb[18].mxu0  ;;  %v945_v7 = vpop.f32.mrb[18].mxu1  ;;  %v546_v9 = vadd.f32 %v545_v2, %v544_v58  ;;  %v600_v24 = vsel %vm1424_vm1, %v578_v14, 0.0 }
 0x118   :  { %v900_v10 = vpop.f32.mrb[19].mxu0  ;;  %v505_v12 = vpop.f32.mrb[19].mxu1 }
 0x119   :  { %v901_v15 = vadd.f32 %v900_v10, %v899_v6  ;;  %v1250_v17 = vadd.f32 %v898_v5, %v502_v0  ;;  %v599_v18 = vadd.f32 %v598_v13, %v597_v3  ;;  %v548_v23 = vadd.f32 %v547_v19, %v546_v9 }
 0x11b   :  { %v549_v20 = vsel %vm1424_vm1, %v1250_v17, 0.0  ;;  %v579_v21 = vmul.f32 %v1250_v17, %v1250_v17  ;;  %v1258_v22 = vadd.f32 %v901_v15, %v505_v12  ;;  %v601_v30 = vadd.f32 %v600_v24, %v599_v18 }
 0x11c   :  { %v550_v29 = vadd.f32 %v549_v20, %v548_v23 }
 0x11d   :  { %v602_v25 = vsel %vm1424_vm1, %v579_v21, 0.0  ;;  %v580_v26 = vmul.f32 %v1258_v22, %v1258_v22  ;;  %v902_v27 = vpop.f32.mrb[20].mxu0  ;;  %v948_v28 = vpop.f32.mrb[20].mxu1  ;;  %v551_v34 = vsel %vm1424_vm1, %v1258_v22, 0.0 }
 0x11e   :  { %v1265_v31 = vadd.f32 %v948_v28, %v1193_v60  ;;  %v903_v32 = vpop.f32.mrb[21].mxu0  ;;  %v518_v33 = vpop.f32.mrb[21].mxu1  ;;  %v603_v40 = vadd.f32 %v602_v25, %v601_v30  ;;  %v552_v47 = vadd.f32 %v551_v34, %v550_v29 }
 0x11f   :  { %v904_v36 = vadd.f32 %v903_v32, %v902_v27  ;;  %v1270_v37 = vadd.f32 %v1189_v48, %v518_v33  ;;  %v905_v38 = vpop.f32.mrb[22].mxu0  ;;  %v949_v39 = vpop.f32.mrb[22].mxu1  ;;  %v604_v60 = vsel %vm1424_vm1, %v580_v26, 0.0 }
 0x120   :  { %v1273_v41 = vadd.f32 %v949_v39, %v1195_v1  ;;  %v906_v42 = vpop.f32.mrb[23].mxu0  ;;  %v521_v44 = vpop.f32.mrb[23].mxu1  ;;  %v605_v1 = vadd.f32 %v604_v60, %v603_v40  ;;  %v585_v5 = vmul.f32 %v1265_v31, %v1265_v31  ;;  %v561_v12 = vsel %vm1424_vm1, %v1265_v31, 0.0 }
 0x121   :  { %v1276_v45 = vadd.f32 %v944_v61, %v904_v36  ;;  %v907_v46 = vadd.f32 %v906_v42, %v905_v38  ;;  %v1279_v49 = vadd.f32 %v1191_v53, %v521_v44  ;;  %v583_v57 = vmul.f32 %v1270_v37, %v1270_v37 }
 0x122   :  { %v557_v62 = vsel %vm1424_vm1, %v1270_v37, 0.0  ;;  %v586_v13 = vmul.f32 %v1273_v41, %v1273_v41  ;;  %v614_v19 = vsel %vm1424_vm1, %v585_v5, 0.0  ;;  %v563_v20 = vsel %vm1424_vm1, %v1273_v41, 0.0  ;;  %v655_v5 = vld [vmem:[%s1421_s2] sm:$0x1] }
 0x123   :  { %v553_v48 = vsel %vm1424_vm1, %v1276_v45, 0.0  ;;  %v581_v51 = vmul.f32 %v1276_v45, %v1276_v45  ;;  %v1285_v54 = vadd.f32 %v945_v7, %v907_v46  ;;  %v584_v0 = vmul.f32 %v1279_v49, %v1279_v49 }
 0x124   :  { %v554_v55 = vadd.f32 %v553_v48, %v552_v47  ;;  %v610_v6 = vsel %vm1424_vm1, %v583_v57, 0.0  ;;  %v559_v7 = vsel %vm1424_vm1, %v1279_v49, 0.0  ;;  %v616_v24 = vsel %vm1424_vm1, %v586_v13, 0.0 }
 0x125   :  { %v606_v56 = vsel %vm1424_vm1, %v581_v51, 0.0  ;;  %v555_v58 = vsel %vm1424_vm1, %v1285_v54, 0.0  ;;  %v582_v53 = vmul.f32 %v1285_v54, %v1285_v54  ;;  %v612_v14 = vsel %vm1424_vm1, %v584_v0, 0.0 }
 0x126   :  { %v607_v59 = vadd.f32 %v606_v56, %v605_v1  ;;  %v556_v61 = vadd.f32 %v555_v58, %v554_v55 }
 0x127   :  { %v608_v63 = vsel %vm1424_vm1, %v582_v53, 0.0 }
 0x128   :  { %v609_v2 = vadd.f32 %v608_v63, %v607_v59  ;;  %v558_v3 = vadd.f32 %v557_v62, %v556_v61 }
 0x12a   :  { %v560_v9 = vadd.f32 %v559_v7, %v558_v3  ;;  %v611_v10 = vadd.f32 %v610_v6, %v609_v2  ;;  %v663_v2 = vlaneseq }
 0x12c   :  { %v562_v15 = vadd.f32 %v561_v12, %v560_v9  ;;  %v613_v18 = vadd.f32 %v612_v14, %v611_v10  ;;  %v664_v3 = vshrl.u32 %v663_v2, 7  ;;  %v659_v10 = vld [vmem:[%s1422_s3] sm:$0x1] }
 0x12e   :  { %v564_v21 = vadd.f32 %v563_v20, %v562_v15  ;;  %v615_v23 = vadd.f32 %v614_v19, %v613_v18  ;;  %v665_v6 = vsub.s32 0, %v664_v3 }
 0x130   :  { %v565_v25 = vrot.slane %v564_v21, 4  ;;  %v617_v26 = vadd.f32 %v616_v24, %v615_v23 }
 0x132   :  { %v566_v27 = vadd.f32 %v565_v25, %v564_v21  ;;  %v618_v28 = vrot.slane %v617_v26, 4 }
 0x134   :  { %v567_v29 = vrot.slane %v566_v27, 2  ;;  %v619_v30 = vadd.f32 %v618_v28, %v617_v26 }
 0x136   :  { %v568_v32 = vadd.f32 %v567_v29, %v566_v27  ;;  %v620_v33 = vrot.slane %v619_v30, 2 }
 0x138   :  { %v569_v34 = vrot.slane %v568_v32, 1  ;;  %v621_v36 = vadd.f32 %v620_v33, %v619_v30 }
 0x13a   :  { %v570_v38 = vadd.f32 %v569_v34, %v568_v32  ;;  %v622_v39 = vrot.slane %v621_v36, 1 }
 0x13c   :  { %634 = vrot.lane.b32.xlu1 %v570_v38, %s1024_s0  ;;  %625 = vrot.lane.b32.xlu0 %v570_v38, %s1025_s19  ;;  %v623_v40 = vadd.f32 %v622_v39, %v621_v36 }
 0x140   :  { %638 = vrot.lane.b32.xlu1 %v623_v40, %s1024_s0  ;;  %630 = vrot.lane.b32.xlu0 %v623_v40, %s1025_s19 }
 0x144   :  { %646 = vrot.lane.b32.xlu1 %v623_v40, %s1026_s20  ;;  %642 = vrot.lane.b32.xlu0 %v570_v38, %s1026_s20 }
 0x1ae   :  { %v635_v42 = vpop.permute.xlu1 %634  ;;  %v626_v44 = vpop.permute.xlu0 %625 }
 0x1af   :  { %v628_v60 = vadd.f32 %v626_v44, %v570_v38 }
 0x1b1   :  { %v637_v1 = vadd.f32 %v635_v42, %v628_v60 }
 0x1b2   :  { %v639_v46 = vpop.permute.xlu1 %638  ;;  %v631_v47 = vpop.permute.xlu0 %630 }
 0x1b3   :  { %v633_v48 = vadd.f32 %v631_v47, %v623_v40 }
 0x1b5   :  { %v641_v51 = vadd.f32 %v639_v46, %v633_v48 }
 0x1b6   :  { %v647_v55 = vpop.permute.xlu1 %646  ;;  %v643_v56 = vpop.permute.xlu0 %642 }
 0x1b7   :  { %v649_v57 = vadd.f32 %v647_v55, %v641_v51  ;;  %v645_v58 = vadd.f32 %v643_v56, %v637_v1 }
 0x1b9   :  { %v650_v53 = vmul.f32 0.001953125, %v645_v58  ;;  %v651_v59 = vmul.f32 0.001953125, %v649_v57 }
 0x1bb   :  { %v652_v61 = vmul.f32 %v650_v53, %v650_v53 }
 0x1bd   :  { %v653_v62 = vsub.f32 %v651_v59, %v652_v61 }
 0x1bf   :  { %v654_v63 = vmax.f32 %v653_v62, 0.0 }
 0x1c1   :  { %v656_v0 = vadd.f32 1e-05, %v654_v63 }
 0x1c3   :  { %1022 = vrsqrt.f32 %v656_v0 }
 0x1cd   :  { %v1023_v7 = vpop.eup %1022 }
 0x1ce   :  { %v658_v9 = vmul.f32 %v1023_v7, %v655_v5 }
 0x1d0   :  { %v660_v12 = vmul.f32 %v658_v9, %v650_v53  ;;  %v666_v13 = vrot.slane %v658_v9, %v665_v6 }
 0x1d2   :  { %v661_v14 = vsub.f32 %v659_v10, %v660_v12  ;;  %670 = vrot.lane.b32.xlu1 %v666_v13, %s1027_s25  ;;  %667 = vrot.lane.b32.xlu0 %v666_v13, %s1028_s26 }
 0x1d4   :  { %v685_v15 = vrot.slane %v661_v14, %v665_v6 }
 0x1d6   :  { %673 = vrot.lane.b32.xlu0 %v666_v13, %s1029_s27  ;;  %686 = vrot.lane.b32.xlu1 %v685_v15, %s1028_s26 }
 0x1da   :  { %689 = vrot.lane.b32.xlu0 %v685_v15, %s1027_s25  ;;  %692 = vrot.lane.b32.xlu1 %v685_v15, %s1029_s27 }
 0x244   :  { %v671_v18 = vpop.permute.xlu1 %670  ;;  %v668_v19 = vpop.permute.xlu0 %667 }
 0x245   :  { %v677_v20 = vsel %vm676_vm2, %v658_v9, %v668_v19 }
 0x246   :  { %v678_v21 = vsel %vm314_vm0, %v677_v20, %v671_v18 }
 0x248   :  { %v674_v23 = vpop.permute.xlu0 %673  ;;  %v687_v24 = vpop.permute.xlu1 %686 }
 0x249   :  { %v680_v25 = vsel %vm679_vm3, %v678_v21, %v674_v23  ;;  %v695_v33 = vsel %vm676_vm2, %v661_v14, %v687_v24 }
 0x24a   :  { %v701_v26 = vrot.slane %v680_v25, %v665_v6 }
 0x24c   :  { %v690_v27 = vpop.permute.xlu0 %689  ;;  %v693_v28 = vpop.permute.xlu1 %692  ;;  %v702_v29 = vmul.f32 %v701_v26, %v1199_v8  ;;  %v703_v30 = vmul.f32 %v701_v26, %v1205_v16  ;;  %v704_v32 = vmul.f32 %v701_v26, %v1197_v4  ;;  %v705_v34 = vmul.f32 %v701_v26, %v1201_v11 }
 0x24d   :  { %v706_v36 = vmul.f32 %v701_v26, %v1224_v35  ;;  %v707_v38 = vmul.f32 %v701_v26, %v1233_v50  ;;  %v696_v39 = vsel %vm314_vm0, %v695_v33, %v690_v27  ;;  %v708_v40 = vmul.f32 %v701_v26, %v1227_v43 }
 0x24e   :  { %v709_v42 = vmul.f32 %v701_v26, %v1236_v52  ;;  %v710_v44 = vmul.f32 %v701_v26, %v1250_v17  ;;  %v697_v8 = vsel %vm679_vm3, %v696_v39, %v693_v28  ;;  %v711_v16 = vmul.f32 %v701_v26, %v1258_v22 }
 0x24f   :  { %v712_v4 = vmul.f32 %v701_v26, %v1276_v45  ;;  %v713_v11 = vmul.f32 %v701_v26, %v1285_v54  ;;  %v721_v60 = vrot.slane %v697_v8, %v665_v6  ;;  %v714_v35 = vmul.f32 %v701_v26, %v1270_v37 }
 0x250   :  { %v715_v50 = vmul.f32 %v701_v26, %v1279_v49  ;;  %v716_v46 = vmul.f32 %v701_v26, %v1265_v31  ;;  %v717_v43 = vmul.f32 %v701_v26, %v1273_v41  ;;  %vm1425_vm0 = vcmask 523264  }
 0x251   :  { %v722_v52 = vadd.f32 %v721_v60, %v702_v29  ;;  %v723_v47 = vadd.f32 %v721_v60, %v703_v30  ;;  %v724_v17 = vadd.f32 %v721_v60, %v704_v32  ;;  %v725_v48 = vadd.f32 %v721_v60, %v705_v34  ;;  %vm1426_vm1 = vmmov %vm1425_vm0 }
 0x252   :  { %v726_v51 = vadd.f32 %v721_v60, %v706_v36  ;;  %v727_v1 = vadd.f32 %v721_v60, %v707_v38  ;;  %v728_v22 = vadd.f32 %v721_v60, %v708_v40  ;;  %v729_v55 = vadd.f32 %v721_v60, %v709_v42 }
 0x253   :  { %v730_v45 = vadd.f32 %v721_v60, %v710_v44  ;;  %v731_v56 = vadd.f32 %v721_v60, %v711_v16  ;;  %v732_v54 = vadd.f32 %v721_v60, %v712_v4  ;;  %v733_v57 = vadd.f32 %v721_v60, %v713_v11 }
 0x254   :  { %v734_v58 = vadd.f32 %v721_v60, %v714_v35  ;;  %v735_v37 = vadd.f32 %v721_v60, %v715_v50  ;;  %v736_v53 = vadd.f32 %v721_v60, %v716_v46  ;;  %v737_v49 = vadd.f32 %v721_v60, %v717_v43 }
 0x255   :  { %vm738_vm4 = vcmp.ge.f32.partialorder %v722_v52, 0.0  ;;  %vm739_vm5 = vcmp.ge.f32.partialorder %v723_v47, 0.0  ;;  %vm740_vm6 = vcmp.ge.f32.partialorder %v724_v17, 0.0  ;;  %vm741_vm7 = vcmp.ge.f32.partialorder %v725_v48, 0.0 }
 0x256   :  { %vm742_vm8 = vcmp.ge.f32.partialorder %v726_v51, 0.0  ;;  %vm743_vm9 = vcmp.ge.f32.partialorder %v727_v1, 0.0  ;;  %vm744_vm10 = vcmp.ge.f32.partialorder %v728_v22, 0.0  ;;  %vm745_vm11 = vcmp.ge.f32.partialorder %v729_v55, 0.0 }
 0x257   :  { %vm746_vm12 = vcmp.ge.f32.partialorder %v730_v45, 0.0  ;;  %vm747_vm13 = vcmp.ge.f32.partialorder %v731_v56, 0.0  ;;  %vm748_vm14 = vcmp.ge.f32.partialorder %v732_v54, 0.0  ;;  %vm749_vm15 = vcmp.ge.f32.partialorder %v733_v57, 0.0 }
 0x258   :  { %vm751_vm2 = vcmp.ge.f32.partialorder %v735_v37, 0.0  ;;  %vm752_vm3 = vcmp.ge.f32.partialorder %v736_v53, 0.0  ;;  %v754_v31 = vmul.f32 0.2, %v722_v52  ;;  %v755_v41 = vmul.f32 0.2, %v723_v47 }
 0x259   :  { %v756_v59 = vmul.f32 0.2, %v724_v17  ;;  %v757_v61 = vmul.f32 0.2, %v725_v48  ;;  %v758_v62 = vmul.f32 0.2, %v726_v51 }
 0x25a   :  { %v759_v63 = vmul.f32 0.2, %v727_v1  ;;  %v760_v0 = vmul.f32 0.2, %v728_v22  ;;  %v761_v2 = vmul.f32 0.2, %v729_v55  ;;  %v770_v5 = vsel %vm738_vm4, %v722_v52, %v754_v31  ;;  %vm1427_vm4 = vmmov %vm1425_vm0 }
 0x25b   :  { %v762_v3 = vmul.f32 0.2, %v730_v45  ;;  %v763_v6 = vmul.f32 0.2, %v731_v56  ;;  %v764_v7 = vmul.f32 0.2, %v732_v54  ;;  %v771_v10 = vsel %vm739_vm5, %v723_v47, %v755_v41  ;;  %vm1429_vm5 = vmmov %vm1425_vm0 }
 0x25c   :  { %v765_v9 = vmul.f32 0.2, %v733_v57  ;;  %786 = vst.msk [vmem:[%s1423_s4] sm:$0xff] %vm1425_vm0, %v770_v5  ;;  %v766_v12 = vmul.f32 0.2, %v734_v58  ;;  %v772_v15 = vsel %vm740_vm6, %v724_v17, %v756_v59  ;;  %v773_v19 = vsel %vm741_vm7, %v725_v48, %v757_v61  ;;  %vm1430_vm6 = vmmov %vm1425_vm0 }
 0x25d   :  { %v767_v13 = vmul.f32 0.2, %v735_v37  ;;  %v768_v14 = vmul.f32 0.2, %v736_v53  ;;  %787 = vst.msk [vmem:[%s1423_s4 + $0x8] sm:$0xff] %vm1426_vm1, %v771_v10  ;;  %v774_v20 = vsel %vm742_vm8, %v726_v51, %v758_v62  ;;  %v775_v21 = vsel %vm743_vm9, %v727_v1, %v759_v63  ;;  %vm1428_vm1 = vmmov %vm1425_vm0 }
 0x25e   :  { %v769_v18 = vmul.f32 0.2, %v737_v49  ;;  %788 = vst.msk [vmem:[%s1423_s4 + $0x10] sm:$0xff] %vm1427_vm4, %v772_v15  ;;  %v776_v23 = vsel %vm744_vm10, %v728_v22, %v760_v0  ;;  %v777_v24 = vsel %vm745_vm11, %v729_v55, %v761_v2  ;;  %v778_v25 = vsel %vm746_vm12, %v730_v45, %v762_v3  ;;  %vm1432_vm8 = vmmov %vm1425_vm0 }
 0x25f   :  { %v779_v26 = vsel %vm747_vm13, %v731_v56, %v763_v6  ;;  %789 = vst.msk [vmem:[%s1423_s4 + $0x18] sm:$0xff] %vm1428_vm1, %v773_v19  ;;  %v780_v27 = vsel %vm748_vm14, %v732_v54, %v764_v7  ;;  %v781_v28 = vsel %vm749_vm15, %v733_v57, %v765_v9  ;;  %vm1431_vm7 = vcmp.ge.f32.partialorder %v734_v58, 0.0  ;;  %vm1433_vm9 = vmmov %vm1425_vm0 }
 0x260   :  { %790 = vst.msk [vmem:[%s1423_s4 + $0x20] sm:$0xff] %vm1429_vm5, %v774_v20  ;;  %v782_v29 = vsel %vm1431_vm7, %v734_v58, %v766_v12  ;;  %v783_v30 = vsel %vm751_vm2, %v735_v37, %v767_v13  ;;  %vm1434_vm10 = vmmov %vm1425_vm0  ;;  %v784_v32 = vsel %vm752_vm3, %v736_v53, %v768_v14  ;;  %vm1436_vm12 = vcmp.ge.f32.partialorder %v737_v49, 0.0 }
 0x261   :  { %791 = vst.msk [vmem:[%s1423_s4 + $0x28] sm:$0xff] %vm1430_vm6, %v775_v21  ;;  %vm1435_vm11 = vmmov %vm1425_vm0  ;;  %v785_v33 = vsel %vm1436_vm12, %v737_v49, %v769_v18 }
 0x262   :  { %792 = vst.msk [vmem:[%s1423_s4 + $0x30] sm:$0xff] %vm1432_vm8, %v776_v23  ;;  %vm1437_vm13 = vmmov %vm1425_vm0 }
 0x263   :  { %793 = vst.msk [vmem:[%s1423_s4 + $0x38] sm:$0xff] %vm1433_vm9, %v777_v24  ;;  %vm1438_vm14 = vmmov %vm1425_vm0 }
 0x264   :  { %794 = vst.msk [vmem:[%s1423_s4 + $0x40] sm:$0xff] %vm1434_vm10, %v778_v25  ;;  %vm1439_vm15 = vmmov %vm1425_vm0 }
 0x265   :  { %795 = vst.msk [vmem:[%s1423_s4 + $0x48] sm:$0xff] %vm1435_vm11, %v779_v26  ;;  %vm1440_vm2 = vmmov %vm1425_vm0 }
 0x266   :  { %796 = vst.msk [vmem:[%s1423_s4 + $0x50] sm:$0xff] %vm1437_vm13, %v780_v27  ;;  %vm1441_vm3 = vmmov %vm1425_vm0 }
 0x267   :  { %797 = vst.msk [vmem:[%s1423_s4 + $0x58] sm:$0xff] %vm1438_vm14, %v781_v28 }
 0x268   :  { %798 = vst.msk [vmem:[%s1423_s4 + $0x60] sm:$0xff] %vm1439_vm15, %v782_v29 }
 0x269   :  { %799 = vst.msk [vmem:[%s1423_s4 + $0x68] sm:$0xff] %vm1425_vm0, %v783_v30 }
 0x26a   :  { %800 = vst.msk [vmem:[%s1423_s4 + $0x70] sm:$0xff] %vm1440_vm2, %v784_v32 }
 0x26b   :  { %801 = vst.msk [vmem:[%s1423_s4 + $0x78] sm:$0xff] %vm1441_vm3, %v785_v33 }

// kernel: generator_forward.10
= control target key start
LH: loop header
LB: loop body
LE: loop exit
PB: predicated region body
PF: predicated region fallthrough
CT: control target
= control target key end

     0   :  { %v1866_v0 = vmov 0   ;;  %vm442_vm0 = vcmask 130048   ;;  %vm828_vm1 = vcmask 261120   ;;  %s1868_s26 = smov 120   ;;  %s1869_s27 = smov 104   ;;  %vm1211_vm2 = vcmask 64512   ;;  %s3867_s1 = inlined_call_operand.vmem [shape: bf16[144,32], index: 1, kind: input, shape index: {}]   ;;  %s3868_s0 = inlined_call_operand.vmem [shape: bf16[512,144], index: 0, kind: input, shape index: {}]   ;;  %s3869_s2 = inlined_call_operand.vmem [shape: f32[1,8], index: 2, kind: input, shape index: {}]   ;;  %s3870_s3 = inlined_call_operand.vmem [shape: f32[1,8], index: 3, kind: input, shape index: {}]   ;;  %s3871_s4 = inlined_call_operand.vmem [shape: f32[512,32], index: 4, kind: output, shape index: {}]  }
   0x1   :  { %539 = vmatprep.subr.bf16.mxu0 %v1866_v0  ;;  %v1759_v1 = vld [vmem:[%s3867_s1] sm:$0xff]   ;;  %1734 = vmatprep.subr.bf16.mxu1 %v1866_v0  ;;  %v1760_v2 = vld [vmem:[%s3867_s1 + $0x8] sm:$0xff]   ;;  %v1761_v3 = vld [vmem:[%s3867_s1 + $0x10] sm:$0xff]   ;;  %s1870_s6 = smov 16   ;;  %s1871_s7 = smov 8   ;;  %vm1214_vm3 = vcmask 195584  }
   0x2   :  { %540 = vmatpush1.bf16.msra.mxu0 %v1759_v1  ;;  %1743 = vmatpush1.bf16.msra.mxu1 %v1759_v1  ;;  %v1762_v4 = vld [vmem:[%s3867_s1 + $0x18] sm:$0xff]   ;;  %v1770_v5 = vld [vmem:[%s3868_s0 + $0x4] ss:$8 sps:$4 sm:$0xff]   ;;  %v1765_v9 = vld [vmem:[%s3867_s1 + $0x30] sm:$0xff]   ;;  %s1872_s8 = smov 24  }
   0x3   :  { %541 = vmatprep.subr.bf16.mxu0 %v1866_v0  ;;  %1735 = vmatprep.subr.bf16.mxu1 %v1866_v0  ;;  %v1763_v6 = vld [vmem:[%s3867_s1 + $0x20] sm:$0xff]   ;;  %v1764_v7 = vld [vmem:[%s3867_s1 + $0x28] sm:$0xff]   ;;  %v1766_v10 = vld [vmem:[%s3867_s1 + $0x38] sm:$0xff]  }
   0x4   :  { %1702 = vmatprep.mubr.msk.bf16.mxu0 %vm442_vm0, %v1770_v5  ;;  %v1794_v8 = vld [vmem:[%s3868_s0 + $0x104] ss:$8 sps:$4 sm:$0xff]   ;;  %v1768_v12 = vld [vmem:[%s3868_s0] ss:$8 sps:$4 sm:$0xff]   ;;  %v1771_v13 = vld [vmem:[%s3868_s0 + $0x14] ss:$8 sps:$4 sm:$0xff]  }
   0x5   :  { %1718 = vmatprep.mubr.msk.bf16.mxu1 %vm442_vm0, %v1794_v8  ;;  %v1767_v11 = vld [vmem:[%s3867_s1 + $0x40] sm:$0xff]   ;;  %v1798_v15 = vld [vmem:[%s3868_s0 + $0x114] ss:$8 sps:$4 sm:$0xff]   ;;  %v1773_v16 = vld [vmem:[%s3868_s0 + $0x10] ss:$8 sps:$4 sm:$0xff]  }
   0x6   :  { %542 = vmatpush1.bf16.msra.mxu0 %v1760_v2  ;;  %1744 = vmatpush1.bf16.msra.mxu1 %v1760_v2  ;;  %v1792_v14 = vld [vmem:[%s3868_s0 + $0x100] ss:$8 sps:$4 sm:$0xff]   ;;  %v1774_v17 = vld [vmem:[%s3868_s0 + $0x24] ss:$8 sps:$4 sm:$0xff]   ;;  %v1800_v18 = vld [vmem:[%s3868_s0 + $0x110] ss:$8 sps:$4 sm:$0xff]  }
   0x7   :  { %543 = vmatprep.subr.bf16.mxu0 %v1866_v0  ;;  %1736 = vmatprep.subr.bf16.mxu1 %v1866_v0  ;;  %v1804_v19 = vld [vmem:[%s3868_s0 + $0x124] ss:$8 sps:$4 sm:$0xff]   ;;  %v1776_v20 = vld [vmem:[%s3868_s0 + $0x20] ss:$8 sps:$4 sm:$0xff]   ;;  %v1777_v21 = vld [vmem:[%s3868_s0 + $0x34] ss:$8 sps:$4 sm:$0xff]  }
   0x8   :  { %v1806_v22 = vld [vmem:[%s3868_s0 + $0x120] ss:$8 sps:$4 sm:$0xff]   ;;  %v1810_v23 = vld [vmem:[%s3868_s0 + $0x134] ss:$8 sps:$4 sm:$0xff]   ;;  %v1779_v24 = vld [vmem:[%s3868_s0 + $0x30] ss:$8 sps:$4 sm:$0xff]  }
   0x9   :  { %v1812_v25 = vld [vmem:[%s3868_s0 + $0x130] ss:$8 sps:$4 sm:$0xff]   ;;  %v1780_v26 = vld [vmem:[%s3868_s0 + $0x44] ss:$8 sps:$4 sm:$0xff]   ;;  %v1782_v28 = vld [vmem:[%s3868_s0 + $0x40] ss:$8 sps:$4 sm:$0xff]  }
   0xa   :  { %544 = vmatpush1.bf16.msra.mxu0 %v1761_v3  ;;  %1745 = vmatpush1.bf16.msra.mxu1 %v1761_v3  ;;  %v1816_v27 = vld [vmem:[%s3868_s0 + $0x144] ss:$8 sps:$4 sm:$0xff]   ;;  %v1818_v29 = vld [vmem:[%s3868_s0 + $0x140] ss:$8 sps:$4 sm:$0xff]   ;;  %v1783_v30 = vld [vmem:[%s3868_s0 + $0x54] ss:$8 sps:$4 sm:$0xff]  }
   0xb   :  { %545 = vmatprep.subr.bf16.mxu0 %v1866_v0  ;;  %1737 = vmatprep.subr.bf16.mxu1 %v1866_v0  ;;  %v1822_v31 = vld [vmem:[%s3868_s0 + $0x154] ss:$8 sps:$4 sm:$0xff]   ;;  %v1785_v32 = vld [vmem:[%s3868_s0 + $0x50] ss:$8 sps:$4 sm:$0xff]   ;;  %v1786_v34 = vld [vmem:[%s3868_s0 + $0x64] ss:$8 sps:$4 sm:$0xff]  }
   0xc   :  { %v1824_v33 = vld [vmem:[%s3868_s0 + $0x150] ss:$8 sps:$4 sm:$0xff]   ;;  %v1828_v35 = vld [vmem:[%s3868_s0 + $0x164] ss:$8 sps:$4 sm:$0xff]   ;;  %v1788_v36 = vld [vmem:[%s3868_s0 + $0x60] ss:$8 sps:$4 sm:$0xff]  }
   0xd   :  { %v1830_v37 = vld [vmem:[%s3868_s0 + $0x160] ss:$8 sps:$4 sm:$0xff]   ;;  %v1789_v38 = vld [vmem:[%s3868_s0 + $0x74] ss:$8 sps:$4 sm:$0xff]   ;;  %v1791_v40 = vld [vmem:[%s3868_s0 + $0x70] ss:$8 sps:$4 sm:$0xff]  }
   0xe   :  { %546 = vmatpush1.bf16.msra.mxu0 %v1762_v4  ;;  %1746 = vmatpush1.bf16.msra.mxu1 %v1762_v4  ;;  %v1834_v39 = vld [vmem:[%s3868_s0 + $0x174] ss:$8 sps:$4 sm:$0xff]   ;;  %v1836_v41 = vld [vmem:[%s3868_s0 + $0x170] ss:$8 sps:$4 sm:$0xff]   ;;  %v1795_v42 = vld [vmem:[%s3868_s0 + $0x84] ss:$8 sps:$4 sm:$0xff]  }
   0xf   :  { %547 = vmatprep.subr.bf16.mxu0 %v1866_v0  ;;  %1738 = vmatprep.subr.bf16.mxu1 %v1866_v0  ;;  %v1840_v43 = vld [vmem:[%s3868_s0 + $0x184] ss:$8 sps:$4 sm:$0xff]   ;;  %v1797_v44 = vld [vmem:[%s3868_s0 + $0x80] ss:$8 sps:$4 sm:$0xff]   ;;  %v1801_v46 = vld [vmem:[%s3868_s0 + $0x94] ss:$8 sps:$4 sm:$0xff]  }
  0x10   :  { %v1842_v45 = vld [vmem:[%s3868_s0 + $0x180] ss:$8 sps:$4 sm:$0xff]   ;;  %v1843_v47 = vld [vmem:[%s3868_s0 + $0x194] ss:$8 sps:$4 sm:$0xff]   ;;  %v1803_v48 = vld [vmem:[%s3868_s0 + $0x90] ss:$8 sps:$4 sm:$0xff]  }
  0x11   :  { %v1845_v49 = vld [vmem:[%s3868_s0 + $0x190] ss:$8 sps:$4 sm:$0xff]   ;;  %v1807_v50 = vld [vmem:[%s3868_s0 + $0xa4] ss:$8 sps:$4 sm:$0xff]   ;;  %v1809_v52 = vld [vmem:[%s3868_s0 + $0xa0] ss:$8 sps:$4 sm:$0xff]  }
  0x12   :  { %548 = vmatpush1.bf16.msra.mxu0 %v1763_v6  ;;  %1747 = vmatpush1.bf16.msra.mxu1 %v1763_v6  ;;  %v1846_v51 = vld [vmem:[%s3868_s0 + $0x1a4] ss:$8 sps:$4 sm:$0xff]   ;;  %v1848_v53 = vld [vmem:[%s3868_s0 + $0x1a0] ss:$8 sps:$4 sm:$0xff]   ;;  %v1813_v54 = vld [vmem:[%s3868_s0 + $0xb4] ss:$8 sps:$4 sm:$0xff]  }
  0x13   :  { %549 = vmatprep.subr.bf16.mxu0 %v1866_v0  ;;  %1739 = vmatprep.subr.bf16.mxu1 %v1866_v0  ;;  %v1849_v55 = vld [vmem:[%s3868_s0 + $0x1b4] ss:$8 sps:$4 sm:$0xff]   ;;  %v1815_v56 = vld [vmem:[%s3868_s0 + $0xb0] ss:$8 sps:$4 sm:$0xff]   ;;  %v1819_v58 = vld [vmem:[%s3868_s0 + $0xc4] ss:$8 sps:$4 sm:$0xff]  }
  0x14   :  { %v1851_v57 = vld [vmem:[%s3868_s0 + $0x1b0] ss:$8 sps:$4 sm:$0xff]   ;;  %v1852_v59 = vld [vmem:[%s3868_s0 + $0x1c4] ss:$8 sps:$4 sm:$0xff]   ;;  %v1821_v60 = vld [vmem:[%s3868_s0 + $0xc0] ss:$8 sps:$4 sm:$0xff]  }
  0x15   :  { %v1854_v61 = vld [vmem:[%s3868_s0 + $0x1c0] ss:$8 sps:$4 sm:$0xff]   ;;  %v1825_v62 = vld [vmem:[%s3868_s0 + $0xd4] ss:$8 sps:$4 sm:$0xff]   ;;  %v1857_v1 = vld [vmem:[%s3868_s0 + $0x1d0] ss:$8 sps:$4 sm:$0xff]  }
  0x16   :  { %550 = vmatpush1.bf16.msra.mxu0 %v1764_v7  ;;  %1748 = vmatpush1.bf16.msra.mxu1 %v1764_v7  ;;  %v1855_v63 = vld [vmem:[%s3868_s0 + $0x1d4] ss:$8 sps:$4 sm:$0xff]   ;;  %v1831_v2 = vld [vmem:[%s3868_s0 + $0xe4] ss:$8 sps:$4 sm:$0xff]   ;;  %v1833_v4 = vld [vmem:[%s3868_s0 + $0xe0] ss:$8 sps:$4 sm:$0xff]  }
  0x17   :  { %551 = vmatprep.subr.bf16.mxu0 %v1866_v0  ;;  %1740 = vmatprep.subr.bf16.mxu1 %v1866_v0  ;;  %v1858_v3 = vld [vmem:[%s3868_s0 + $0x1e4] ss:$8 sps:$4 sm:$0xff]   ;;  %v1860_v5 = vld [vmem:[%s3868_s0 + $0x1e0] ss:$8 sps:$4 sm:$0xff]   ;;  %v1837_v6 = vld [vmem:[%s3868_s0 + $0xf4] ss:$8 sps:$4 sm:$0xff]  }
  0x18   :  { %v1861_v7 = vld [vmem:[%s3868_s0 + $0x1f4] ss:$8 sps:$4 sm:$0xff]   ;;  %v1839_v8 = vld [vmem:[%s3868_s0 + $0xf0] ss:$8 sps:$4 sm:$0xff]  }
  0x1a   :  { %552 = vmatpush1.bf16.msra.mxu0 %v1765_v9  ;;  %1749 = vmatpush1.bf16.msra.mxu1 %v1765_v9  ;;  %v1863_v9 = vld [vmem:[%s3868_s0 + $0x1f0] ss:$8 sps:$4 sm:$0xff]  }
  0x1b   :  { %553 = vmatprep.subr.bf16.mxu0 %v1866_v0  ;;  %1741 = vmatprep.subr.bf16.mxu1 %v1866_v0 }
  0x1e   :  { %554 = vmatpush1.bf16.msra.mxu0 %v1766_v10  ;;  %1750 = vmatpush1.bf16.msra.mxu1 %v1766_v10 }
  0x1f   :  { %555 = vmatprep.subr.bf16.mxu0 %v1866_v0  ;;  %1742 = vmatprep.subr.bf16.mxu1 %v1866_v0  ;;  %v1827_v0 = vld [vmem:[%s3868_s0 + $0xd0] ss:$8 sps:$4 sm:$0xff]   ;;  %s1867_s0 = smov 112  }
  0x22   :  { %556 = vmatpush1.bf16.msra.mxu0 %v1767_v11  ;;  %1751 = vmatpush1.bf16.msra.mxu1 %v1767_v11 }
  0x25   :  { %572 = vmatmul.mubr.bf16.vlgmr.msra.gmra.mrb[0].mxu0 %v1768_v12  ;;  %700 = vmatmul.mubr.bf16.vlgmr.msra.gmra.mrb[0].mxu1 %v1792_v14 }
  0x26   :  { %1703 = vmatprep.mubr.msk.bf16.mxu0 %vm442_vm0, %v1771_v13  ;;  %1719 = vmatprep.mubr.msk.bf16.mxu1 %vm442_vm0, %v1798_v15 }
  0x2d   :  { %580 = vmatmul.mubr.bf16.gmra.mrb[4].mxu0 %v1773_v16  ;;  %708 = vmatmul.mubr.bf16.gmra.mrb[4].mxu1 %v1800_v18 }
  0x2e   :  { %1704 = vmatprep.mubr.msk.bf16.mxu0 %vm442_vm0, %v1774_v17  ;;  %1720 = vmatprep.mubr.msk.bf16.mxu1 %vm442_vm0, %v1804_v19 }
  0x35   :  { %588 = vmatmul.mubr.bf16.gmra.mrb[8].mxu0 %v1776_v20  ;;  %716 = vmatmul.mubr.bf16.gmra.mrb[8].mxu1 %v1806_v22 }
  0x36   :  { %1705 = vmatprep.mubr.msk.bf16.mxu0 %vm442_vm0, %v1777_v21  ;;  %1721 = vmatprep.mubr.msk.bf16.mxu1 %vm442_vm0, %v1810_v23 }
  0x3d   :  { %596 = vmatmul.mubr.bf16.gmra.mrb[12].mxu0 %v1779_v24  ;;  %724 = vmatmul.mubr.bf16.gmra.mrb[12].mxu1 %v1812_v25 }
  0x3e   :  { %1706 = vmatprep.mubr.msk.bf16.mxu0 %vm442_vm0, %v1780_v26  ;;  %1722 = vmatprep.mubr.msk.bf16.mxu1 %vm442_vm0, %v1816_v27 }
  0x45   :  { %604 = vmatmul.mubr.bf16.gmra.mrb[16].mxu0 %v1782_v28  ;;  %732 = vmatmul.mubr.bf16.gmra.mrb[16].mxu1 %v1818_v29 }
  0x46   :  { %1707 = vmatprep.mubr.msk.bf16.mxu0 %vm442_vm0, %v1783_v30  ;;  %1723 = vmatprep.mubr.msk.bf16.mxu1 %vm442_vm0, %v1822_v31 }
  0x4d   :  { %612 = vmatmul.mubr.bf16.gmra.mrb[20].mxu0 %v1785_v32  ;;  %740 = vmatmul.mubr.bf16.gmra.mrb[20].mxu1 %v1824_v33 }
  0x4e   :  { %1708 = vmatprep.mubr.msk.bf16.mxu0 %vm442_vm0, %v1786_v34  ;;  %1724 = vmatprep.mubr.msk.bf16.mxu1 %vm442_vm0, %v1828_v35 }
  0x55   :  { %620 = vmatmul.mubr.bf16.gmra.mrb[24].mxu0 %v1788_v36  ;;  %748 = vmatmul.mubr.bf16.gmra.mrb[24].mxu1 %v1830_v37 }
  0x56   :  { %1709 = vmatprep.mubr.msk.bf16.mxu0 %vm442_vm0, %v1789_v38  ;;  %1725 = vmatprep.mubr.msk.bf16.mxu1 %vm442_vm0, %v1834_v39 }
  0x5d   :  { %628 = vmatmul.mubr.bf16.gmra.mrb[28].mxu0 %v1791_v40  ;;  %756 = vmatmul.mubr.bf16.gmra.mrb[28].mxu1 %v1836_v41 }
  0x5e   :  { %1710 = vmatprep.mubr.msk.bf16.mxu0 %vm442_vm0, %v1795_v42  ;;  %1726 = vmatprep.mubr.msk.bf16.mxu1 %vm442_vm0, %v1840_v43 }
  0x65   :  { %636 = vmatmul.mubr.bf16.gmra.mrb[32].mxu0 %v1797_v44  ;;  %764 = vmatmul.mubr.bf16.gmra.mrb[32].mxu1 %v1842_v45 }
  0x66   :  { %1711 = vmatprep.mubr.msk.bf16.mxu0 %vm442_vm0, %v1801_v46  ;;  %1727 = vmatprep.mubr.msk.bf16.mxu1 %vm442_vm0, %v1843_v47 }
  0x6d   :  { %644 = vmatmul.mubr.bf16.gmra.mrb[36].mxu0 %v1803_v48  ;;  %772 = vmatmul.mubr.bf16.gmra.mrb[36].mxu1 %v1845_v49 }
  0x6e   :  { %1712 = vmatprep.mubr.msk.bf16.mxu0 %vm442_vm0, %v1807_v50  ;;  %1728 = vmatprep.mubr.msk.bf16.mxu1 %vm442_vm0, %v1846_v51 }
  0x75   :  { %652 = vmatmul.mubr.bf16.gmra.mrb[40].mxu0 %v1809_v52  ;;  %780 = vmatmul.mubr.bf16.gmra.mrb[40].mxu1 %v1848_v53 }
  0x76   :  { %1713 = vmatprep.mubr.msk.bf16.mxu0 %vm442_vm0, %v1813_v54  ;;  %1729 = vmatprep.mubr.msk.bf16.mxu1 %vm442_vm0, %v1849_v55 }
  0x7d   :  { %660 = vmatmul.mubr.bf16.gmra.mrb[44].mxu0 %v1815_v56  ;;  %788 = vmatmul.mubr.bf16.gmra.mrb[44].mxu1 %v1851_v57 }
  0x7e   :  { %1714 = vmatprep.mubr.msk.bf16.mxu0 %vm442_vm0, %v1819_v58  ;;  %1730 = vmatprep.mubr.msk.bf16.mxu1 %vm442_vm0, %v1852_v59 }
  0x85   :  { %668 = vmatmul.mubr.bf16.gmra.mrb[48].mxu0 %v1821_v60  ;;  %796 = vmatmul.mubr.bf16.gmra.mrb[48].mxu1 %v1854_v61 }
  0x86   :  { %1715 = vmatprep.mubr.msk.bf16.mxu0 %vm442_vm0, %v1825_v62  ;;  %1731 = vmatprep.mubr.msk.bf16.mxu1 %vm442_vm0, %v1855_v63 }
  0x8d   :  { %676 = vmatmul.mubr.bf16.gmra.mrb[52].mxu0 %v1827_v0  ;;  %804 = vmatmul.mubr.bf16.gmra.mrb[52].mxu1 %v1857_v1 }
  0x8e   :  { %1716 = vmatprep.mubr.msk.bf16.mxu0 %vm442_vm0, %v1831_v2  ;;  %1732 = vmatprep.mubr.msk.bf16.mxu1 %vm442_vm0, %v1858_v3 }
  0x95   :  { %684 = vmatmul.mubr.bf16.gmra.mrb[56].mxu0 %v1833_v4  ;;  %812 = vmatmul.mubr.bf16.gmra.mrb[56].mxu1 %v1860_v5 }
  0x96   :  { %1717 = vmatprep.mubr.msk.bf16.mxu0 %vm442_vm0, %v1837_v6  ;;  %1733 = vmatprep.mubr.msk.bf16.mxu1 %vm442_vm0, %v1861_v7 }
  0x9d   :  { %692 = vmatmul.mubr.bf16.gmra.mrb[60].mxu0 %v1839_v8  ;;  %820 = vmatmul.mubr.bf16.gmra.mrb[60].mxu1 %v1863_v9 }
  0xf8   :  { %v2149_v10 = vpop.f32.mrb[0].mxu0  ;;  %v2151_v11 = vpop.f32.mrb[0].mxu1 }
  0xf9   :  { %v962_v12 = vmul.f32 %v2149_v10, %v2149_v10  ;;  %v575_v13 = vpop.f32.mrb[1].mxu0  ;;  %v703_v14 = vpop.f32.mrb[1].mxu1  ;;  %v829_v17 = vsel %vm828_vm1, %v2149_v10, 0.0 }
  0xfa   :  { %v2155_v15 = vpop.f32.mrb[2].mxu0  ;;  %v2157_v16 = vpop.f32.mrb[2].mxu1 }
  0xfb   :  { %v830_v18 = vsel %vm828_vm1, %v2155_v15, 0.0  ;;  %v963_v19 = vmul.f32 %v2155_v15, %v2155_v15  ;;  %v578_v20 = vpop.f32.mrb[3].mxu0  ;;  %v706_v21 = vpop.f32.mrb[3].mxu1  ;;  %v1026_v23 = vsel %vm828_vm1, %v962_v12, 0.0 }
  0xfc   :  { %v831_v22 = vadd.f32 %v830_v18, %v829_v17 }
  0xfd   :  { %v1027_v24 = vsel %vm828_vm1, %v963_v19, 0.0 }
  0xfe   :  { %v1028_v25 = vadd.f32 %v1027_v24, %v1026_v23 }
 0x100   :  { %v2167_v26 = vpop.f32.mrb[4].mxu0  ;;  %v2169_v27 = vpop.f32.mrb[4].mxu1 }
 0x101   :  { %v832_v28 = vsel %vm828_vm1, %v2167_v26, 0.0  ;;  %v964_v29 = vmul.f32 %v2167_v26, %v2167_v26  ;;  %v583_v30 = vpop.f32.mrb[5].mxu0  ;;  %v711_v31 = vpop.f32.mrb[5].mxu1 }
 0x102   :  { %v833_v32 = vadd.f32 %v832_v28, %v831_v22  ;;  %v2175_v33 = vpop.f32.mrb[6].mxu0  ;;  %v2177_v34 = vpop.f32.mrb[6].mxu1 }
 0x103   :  { %v1029_v35 = vsel %vm828_vm1, %v964_v29, 0.0  ;;  %v834_v36 = vsel %vm828_vm1, %v2175_v33, 0.0  ;;  %v965_v37 = vmul.f32 %v2175_v33, %v2175_v33  ;;  %v586_v38 = vpop.f32.mrb[7].mxu0  ;;  %v714_v39 = vpop.f32.mrb[7].mxu1 }
 0x104   :  { %v1030_v40 = vadd.f32 %v1029_v35, %v1028_v25  ;;  %v835_v41 = vadd.f32 %v834_v36, %v833_v32 }
 0x105   :  { %v1031_v42 = vsel %vm828_vm1, %v965_v37, 0.0 }
 0x106   :  { %v1032_v43 = vadd.f32 %v1031_v42, %v1030_v40 }
 0x108   :  { %v2185_v44 = vpop.f32.mrb[8].mxu0  ;;  %v2187_v45 = vpop.f32.mrb[8].mxu1 }
 0x109   :  { %v836_v46 = vsel %vm828_vm1, %v2185_v44, 0.0  ;;  %v966_v47 = vmul.f32 %v2185_v44, %v2185_v44  ;;  %v591_v48 = vpop.f32.mrb[9].mxu0  ;;  %v719_v49 = vpop.f32.mrb[9].mxu1 }
 0x10a   :  { %v837_v50 = vadd.f32 %v836_v46, %v835_v41  ;;  %v2193_v51 = vpop.f32.mrb[10].mxu0  ;;  %v2195_v52 = vpop.f32.mrb[10].mxu1 }
 0x10b   :  { %v1033_v53 = vsel %vm828_vm1, %v966_v47, 0.0  ;;  %v838_v54 = vsel %vm828_vm1, %v2193_v51, 0.0  ;;  %v967_v55 = vmul.f32 %v2193_v51, %v2193_v51  ;;  %v594_v56 = vpop.f32.mrb[11].mxu0  ;;  %v722_v57 = vpop.f32.mrb[11].mxu1 }
 0x10c   :  { %v1034_v58 = vadd.f32 %v1033_v53, %v1032_v43  ;;  %v839_v59 = vadd.f32 %v838_v54, %v837_v50 }
 0x10d   :  { %v1035_v60 = vsel %vm828_vm1, %v967_v55, 0.0 }
 0x10e   :  { %v1036_v61 = vadd.f32 %v1035_v60, %v1034_v58 }
 0x110   :  { %v2203_v62 = vpop.f32.mrb[12].mxu0  ;;  %v2205_v63 = vpop.f32.mrb[12].mxu1 }
 0x111   :  { %v840_v0 = vsel %vm828_vm1, %v2203_v62, 0.0  ;;  %v968_v1 = vmul.f32 %v2203_v62, %v2203_v62  ;;  %v599_v2 = vpop.f32.mrb[13].mxu0  ;;  %v727_v3 = vpop.f32.mrb[13].mxu1 }
 0x112   :  { %v841_v4 = vadd.f32 %v840_v0, %v839_v59  ;;  %v2211_v5 = vpop.f32.mrb[14].mxu0  ;;  %v2213_v6 = vpop.f32.mrb[14].mxu1 }
 0x113   :  { %v1037_v7 = vsel %vm828_vm1, %v968_v1, 0.0  ;;  %v842_v8 = vsel %vm828_vm1, %v2211_v5, 0.0  ;;  %v969_v9 = vmul.f32 %v2211_v5, %v2211_v5  ;;  %v602_v12 = vpop.f32.mrb[15].mxu0  ;;  %v730_v13 = vpop.f32.mrb[15].mxu1 }
 0x114   :  { %v1038_v14 = vadd.f32 %v1037_v7, %v1036_v61  ;;  %v843_v17 = vadd.f32 %v842_v8, %v841_v4 }
 0x115   :  { %v1039_v18 = vsel %vm828_vm1, %v969_v9, 0.0 }
 0x116   :  { %v1040_v19 = vadd.f32 %v1039_v18, %v1038_v14 }
 0x118   :  { %v2221_v20 = vpop.f32.mrb[16].mxu0  ;;  %v2223_v21 = vpop.f32.mrb[16].mxu1 }
 0x119   :  { %v844_v22 = vsel %vm828_vm1, %v2221_v20, 0.0  ;;  %v970_v23 = vmul.f32 %v2221_v20, %v2221_v20  ;;  %v607_v24 = vpop.f32.mrb[17].mxu0  ;;  %v735_v25 = vpop.f32.mrb[17].mxu1 }
 0x11a   :  { %v845_v28 = vadd.f32 %v844_v22, %v843_v17  ;;  %v2229_v29 = vpop.f32.mrb[18].mxu0  ;;  %v2231_v30 = vpop.f32.mrb[18].mxu1 }
 0x11b   :  { %v1041_v31 = vsel %vm828_vm1, %v970_v23, 0.0  ;;  %v846_v32 = vsel %vm828_vm1, %v2229_v29, 0.0  ;;  %v971_v35 = vmul.f32 %v2229_v29, %v2229_v29  ;;  %v610_v36 = vpop.f32.mrb[19].mxu0  ;;  %v738_v37 = vpop.f32.mrb[19].mxu1 }
 0x11c   :  { %v1042_v38 = vadd.f32 %v1041_v31, %v1040_v19  ;;  %v847_v39 = vadd.f32 %v846_v32, %v845_v28 }
 0x11d   :  { %v1043_v40 = vsel %vm828_vm1, %v971_v35, 0.0 }
 0x11e   :  { %v1044_v41 = vadd.f32 %v1043_v40, %v1042_v38 }
 0x120   :  { %v2239_v42 = vpop.f32.mrb[20].mxu0  ;;  %v2241_v43 = vpop.f32.mrb[20].mxu1 }
 0x121   :  { %v848_v46 = vsel %vm828_vm1, %v2239_v42, 0.0  ;;  %v972_v47 = vmul.f32 %v2239_v42, %v2239_v42  ;;  %v615_v48 = vpop.f32.mrb[21].mxu0  ;;  %v743_v49 = vpop.f32.mrb[21].mxu1 }
 0x122   :  { %v849_v50 = vadd.f32 %v848_v46, %v847_v39  ;;  %v2247_v53 = vpop.f32.mrb[22].mxu0  ;;  %v2249_v54 = vpop.f32.mrb[22].mxu1 }
 0x123   :  { %v1045_v55 = vsel %vm828_vm1, %v972_v47, 0.0  ;;  %v850_v56 = vsel %vm828_vm1, %v2247_v53, 0.0  ;;  %v973_v57 = vmul.f32 %v2247_v53, %v2247_v53  ;;  %v618_v58 = vpop.f32.mrb[23].mxu0  ;;  %v746_v59 = vpop.f32.mrb[23].mxu1 }
 0x124   :  { %v1046_v60 = vadd.f32 %v1045_v55, %v1044_v41  ;;  %v851_v61 = vadd.f32 %v850_v56, %v849_v50 }
 0x125   :  { %v1047_v0 = vsel %vm828_vm1, %v973_v57, 0.0 }
 0x126   :  { %v1048_v1 = vadd.f32 %v1047_v0, %v1046_v60 }
 0x128   :  { %v2257_v2 = vpop.f32.mrb[24].mxu0  ;;  %v2259_v3 = vpop.f32.mrb[24].mxu1 }
 0x129   :  { %v852_v4 = vsel %vm828_vm1, %v2257_v2, 0.0  ;;  %v974_v7 = vmul.f32 %v2257_v2, %v2257_v2  ;;  %v623_v8 = vpop.f32.mrb[25].mxu0  ;;  %v751_v9 = vpop.f32.mrb[25].mxu1 }
 0x12a   :  { %v853_v12 = vadd.f32 %v852_v4, %v851_v61  ;;  %v2265_v13 = vpop.f32.mrb[26].mxu0  ;;  %v2267_v14 = vpop.f32.mrb[26].mxu1 }
 0x12b   :  { %v1049_v17 = vsel %vm828_vm1, %v974_v7, 0.0  ;;  %v854_v18 = vsel %vm828_vm1, %v2265_v13, 0.0  ;;  %v975_v19 = vmul.f32 %v2265_v13, %v2265_v13  ;;  %v626_v22 = vpop.f32.mrb[27].mxu0  ;;  %v754_v23 = vpop.f32.mrb[27].mxu1 }
 0x12c   :  { %v1050_v24 = vadd.f32 %v1049_v17, %v1048_v1  ;;  %v855_v25 = vadd.f32 %v854_v18, %v853_v12 }
 0x12d   :  { %v1051_v28 = vsel %vm828_vm1, %v975_v19, 0.0 }
 0x12e   :  { %v1052_v31 = vadd.f32 %v1051_v28, %v1050_v24 }
 0x130   :  { %v2275_v32 = vpop.f32.mrb[28].mxu0  ;;  %v2277_v35 = vpop.f32.mrb[28].mxu1 }
 0x131   :  { %3923 = vst [vmem:[#allocation2_spill] sm:$0xff] %v2275_v32  ;;  %v856_v36 = vsel %vm828_vm1, %v2275_v32, 0.0  ;;  %v976_v37 = vmul.f32 %v2275_v32, %v2275_v32  ;;  %v631_v38 = vpop.f32.mrb[29].mxu0  ;;  %v759_v39 = vpop.f32.mrb[29].mxu1  ;;  %v894_v32 = vsel %vm828_vm1, %v2157_v16, 0.0 }
 0x132   :  { %v857_v40 = vadd.f32 %v856_v36, %v855_v25  ;;  %v2283_v41 = vpop.f32.mrb[30].mxu0  ;;  %v2285_v46 = vpop.f32.mrb[30].mxu1 }
 0x133   :  { %3924 = vst [vmem:[#allocation3_spill] sm:$0xff] %v2283_v41  ;;  %v1053_v47 = vsel %vm828_vm1, %v976_v37, 0.0  ;;  %v858_v48 = vsel %vm828_vm1, %v2283_v41, 0.0  ;;  %v977_v49 = vmul.f32 %v2283_v41, %v2283_v41  ;;  %v634_v50 = vpop.f32.mrb[31].mxu0  ;;  %v762_v55 = vpop.f32.mrb[31].mxu1 }
 0x134   :  { %v1054_v56 = vadd.f32 %v1053_v47, %v1052_v31  ;;  %v859_v57 = vadd.f32 %v858_v48, %v857_v40 }
 0x135   :  { %v1055_v58 = vsel %vm828_vm1, %v977_v49, 0.0 }
 0x136   :  { %v1056_v59 = vadd.f32 %v1055_v58, %v1054_v56 }
 0x138   :  { %v2293_v60 = vpop.f32.mrb[32].mxu0  ;;  %v2295_v61 = vpop.f32.mrb[32].mxu1 }
 0x139   :  { %3925 = vst [vmem:[#allocation4_spill] sm:$0xff] %v2293_v60  ;;  %v860_v0 = vsel %vm828_vm1, %v2293_v60, 0.0  ;;  %v978_v1 = vmul.f32 %v2293_v60, %v2293_v60  ;;  %v639_v4 = vpop.f32.mrb[33].mxu0  ;;  %v767_v7 = vpop.f32.mrb[33].mxu1 }
 0x13a   :  { %v861_v8 = vadd.f32 %v860_v0, %v859_v57  ;;  %v2301_v9 = vpop.f32.mrb[34].mxu0  ;;  %v2303_v12 = vpop.f32.mrb[34].mxu1 }
 0x13b   :  { %3926 = vst [vmem:[#allocation5_spill] sm:$0xff] %v2301_v9  ;;  %v1057_v17 = vsel %vm828_vm1, %v978_v1, 0.0  ;;  %v862_v18 = vsel %vm828_vm1, %v2301_v9, 0.0  ;;  %v979_v19 = vmul.f32 %v2301_v9, %v2301_v9  ;;  %v642_v22 = vpop.f32.mrb[35].mxu0  ;;  %v770_v23 = vpop.f32.mrb[35].mxu1 }
 0x13c   :  { %v1058_v24 = vadd.f32 %v1057_v17, %v1056_v59  ;;  %v863_v25 = vadd.f32 %v862_v18, %v861_v8 }
 0x13d   :  { %v1059_v28 = vsel %vm828_vm1, %v979_v19, 0.0 }
 0x13e   :  { %v1060_v31 = vadd.f32 %v1059_v28, %v1058_v24 }
 0x140   :  { %v2311_v36 = vpop.f32.mrb[36].mxu0  ;;  %v2313_v37 = vpop.f32.mrb[36].mxu1 }
 0x141   :  { %3927 = vst [vmem:[#allocation6_spill] sm:$0xff] %v2311_v36  ;;  %v864_v38 = vsel %vm828_vm1, %v2311_v36, 0.0  ;;  %v980_v39 = vmul.f32 %v2311_v36, %v2311_v36  ;;  %v647_v40 = vpop.f32.mrb[37].mxu0  ;;  %v775_v47 = vpop.f32.mrb[37].mxu1 }
 0x142   :  { %v865_v48 = vadd.f32 %v864_v38, %v863_v25  ;;  %v2319_v49 = vpop.f32.mrb[38].mxu0  ;;  %v2321_v50 = vpop.f32.mrb[38].mxu1 }
 0x143   :  { %3928 = vst [vmem:[#allocation7_spill] sm:$0xff] %v2319_v49  ;;  %v1061_v55 = vsel %vm828_vm1, %v980_v39, 0.0  ;;  %v866_v56 = vsel %vm828_vm1, %v2319_v49, 0.0  ;;  %v981_v57 = vmul.f32 %v2319_v49, %v2319_v49  ;;  %v650_v58 = vpop.f32.mrb[39].mxu0  ;;  %v778_v59 = vpop.f32.mrb[39].mxu1 }
 0x144   :  { %v1062_v0 = vadd.f32 %v1061_v55, %v1060_v31  ;;  %v867_v1 = vadd.f32 %v866_v56, %v865_v48 }
 0x145   :  { %v1063_v4 = vsel %vm828_vm1, %v981_v57, 0.0 }
 0x146   :  { %v1064_v7 = vadd.f32 %v1063_v4, %v1062_v0 }
 0x148   :  { %v2329_v8 = vpop.f32.mrb[40].mxu0  ;;  %v2331_v17 = vpop.f32.mrb[40].mxu1 }
 0x149   :  { %3929 = vst [vmem:[#allocation8_spill] sm:$0xff] %v2329_v8  ;;  %v868_v18 = vsel %vm828_vm1, %v2329_v8, 0.0  ;;  %v982_v19 = vmul.f32 %v2329_v8, %v2329_v8  ;;  %v655_v22 = vpop.f32.mrb[41].mxu0  ;;  %v783_v23 = vpop.f32.mrb[41].mxu1 }
 0x14a   :  { %v869_v24 = vadd.f32 %v868_v18, %v867_v1  ;;  %v2337_v25 = vpop.f32.mrb[42].mxu0  ;;  %v2339_v28 = vpop.f32.mrb[42].mxu1 }
 0x14b   :  { %3930 = vst [vmem:[#allocation9_spill] sm:$0xff] %v2337_v25  ;;  %v1065_v31 = vsel %vm828_vm1, %v982_v19, 0.0  ;;  %v870_v38 = vsel %vm828_vm1, %v2337_v25, 0.0  ;;  %v983_v39 = vmul.f32 %v2337_v25, %v2337_v25  ;;  %v658_v40 = vpop.f32.mrb[43].mxu0  ;;  %v786_v47 = vpop.f32.mrb[43].mxu1 }
 0x14c   :  { %v1066_v48 = vadd.f32 %v1065_v31, %v1064_v7  ;;  %v871_v55 = vadd.f32 %v870_v38, %v869_v24 }
 0x14d   :  { %v1067_v56 = vsel %vm828_vm1, %v983_v39, 0.0 }
 0x14e   :  { %v1068_v57 = vadd.f32 %v1067_v56, %v1066_v48 }
 0x150   :  { %v2347_v58 = vpop.f32.mrb[44].mxu0  ;;  %v2349_v59 = vpop.f32.mrb[44].mxu1 }
 0x151   :  { %3931 = vst [vmem:[#allocation10_spill] sm:$0xff] %v2347_v58  ;;  %v872_v0 = vsel %vm828_vm1, %v2347_v58, 0.0  ;;  %v984_v1 = vmul.f32 %v2347_v58, %v2347_v58  ;;  %v663_v4 = vpop.f32.mrb[45].mxu0  ;;  %v791_v18 = vpop.f32.mrb[45].mxu1 }
 0x152   :  { %v873_v19 = vadd.f32 %v872_v0, %v871_v55  ;;  %v2355_v22 = vpop.f32.mrb[46].mxu0  ;;  %v2357_v7 = vpop.f32.mrb[46].mxu1 }
 0x153   :  { %3932 = vst [vmem:[#allocation11_spill] sm:$0xff] %v2355_v22  ;;  %v1069_v23 = vsel %vm828_vm1, %v984_v1, 0.0  ;;  %v874_v24 = vsel %vm828_vm1, %v2355_v22, 0.0  ;;  %v985_v31 = vmul.f32 %v2355_v22, %v2355_v22  ;;  %v666_v38 = vpop.f32.mrb[47].mxu0  ;;  %v794_v39 = vpop.f32.mrb[47].mxu1 }
 0x154   :  { %v1070_v40 = vadd.f32 %v1069_v23, %v1068_v57  ;;  %v875_v47 = vadd.f32 %v874_v24, %v873_v19 }
 0x155   :  { %v1071_v48 = vsel %vm828_vm1, %v985_v31, 0.0 }
 0x156   :  { %v1072_v56 = vadd.f32 %v1071_v48, %v1070_v40 }
 0x158   :  { %v2365_v55 = vpop.f32.mrb[48].mxu0  ;;  %v2367_v0 = vpop.f32.mrb[48].mxu1 }
 0x159   :  { %3933 = vst [vmem:[#allocation12_spill] sm:$0xff] %v2365_v55  ;;  %v876_v1 = vsel %vm828_vm1, %v2365_v55, 0.0  ;;  %v986_v4 = vmul.f32 %v2365_v55, %v2365_v55  ;;  %v671_v18 = vpop.f32.mrb[49].mxu0  ;;  %v799_v58 = vpop.f32.mrb[49].mxu1 }
 0x15a   :  { %v877_v22 = vadd.f32 %v876_v1, %v875_v47  ;;  %v2373_v38 = vpop.f32.mrb[50].mxu0  ;;  %v2375_v57 = vpop.f32.mrb[50].mxu1 }
 0x15b   :  { %3934 = vst [vmem:[#allocation13_spill] sm:$0xff] %v2373_v38  ;;  %3935 = vst [vmem:[#allocation14_spill] sm:$0xff] %v2375_v57  ;;  %v1073_v19 = vsel %vm828_vm1, %v986_v4, 0.0  ;;  %v878_v23 = vsel %vm828_vm1, %v2373_v38, 0.0  ;;  %v987_v24 = vmul.f32 %v2373_v38, %v2373_v38  ;;  %v674_v31 = vpop.f32.mrb[51].mxu0  ;;  %v802_v39 = vpop.f32.mrb[51].mxu1 }
 0x15c   :  { %v1074_v40 = vadd.f32 %v1073_v19, %v1072_v56  ;;  %v879_v48 = vadd.f32 %v878_v23, %v877_v22 }
 0x15d   :  { %v1075_v18 = vsel %vm828_vm1, %v987_v24, 0.0 }
 0x15e   :  { %v1076_v58 = vadd.f32 %v1075_v18, %v1074_v40 }
 0x160   :  { %v2383_v47 = vpop.f32.mrb[52].mxu0  ;;  %v2385_v1 = vpop.f32.mrb[52].mxu1 }
 0x161   :  { %3936 = vst [vmem:[#allocation15_spill] sm:$0xff] %v2383_v47  ;;  %3937 = vst [vmem:[#allocation16_spill] sm:$0xff] %v2385_v1  ;;  %v880_v4 = vsel %vm828_vm1, %v2383_v47, 0.0  ;;  %v988_v55 = vmul.f32 %v2383_v47, %v2383_v47  ;;  %v679_v25 = vpop.f32.mrb[53].mxu0  ;;  %v807_v8 = vpop.f32.mrb[53].mxu1 }
 0x162   :  { %v881_v38 = vadd.f32 %v880_v4, %v879_v48  ;;  %v2391_v31 = vpop.f32.mrb[54].mxu0  ;;  %v2393_v56 = vpop.f32.mrb[54].mxu1 }
 0x163   :  { %3938 = vst [vmem:[#allocation17_spill] sm:$0xff] %v2391_v31  ;;  %3939 = vst [vmem:[#allocation18_spill] sm:$0xff] %v2393_v56  ;;  %v1077_v22 = vsel %vm828_vm1, %v988_v55, 0.0  ;;  %v882_v19 = vsel %vm828_vm1, %v2391_v31, 0.0  ;;  %v989_v23 = vmul.f32 %v2391_v31, %v2391_v31  ;;  %v682_v24 = vpop.f32.mrb[55].mxu0  ;;  %v810_v39 = vpop.f32.mrb[55].mxu1 }
 0x164   :  { %v1078_v40 = vadd.f32 %v1077_v22, %v1076_v58  ;;  %v883_v18 = vadd.f32 %v882_v19, %v881_v38 }
 0x165   :  { %v1079_v25 = vsel %vm828_vm1, %v989_v23, 0.0 }
 0x166   :  { %v1080_v8 = vadd.f32 %v1079_v25, %v1078_v40 }
 0x168   :  { %v2401_v48 = vpop.f32.mrb[56].mxu0  ;;  %v2403_v4 = vpop.f32.mrb[56].mxu1 }
 0x169   :  { %3940 = vst [vmem:[#allocation19_spill] sm:$0xff] %v2401_v48  ;;  %3941 = vst [vmem:[#allocation20_spill] sm:$0xff] %v2403_v4  ;;  %v884_v55 = vsel %vm828_vm1, %v2401_v48, 0.0  ;;  %v990_v47 = vmul.f32 %v2401_v48, %v2401_v48  ;;  %v687_v49 = vpop.f32.mrb[57].mxu0  ;;  %v815_v36 = vpop.f32.mrb[57].mxu1 }
 0x16a   :  { %v885_v31 = vadd.f32 %v884_v55, %v883_v18  ;;  %v2409_v24 = vpop.f32.mrb[58].mxu0  ;;  %v2411_v58 = vpop.f32.mrb[58].mxu1 }
 0x16b   :  { %3942 = vst [vmem:[#allocation21_spill] sm:$0xff] %v2409_v24  ;;  %3943 = vst [vmem:[#allocation22_spill] sm:$0xff] %v2411_v58  ;;  %v1081_v38 = vsel %vm828_vm1, %v990_v47, 0.0  ;;  %v886_v22 = vsel %vm828_vm1, %v2409_v24, 0.0  ;;  %v991_v19 = vmul.f32 %v2409_v24, %v2409_v24  ;;  %v690_v23 = vpop.f32.mrb[59].mxu0  ;;  %v818_v39 = vpop.f32.mrb[59].mxu1 }
 0x16c   :  { %v1082_v40 = vadd.f32 %v1081_v38, %v1080_v8  ;;  %v887_v25 = vadd.f32 %v886_v22, %v885_v31  ;;  %v994_v31 = vmul.f32 %v2151_v11, %v2151_v11 }
 0x16d   :  { %v1083_v49 = vsel %vm828_vm1, %v991_v19, 0.0 }
 0x16e   :  { %v1084_v36 = vadd.f32 %v1083_v49, %v1082_v40  ;;  %v995_v49 = vmul.f32 %v2157_v16, %v2157_v16  ;;  %v1089_v41 = vsel %vm828_vm1, %v994_v31, 0.0 }
 0x170   :  { %v2419_v18 = vpop.f32.mrb[60].mxu0  ;;  %v2421_v55 = vpop.f32.mrb[60].mxu1 }
 0x171   :  { %3944 = vst [vmem:[#allocation23_spill] sm:$0xff] %v2419_v18  ;;  %3945 = vst [vmem:[#allocation24_spill] sm:$0xff] %v2421_v55  ;;  %v888_v47 = vsel %vm828_vm1, %v2419_v18, 0.0  ;;  %v992_v48 = vmul.f32 %v2419_v18, %v2419_v18  ;;  %v695_v9 = vpop.f32.mrb[61].mxu0  ;;  %v823_v60 = vpop.f32.mrb[61].mxu1 }
 0x172   :  { %v889_v24 = vadd.f32 %v888_v47, %v887_v25  ;;  %v2427_v23 = vpop.f32.mrb[62].mxu0  ;;  %v2429_v8 = vpop.f32.mrb[62].mxu1  ;;  %v892_v25 = vsel %vm828_vm1, %v2151_v11, 0.0 }
 0x173   :  { %v1085_v38 = vsel %vm828_vm1, %v992_v48, 0.0  ;;  %v890_v22 = vsel %vm828_vm1, %v2427_v23, 0.0  ;;  %v993_v19 = vmul.f32 %v2427_v23, %v2427_v23  ;;  %v698_v39 = vpop.f32.mrb[63].mxu0  ;;  %v826_v40 = vpop.f32.mrb[63].mxu1 }
 0x174   :  { %v1086_v9 = vadd.f32 %v1085_v38, %v1084_v36  ;;  %v891_v60 = vadd.f32 %v890_v22, %v889_v24  ;;  %v996_v39 = vmul.f32 %v2169_v27, %v2169_v27  ;;  %v1091_v38 = vsel %vm828_vm1, %v995_v49, 0.0 }
 0x175   :  { %v1087_v47 = vsel %vm828_vm1, %v993_v19, 0.0  ;;  %v896_v22 = vsel %vm828_vm1, %v2169_v27, 0.0  ;;  %v997_v19 = vmul.f32 %v2177_v34, %v2177_v34  ;;  %v900_v49 = vsel %vm828_vm1, %v2187_v45, 0.0 }
 0x176   :  { %v893_v18 = vadd.f32 %v892_v25, %v891_v60  ;;  %v1088_v48 = vadd.f32 %v1087_v47, %v1086_v9  ;;  %v1093_v31 = vsel %vm828_vm1, %v996_v39, 0.0  ;;  %v898_v60 = vsel %vm828_vm1, %v2177_v34, 0.0 }
 0x177   :  { %v998_v25 = vmul.f32 %v2187_v45, %v2187_v45  ;;  %v999_v47 = vmul.f32 %v2195_v52, %v2195_v52 }
 0x178   :  { %v895_v36 = vadd.f32 %v894_v32, %v893_v18  ;;  %v1090_v24 = vadd.f32 %v1089_v41, %v1088_v48  ;;  %v1095_v18 = vsel %vm828_vm1, %v997_v19, 0.0 }
 0x179   :  { %v1097_v39 = vsel %vm828_vm1, %v998_v25, 0.0  ;;  %v1099_v19 = vsel %vm828_vm1, %v999_v47, 0.0 }
 0x17a   :  { %v897_v40 = vadd.f32 %v896_v22, %v895_v36  ;;  %v1092_v9 = vadd.f32 %v1091_v38, %v1090_v24  ;;  %v902_v24 = vsel %vm828_vm1, %v2195_v52, 0.0  ;;  %v1000_v38 = vmul.f32 %v2205_v63, %v2205_v63 }
 0x17c   :  { %v899_v32 = vadd.f32 %v898_v60, %v897_v40  ;;  %v1094_v41 = vadd.f32 %v1093_v31, %v1092_v9  ;;  %v904_v9 = vsel %vm828_vm1, %v2205_v63, 0.0  ;;  %v1001_v31 = vmul.f32 %v2213_v6, %v2213_v6 }
 0x17d   :  { %v1101_v25 = vsel %vm828_vm1, %v1000_v38, 0.0 }
 0x17e   :  { %v901_v48 = vadd.f32 %v900_v49, %v899_v32  ;;  %v1096_v36 = vadd.f32 %v1095_v18, %v1094_v41  ;;  %v906_v41 = vsel %vm828_vm1, %v2213_v6, 0.0  ;;  %v1002_v18 = vmul.f32 %v2223_v21, %v2223_v21 }
 0x17f   :  { %v1103_v47 = vsel %vm828_vm1, %v1001_v31, 0.0 }
 0x180   :  { %v903_v22 = vadd.f32 %v902_v24, %v901_v48  ;;  %v1098_v40 = vadd.f32 %v1097_v39, %v1096_v36  ;;  %v908_v36 = vsel %vm828_vm1, %v2223_v21, 0.0  ;;  %v1003_v39 = vmul.f32 %v2231_v30, %v2231_v30 }
 0x181   :  { %v1105_v38 = vsel %vm828_vm1, %v1002_v18, 0.0 }
 0x182   :  { %v905_v60 = vadd.f32 %v904_v9, %v903_v22  ;;  %v1100_v32 = vadd.f32 %v1099_v19, %v1098_v40  ;;  %v910_v40 = vsel %vm828_vm1, %v2231_v30, 0.0  ;;  %v1004_v19 = vmul.f32 %v2241_v43, %v2241_v43 }
 0x183   :  { %v1107_v31 = vsel %vm828_vm1, %v1003_v39, 0.0 }
 0x184   :  { %v907_v49 = vadd.f32 %v906_v41, %v905_v60  ;;  %v1102_v48 = vadd.f32 %v1101_v25, %v1100_v32  ;;  %v912_v32 = vsel %vm828_vm1, %v2241_v43, 0.0  ;;  %v1005_v25 = vmul.f32 %v2249_v54, %v2249_v54 }
 0x185   :  { %v1109_v18 = vsel %vm828_vm1, %v1004_v19, 0.0 }
 0x186   :  { %v1104_v24 = vadd.f32 %v1103_v47, %v1102_v48  ;;  %v909_v22 = vadd.f32 %v908_v36, %v907_v49  ;;  %v914_v48 = vsel %vm828_vm1, %v2249_v54, 0.0  ;;  %v1006_v47 = vmul.f32 %v2259_v3, %v2259_v3 }
 0x187   :  { %v1111_v39 = vsel %vm828_vm1, %v1005_v25, 0.0 }
 0x188   :  { %v911_v9 = vadd.f32 %v910_v40, %v909_v22  ;;  %v1106_v60 = vadd.f32 %v1105_v38, %v1104_v24  ;;  %v916_v22 = vsel %vm828_vm1, %v2259_v3, 0.0  ;;  %v1007_v38 = vmul.f32 %v2267_v14, %v2267_v14 }
 0x189   :  { %v1113_v19 = vsel %vm828_vm1, %v1006_v47, 0.0 }
 0x18a   :  { %v913_v41 = vadd.f32 %v912_v32, %v911_v9  ;;  %v1108_v49 = vadd.f32 %v1107_v31, %v1106_v60  ;;  %v918_v60 = vsel %vm828_vm1, %v2267_v14, 0.0  ;;  %v1008_v31 = vmul.f32 %v2277_v35, %v2277_v35 }
 0x18b   :  { %v1115_v25 = vsel %vm828_vm1, %v1007_v38, 0.0 }
 0x18c   :  { %v915_v36 = vadd.f32 %v914_v48, %v913_v41  ;;  %v1110_v24 = vadd.f32 %v1109_v18, %v1108_v49  ;;  %v920_v49 = vsel %vm828_vm1, %v2277_v35, 0.0  ;;  %v1009_v18 = vmul.f32 %v2285_v46, %v2285_v46 }
 0x18d   :  { %v1117_v47 = vsel %vm828_vm1, %v1008_v31, 0.0 }
 0x18e   :  { %v917_v40 = vadd.f32 %v916_v22, %v915_v36  ;;  %v1112_v9 = vadd.f32 %v1111_v39, %v1110_v24  ;;  %v922_v24 = vsel %vm828_vm1, %v2285_v46, 0.0  ;;  %v1010_v39 = vmul.f32 %v2295_v61, %v2295_v61 }
 0x18f   :  { %v1119_v38 = vsel %vm828_vm1, %v1009_v18, 0.0 }
 0x190   :  { %v919_v32 = vadd.f32 %v918_v60, %v917_v40  ;;  %v1114_v41 = vadd.f32 %v1113_v19, %v1112_v9  ;;  %v924_v9 = vsel %vm828_vm1, %v2295_v61, 0.0  ;;  %v1011_v19 = vmul.f32 %v2303_v12, %v2303_v12 }
 0x191   :  { %v1121_v31 = vsel %vm828_vm1, %v1010_v39, 0.0 }
 0x192   :  { %v921_v48 = vadd.f32 %v920_v49, %v919_v32  ;;  %v1116_v36 = vadd.f32 %v1115_v25, %v1114_v41  ;;  %v926_v41 = vsel %vm828_vm1, %v2303_v12, 0.0  ;;  %v1012_v25 = vmul.f32 %v2313_v37, %v2313_v37 }
 0x193   :  { %v1123_v18 = vsel %vm828_vm1, %v1011_v19, 0.0 }
 0x194   :  { %v923_v22 = vadd.f32 %v922_v24, %v921_v48  ;;  %v1118_v40 = vadd.f32 %v1117_v47, %v1116_v36  ;;  %v928_v36 = vsel %vm828_vm1, %v2313_v37, 0.0  ;;  %v1013_v47 = vmul.f32 %v2321_v50, %v2321_v50 }
 0x195   :  { %v1125_v39 = vsel %vm828_vm1, %v1012_v25, 0.0 }
 0x196   :  { %v925_v60 = vadd.f32 %v924_v9, %v923_v22  ;;  %v1120_v32 = vadd.f32 %v1119_v38, %v1118_v40  ;;  %v930_v40 = vsel %vm828_vm1, %v2321_v50, 0.0  ;;  %v1014_v38 = vmul.f32 %v2331_v17, %v2331_v17 }
 0x197   :  { %v1127_v19 = vsel %vm828_vm1, %v1013_v47, 0.0 }
 0x198   :  { %v1122_v49 = vadd.f32 %v1121_v31, %v1120_v32  ;;  %v927_v48 = vadd.f32 %v926_v41, %v925_v60  ;;  %v932_v32 = vsel %vm828_vm1, %v2331_v17, 0.0  ;;  %v1015_v31 = vmul.f32 %v2339_v28, %v2339_v28 }
 0x199   :  { %v1129_v25 = vsel %vm828_vm1, %v1014_v38, 0.0 }
 0x19a   :  { %v1124_v24 = vadd.f32 %v1123_v18, %v1122_v49  ;;  %v929_v22 = vadd.f32 %v928_v36, %v927_v48  ;;  %v934_v48 = vsel %vm828_vm1, %v2339_v28, 0.0  ;;  %v1016_v18 = vmul.f32 %v2349_v59, %v2349_v59 }
 0x19b   :  { %v1131_v47 = vsel %vm828_vm1, %v1015_v31, 0.0 }
 0x19c   :  { %v1126_v9 = vadd.f32 %v1125_v39, %v1124_v24  ;;  %v931_v60 = vadd.f32 %v930_v40, %v929_v22  ;;  %v936_v22 = vsel %vm828_vm1, %v2349_v59, 0.0  ;;  %v1017_v39 = vmul.f32 %v2357_v7, %v2357_v7 }
 0x19d   :  { %v1133_v38 = vsel %vm828_vm1, %v1016_v18, 0.0 }
 0x19e   :  { %v1128_v41 = vadd.f32 %v1127_v19, %v1126_v9  ;;  %v933_v49 = vadd.f32 %v932_v32, %v931_v60  ;;  %v938_v60 = vsel %vm828_vm1, %v2357_v7, 0.0  ;;  %v1018_v19 = vmul.f32 %v2367_v0, %v2367_v0 }
 0x19f   :  { %v1135_v31 = vsel %vm828_vm1, %v1017_v39, 0.0 }
 0x1a0   :  { %v1130_v36 = vadd.f32 %v1129_v25, %v1128_v41  ;;  %v935_v24 = vadd.f32 %v934_v48, %v933_v49  ;;  %v940_v49 = vsel %vm828_vm1, %v2367_v0, 0.0  ;;  %v1019_v25 = vmul.f32 %v2375_v57, %v2375_v57 }
 0x1a1   :  { %v1137_v18 = vsel %vm828_vm1, %v1018_v19, 0.0 }
 0x1a2   :  { %v1132_v40 = vadd.f32 %v1131_v47, %v1130_v36  ;;  %v937_v9 = vadd.f32 %v936_v22, %v935_v24  ;;  %v942_v24 = vsel %vm828_vm1, %v2375_v57, 0.0  ;;  %v1020_v47 = vmul.f32 %v2385_v1, %v2385_v1 }
 0x1a3   :  { %v1139_v39 = vsel %vm828_vm1, %v1019_v25, 0.0 }
 0x1a4   :  { %v1134_v32 = vadd.f32 %v1133_v38, %v1132_v40  ;;  %v939_v41 = vadd.f32 %v938_v60, %v937_v9  ;;  %v944_v9 = vsel %vm828_vm1, %v2385_v1, 0.0  ;;  %v1021_v38 = vmul.f32 %v2393_v56, %v2393_v56 }
 0x1a5   :  { %v1141_v19 = vsel %vm828_vm1, %v1020_v47, 0.0 }
 0x1a6   :  { %v1136_v48 = vadd.f32 %v1135_v31, %v1134_v32  ;;  %v941_v36 = vadd.f32 %v940_v49, %v939_v41  ;;  %v946_v41 = vsel %vm828_vm1, %v2393_v56, 0.0  ;;  %v1022_v31 = vmul.f32 %v2403_v4, %v2403_v4 }
 0x1a7   :  { %v1143_v25 = vsel %vm828_vm1, %v1021_v38, 0.0 }
 0x1a8   :  { %v1138_v22 = vadd.f32 %v1137_v18, %v1136_v48  ;;  %v943_v40 = vadd.f32 %v942_v24, %v941_v36  ;;  %v948_v36 = vsel %vm828_vm1, %v2403_v4, 0.0  ;;  %v1023_v18 = vmul.f32 %v2411_v58, %v2411_v58 }
 0x1a9   :  { %v1024_v24 = vmul.f32 %v2421_v55, %v2421_v55 }
 0x1aa   :  { %v1140_v60 = vadd.f32 %v1139_v39, %v1138_v22  ;;  %v945_v32 = vadd.f32 %v944_v9, %v943_v40  ;;  %v1145_v40 = vsel %vm828_vm1, %v1022_v31, 0.0  ;;  %v950_v39 = vsel %vm828_vm1, %v2411_v58, 0.0 }
 0x1ab   :  { %v952_v9 = vsel %vm828_vm1, %v2421_v55, 0.0  ;;  %v954_v31 = vsel %vm828_vm1, %v2429_v8, 0.0 }
 0x1ac   :  { %v1142_v49 = vadd.f32 %v1141_v19, %v1140_v60  ;;  %v947_v48 = vadd.f32 %v946_v41, %v945_v32  ;;  %v1147_v32 = vsel %vm828_vm1, %v1023_v18, 0.0  ;;  %v1149_v19 = vsel %vm828_vm1, %v1024_v24, 0.0 }
 0x1ad   :  { %v1025_v41 = vmul.f32 %v2429_v8, %v2429_v8 }
 0x1ae   :  { %v1144_v47 = vadd.f32 %v1143_v25, %v1142_v49  ;;  %v949_v22 = vadd.f32 %v948_v36, %v947_v48 }
 0x1af   :  { %v1151_v36 = vsel %vm828_vm1, %v1025_v41, 0.0 }
 0x1b0   :  { %v1146_v38 = vadd.f32 %v1145_v40, %v1144_v47  ;;  %v951_v60 = vadd.f32 %v950_v39, %v949_v22 }
 0x1b2   :  { %v1148_v4 = vadd.f32 %v1147_v32, %v1146_v38  ;;  %v953_v49 = vadd.f32 %v952_v9, %v951_v60 }
 0x1b4   :  { %v1150_v48 = vadd.f32 %v1149_v19, %v1148_v4  ;;  %v955_v25 = vadd.f32 %v954_v31, %v953_v49 }
 0x1b6   :  { %v956_v58 = vrot.slane %v955_v25, 4  ;;  %v1152_v55 = vadd.f32 %v1151_v36, %v1150_v48 }
 0x1b8   :  { %v957_v47 = vadd.f32 %v956_v58, %v955_v25  ;;  %v1153_v22 = vrot.slane %v1152_v55, 4 }
 0x1ba   :  { %v958_v40 = vrot.slane %v957_v47, 2  ;;  %v1154_v18 = vadd.f32 %v1153_v22, %v1152_v55 }
 0x1bc   :  { %v959_v39 = vadd.f32 %v958_v40, %v957_v47  ;;  %v1155_v24 = vrot.slane %v1154_v18, 2 }
 0x1be   :  { %v960_v56 = vrot.slane %v959_v39, 1  ;;  %v1156_v1 = vadd.f32 %v1155_v24, %v1154_v18 }
 0x1c0   :  { %v961_v57 = vadd.f32 %v960_v56, %v959_v39  ;;  %v1157_v38 = vrot.slane %v1156_v1, 1  ;;  %v1198_v39 = vlaneseq }
 0x1c2   :  { %1169 = vrot.lane.b32.xlu1 %v961_v57, %s1867_s0  ;;  %1160 = vrot.lane.b32.xlu0 %v961_v57, %s1868_s26  ;;  %v1158_v4 = vadd.f32 %v1157_v38, %v1156_v1  ;;  %v1199_v24 = vshrl.u32 %v1198_v39, 7 }
 0x1c4   :  { %v2600_v38 = vsub.s32 0, %v1199_v24 }
 0x1c6   :  { %1173 = vrot.lane.b32.xlu1 %v1158_v4, %s1867_s0  ;;  %1165 = vrot.lane.b32.xlu0 %v1158_v4, %s1868_s26 }
 0x1ca   :  { %1181 = vrot.lane.b32.xlu1 %v1158_v4, %s1869_s27  ;;  %1177 = vrot.lane.b32.xlu0 %v961_v57, %s1869_s27 }
 0x234   :  { %v1170_v58 = vpop.permute.xlu1 %1169  ;;  %v1161_v9 = vpop.permute.xlu0 %1160 }
 0x235   :  { %v1163_v60 = vadd.f32 %v1161_v9, %v961_v57  ;;  %v1190_v57 = vld [vmem:[%s3869_s2] sm:$0x1] }
 0x236   :  { %v1194_v9 = vld [vmem:[%s3870_s3] sm:$0x1] }
 0x237   :  { %v1172_v49 = vadd.f32 %v1170_v58, %v1163_v60 }
 0x238   :  { %v1174_v55 = vpop.permute.xlu1 %1173  ;;  %v1166_v32 = vpop.permute.xlu0 %1165 }
 0x239   :  { %v1168_v19 = vadd.f32 %v1166_v32, %v1158_v4 }
 0x23b   :  { %v1176_v41 = vadd.f32 %v1174_v55, %v1168_v19 }
 0x23c   :  { %v1182_v56 = vpop.permute.xlu1 %1181  ;;  %v1178_v31 = vpop.permute.xlu0 %1177 }
 0x23d   :  { %v1184_v48 = vadd.f32 %v1182_v56, %v1176_v41  ;;  %v1180_v25 = vadd.f32 %v1178_v31, %v1172_v49 }
 0x23f   :  { %v1185_v36 = vmul.f32 0.00048828125, %v1180_v25  ;;  %v1186_v47 = vmul.f32 0.00048828125, %v1184_v48 }
 0x241   :  { %v1187_v1 = vmul.f32 %v1185_v36, %v1185_v36 }
 0x243   :  { %v1188_v22 = vsub.f32 %v1186_v47, %v1187_v1 }
 0x245   :  { %v1189_v40 = vmax.f32 %v1188_v22, 0.0 }
 0x247   :  { %v1191_v18 = vadd.f32 1e-05, %v1189_v40 }
 0x249   :  { %1864 = vrsqrt.f32 %v1191_v18 }
 0x253   :  { %v1865_v4 = vpop.eup %1864 }
 0x254   :  { %v1193_v58 = vmul.f32 %v1865_v4, %v1190_v57  ;;  %v3946_v57 = vld [vmem:[#allocation2_spill] sm:$0xff]  ;;  %v3947_v4 = vld [vmem:[#allocation3_spill] sm:$0xff] }
 0x256   :  { %v1195_v60 = vmul.f32 %v1193_v58, %v1185_v36  ;;  %v1201_v55 = vrot.slane %v1193_v58, %v2600_v38 }
 0x258   :  { %v1196_v32 = vsub.f32 %v1194_v9, %v1195_v60  ;;  %1205 = vrot.lane.b32.xlu1 %v1201_v55, %s1870_s6  ;;  %1202 = vrot.lane.b32.xlu0 %v1201_v55, %s1871_s7  ;;  %v3949_v9 = vld [vmem:[#allocation5_spill] sm:$0xff] }
 0x25a   :  { %v1220_v19 = vrot.slane %v1196_v32, %v2600_v38 }
 0x25c   :  { %1208 = vrot.lane.b32.xlu0 %v1201_v55, %s1872_s8  ;;  %1221 = vrot.lane.b32.xlu1 %v1220_v19, %s1871_s7  ;;  %v3950_v55 = vld [vmem:[#allocation6_spill] sm:$0xff] }
 0x260   :  { %1224 = vrot.lane.b32.xlu0 %v1220_v19, %s1870_s6  ;;  %1227 = vrot.lane.b32.xlu1 %v1220_v19, %s1872_s8 }
 0x2ca   :  { %v1203_v41 = vpop.permute.xlu0 %1202  ;;  %v1206_v49 = vpop.permute.xlu1 %1205 }
 0x2cb   :  { %v1212_v56 = vsel %vm1211_vm2, %v1193_v58, %v1203_v41  ;;  %v3948_v58 = vld [vmem:[#allocation4_spill] sm:$0xff] }
 0x2cc   :  { %v1213_v48 = vsel %vm442_vm0, %v1212_v56, %v1206_v49  ;;  %v3952_v41 = vld [vmem:[#allocation8_spill] sm:$0xff]  ;;  %v3953_v56 = vld [vmem:[#allocation9_spill] sm:$0xff] }
 0x2ce   :  { %v1209_v31 = vpop.permute.xlu0 %1208  ;;  %v1222_v47 = vpop.permute.xlu1 %1221 }
 0x2cf   :  { %v1215_v25 = vsel %vm1214_vm3, %v1213_v48, %v1209_v31  ;;  %v1230_v40 = vsel %vm1211_vm2, %v1196_v32, %v1222_v47  ;;  %v3951_v32 = vld [vmem:[#allocation7_spill] sm:$0xff]  ;;  %v3955_v48 = vld [vmem:[#allocation10_spill] sm:$0xff] }
 0x2d0   :  { %v2610_v36 = vrot.slane %v1215_v25, %v2600_v38  ;;  %v3957_v47 = vld [vmem:[#allocation11_spill] sm:$0xff] }
 0x2d2   :  { %v2614_v1 = vmul.f32 %v2610_v36, %v2149_v10  ;;  %v2618_v22 = vmul.f32 %v2610_v36, %v2155_v15  ;;  %v2622_v18 = vmul.f32 %v2610_v36, %v2167_v26  ;;  %v2626_v39 = vmul.f32 %v2610_v36, %v2175_v33  ;;  %v1225_v60 = vpop.permute.xlu0 %1224 }
 0x2d3   :  { %v2630_v24 = vmul.f32 %v2610_v36, %v2185_v44  ;;  %v2634_v10 = vmul.f32 %v2610_v36, %v2193_v51  ;;  %v2638_v15 = vmul.f32 %v2610_v36, %v2203_v62  ;;  %v2642_v26 = vmul.f32 %v2610_v36, %v2211_v5 }
 0x2d4   :  { %v2646_v33 = vmul.f32 %v2610_v36, %v2221_v20  ;;  %v2650_v44 = vmul.f32 %v2610_v36, %v2229_v29  ;;  %v2654_v51 = vmul.f32 %v2610_v36, %v2239_v42  ;;  %v2658_v62 = vmul.f32 %v2610_v36, %v2247_v53 }
 0x2d5   :  { %v2662_v5 = vmul.f32 %v2610_v36, %v2257_v2  ;;  %v2666_v20 = vmul.f32 %v2610_v36, %v2265_v13  ;;  %v2670_v29 = vmul.f32 %v2610_v36, %v3946_v57  ;;  %v2674_v42 = vmul.f32 %v2610_v36, %v3947_v4  ;;  %v3959_v4 = vld [vmem:[#allocation12_spill] sm:$0xff] }
 0x2d6   :  { %v2678_v53 = vmul.f32 %v2610_v36, %v3948_v58  ;;  %v2682_v2 = vmul.f32 %v2610_v36, %v3949_v9  ;;  %v2686_v13 = vmul.f32 %v2610_v36, %v3950_v55  ;;  %v2690_v19 = vmul.f32 %v2610_v36, %v3951_v32  ;;  %v3961_v9 = vld [vmem:[#allocation13_spill] sm:$0xff]  ;;  %v3963_v32 = vld [vmem:[#allocation15_spill] sm:$0xff] }
 0x2d7   :  { %v2694_v49 = vmul.f32 %v2610_v36, %v3952_v41  ;;  %v2698_v31 = vmul.f32 %v2610_v36, %v3953_v56  ;;  %v2702_v25 = vmul.f32 %v2610_v36, %v3955_v48  ;;  %v2706_v57 = vmul.f32 %v2610_v36, %v3957_v47  ;;  %v3964_v56 = vld [vmem:[#allocation17_spill] sm:$0xff] }
 0x2d8   :  { %v2710_v58 = vmul.f32 %v2610_v36, %v3959_v4  ;;  %v2714_v55 = vmul.f32 %v2610_v36, %v3961_v9  ;;  %v2718_v41 = vmul.f32 %v2610_v36, %v3963_v32  ;;  %v2722_v48 = vmul.f32 %v2610_v36, %v3964_v56  ;;  %v1228_v4 = vpop.permute.xlu1 %1227  ;;  %v3967_v9 = vld [vmem:[#allocation23_spill] sm:$0xff] }
 0x2d9   :  { %3954 = vst [vmem:[#allocation2_spill] sm:$0xff] %v2698_v31  ;;  %3956 = vst [vmem:[#allocation3_spill] sm:$0xff] %v2702_v25  ;;  %v3965_v25 = vld [vmem:[#allocation19_spill] sm:$0xff]  ;;  %v2739_v32 = vmul.f32 %v2610_v36, %v2427_v23  ;;  %v2743_v56 = vmul.f32 %v2610_v36, %v2151_v11  ;;  %v2759_v23 = vmul.f32 %v2610_v36, %v2187_v45 }
 0x2da   :  { %3958 = vst [vmem:[#allocation4_spill] sm:$0xff] %v2706_v57  ;;  %3960 = vst [vmem:[#allocation5_spill] sm:$0xff] %v2710_v58  ;;  %v2726_v47 = vmul.f32 %v2610_v36, %v3965_v25  ;;  %v1231_v57 = vsel %vm442_vm0, %v1230_v40, %v1225_v60  ;;  %v3966_v58 = vld [vmem:[#allocation21_spill] sm:$0xff]  ;;  %v2747_v40 = vmul.f32 %v2610_v36, %v2157_v16 }
 0x2db   :  { %3962 = vst [vmem:[#allocation6_spill] sm:$0xff] %v2714_v55  ;;  %v2731_v31 = vmul.f32 %v2610_v36, %v3966_v58  ;;  %v2735_v55 = vmul.f32 %v2610_v36, %v3967_v9  ;;  %v2751_v60 = vmul.f32 %v2610_v36, %v2169_v27  ;;  %v2755_v25 = vmul.f32 %v2610_v36, %v2177_v34  ;;  %v3972_v9 = vld [vmem:[#allocation18_spill] sm:$0xff] }
 0x2dc   :  { %v2763_v11 = vmul.f32 %v2610_v36, %v2195_v52  ;;  %v2767_v16 = vmul.f32 %v2610_v36, %v2205_v63  ;;  %v2771_v27 = vmul.f32 %v2610_v36, %v2213_v6  ;;  %v1232_v58 = vsel %vm1214_vm3, %v1231_v57, %v1228_v4  ;;  %v3971_v4 = vld [vmem:[#allocation16_spill] sm:$0xff] }
 0x2dd   :  { %v2776_v34 = vmul.f32 %v2610_v36, %v2223_v21  ;;  %v2780_v45 = vmul.f32 %v2610_v36, %v2231_v30  ;;  %v2784_v52 = vmul.f32 %v2610_v36, %v2241_v43  ;;  %v2788_v63 = vmul.f32 %v2610_v36, %v2249_v54 }
 0x2de   :  { %v2792_v6 = vmul.f32 %v2610_v36, %v2259_v3  ;;  %v2796_v21 = vmul.f32 %v2610_v36, %v2267_v14  ;;  %v2800_v30 = vmul.f32 %v2610_v36, %v2277_v35  ;;  %v2804_v43 = vmul.f32 %v2610_v36, %v2285_v46 }
 0x2df   :  { %v2808_v54 = vmul.f32 %v2610_v36, %v2295_v61  ;;  %v2812_v3 = vmul.f32 %v2610_v36, %v2303_v12  ;;  %v2816_v14 = vmul.f32 %v2610_v36, %v2313_v37  ;;  %v2819_v57 = vrot.slane %v1232_v58, %v2600_v38  ;;  %v3970_v38 = vld [vmem:[#allocation14_spill] sm:$0xff]  ;;  %v3973_v58 = vld [vmem:[#allocation20_spill] sm:$0xff] }
 0x2e0   :  { %v2823_v35 = vmul.f32 %v2610_v36, %v2321_v50  ;;  %v2827_v46 = vmul.f32 %v2610_v36, %v2331_v17  ;;  %v2831_v61 = vmul.f32 %v2610_v36, %v2339_v28  ;;  %v2835_v12 = vmul.f32 %v2610_v36, %v2349_v59 }
 0x2e1   :  { %v2839_v37 = vmul.f32 %v2610_v36, %v2357_v7  ;;  %v2843_v50 = vmul.f32 %v2610_v36, %v2367_v0  ;;  %v2847_v17 = vmul.f32 %v2610_v36, %v3970_v38  ;;  %v2851_v28 = vmul.f32 %v2610_v36, %v3971_v4 }
 0x2e2   :  { %v2855_v59 = vmul.f32 %v2610_v36, %v3972_v9  ;;  %v2859_v7 = vmul.f32 %v2610_v36, %v3973_v58  ;;  %v2871_v4 = vmul.f32 %v2610_v36, %v2429_v8  ;;  %v2875_v9 = vadd.f32 %v2819_v57, %v2614_v1 }
 0x2e3   :  { %3968 = vst [vmem:[#allocation7_spill] sm:$0xff] %v2839_v37  ;;  %3969 = vst [vmem:[#allocation8_spill] sm:$0xff] %v2843_v50  ;;  %v3974_v37 = vld [vmem:[#allocation22_spill] sm:$0xff]  ;;  %v3975_v50 = vld [vmem:[#allocation24_spill] sm:$0xff]  ;;  %v2879_v58 = vadd.f32 %v2819_v57, %v2618_v22  ;;  %v2891_v8 = vadd.f32 %v2819_v57, %v2630_v24  ;;  %v2899_v1 = vadd.f32 %v2819_v57, %v2638_v15 }
 0x2e4   :  { %v2863_v0 = vmul.f32 %v2610_v36, %v3974_v37  ;;  %v2867_v38 = vmul.f32 %v2610_v36, %v3975_v50  ;;  %v2883_v37 = vadd.f32 %v2819_v57, %v2622_v18  ;;  %v2887_v50 = vadd.f32 %v2819_v57, %v2626_v39 }
 0x2e5   :  { %v2895_v36 = vadd.f32 %v2819_v57, %v2634_v10  ;;  %v2903_v22 = vadd.f32 %v2819_v57, %v2642_v26  ;;  %v2907_v18 = vadd.f32 %v2819_v57, %v2646_v33  ;;  %v2911_v39 = vadd.f32 %v2819_v57, %v2650_v44 }
 0x2e6   :  { %v2915_v24 = vadd.f32 %v2819_v57, %v2654_v51  ;;  %v2919_v10 = vadd.f32 %v2819_v57, %v2658_v62  ;;  %v2923_v15 = vadd.f32 %v2819_v57, %v2662_v5  ;;  %v2927_v26 = vadd.f32 %v2819_v57, %v2666_v20 }
 0x2e7   :  { %v2931_v33 = vadd.f32 %v2819_v57, %v2670_v29  ;;  %v2935_v44 = vadd.f32 %v2819_v57, %v2674_v42  ;;  %v2939_v51 = vadd.f32 %v2819_v57, %v2678_v53  ;;  %v2943_v62 = vadd.f32 %v2819_v57, %v2682_v2  ;;  %v3980_v42 = vld [vmem:[#allocation2_spill] sm:$0xff] }
 0x2e8   :  { %v2947_v5 = vadd.f32 %v2819_v57, %v2686_v13  ;;  %v2951_v20 = vadd.f32 %v2819_v57, %v2690_v19  ;;  %v2955_v29 = vadd.f32 %v2819_v57, %v2694_v49  ;;  %v2959_v53 = vadd.f32 %v2819_v57, %v3980_v42 }
 0x2e9   :  { %3976 = vst [vmem:[#allocation9_spill] sm:$0xff] %v2939_v51  ;;  %3977 = vst [vmem:[#allocation10_spill] sm:$0xff] %v2943_v62  ;;  %v3981_v51 = vld [vmem:[#allocation3_spill] sm:$0xff]  ;;  %v3982_v62 = vld [vmem:[#allocation4_spill] sm:$0xff]  ;;  %v2979_v42 = vadd.f32 %v2819_v57, %v2718_v41  ;;  %v2999_v41 = vadd.f32 %v2819_v57, %v2739_v32  ;;  %v3019_v32 = vadd.f32 %v2819_v57, %v2759_v23  ;;  %vm1369_vm4 = vcmp.ge.f32.partialorder %v2875_v9, 0.0 }
 0x2ea   :  { %3978 = vst [vmem:[#allocation11_spill] sm:$0xff] %v2947_v5  ;;  %3979 = vst [vmem:[#allocation12_spill] sm:$0xff] %v2951_v20  ;;  %v2963_v2 = vadd.f32 %v2819_v57, %v3981_v51  ;;  %v2967_v13 = vadd.f32 %v2819_v57, %v3982_v62  ;;  %v3983_v5 = vld [vmem:[#allocation5_spill] sm:$0xff]  ;;  %v3984_v20 = vld [vmem:[#allocation6_spill] sm:$0xff]  ;;  %v2983_v51 = vadd.f32 %v2819_v57, %v2722_v48  ;;  %vm1370_vm5 = vcmp.ge.f32.partialorder %v2879_v58, 0.0 }
 0x2eb   :  { %v2971_v19 = vadd.f32 %v2819_v57, %v3983_v5  ;;  %v2975_v49 = vadd.f32 %v2819_v57, %v3984_v20  ;;  %v2987_v62 = vadd.f32 %v2819_v57, %v2726_v47  ;;  %v2991_v5 = vadd.f32 %v2819_v57, %v2731_v31 }
 0x2ec   :  { %v2995_v20 = vadd.f32 %v2819_v57, %v2735_v55  ;;  %v3003_v48 = vadd.f32 %v2819_v57, %v2743_v56  ;;  %v3007_v47 = vadd.f32 %v2819_v57, %v2747_v40  ;;  %v3011_v31 = vadd.f32 %v2819_v57, %v2751_v60 }
 0x2ed   :  { %v3015_v55 = vadd.f32 %v2819_v57, %v2755_v25  ;;  %v3023_v56 = vadd.f32 %v2819_v57, %v2763_v11  ;;  %v3027_v40 = vadd.f32 %v2819_v57, %v2767_v16  ;;  %v3031_v60 = vadd.f32 %v2819_v57, %v2771_v27 }
 0x2ee   :  { %v3035_v25 = vadd.f32 %v2819_v57, %v2776_v34  ;;  %v3039_v23 = vadd.f32 %v2819_v57, %v2780_v45  ;;  %v3043_v11 = vadd.f32 %v2819_v57, %v2784_v52  ;;  %v3047_v16 = vadd.f32 %v2819_v57, %v2788_v63 }
 0x2ef   :  { %v3051_v27 = vadd.f32 %v2819_v57, %v2792_v6  ;;  %v3055_v34 = vadd.f32 %v2819_v57, %v2796_v21  ;;  %v3059_v45 = vadd.f32 %v2819_v57, %v2800_v30  ;;  %v3063_v52 = vadd.f32 %v2819_v57, %v2804_v43 }
 0x2f0   :  { %v3067_v63 = vadd.f32 %v2819_v57, %v2808_v54  ;;  %v3071_v6 = vadd.f32 %v2819_v57, %v2812_v3  ;;  %v3075_v21 = vadd.f32 %v2819_v57, %v2816_v14  ;;  %v3079_v30 = vadd.f32 %v2819_v57, %v2823_v35 }
 0x2f1   :  { %3985 = vst [vmem:[#allocation13_spill] sm:$0xff] %v3055_v34  ;;  %v3083_v43 = vadd.f32 %v2819_v57, %v2827_v46  ;;  %v3087_v54 = vadd.f32 %v2819_v57, %v2831_v61  ;;  %v3091_v3 = vadd.f32 %v2819_v57, %v2835_v12  ;;  %v3103_v46 = vadd.f32 %v2819_v57, %v2847_v17 }
 0x2f2   :  { %3986 = vst [vmem:[#allocation15_spill] sm:$0xff] %v3067_v63  ;;  %3987 = vst [vmem:[#allocation17_spill] sm:$0xff] %v3071_v6  ;;  %v3993_v6 = vld [vmem:[#allocation7_spill] sm:$0xff]  ;;  %v3107_v61 = vadd.f32 %v2819_v57, %v2851_v28  ;;  %v3111_v12 = vadd.f32 %v2819_v57, %v2855_v59  ;;  %vm1371_vm6 = vcmp.ge.f32.partialorder %v2883_v37, 0.0  ;;  %vm1372_vm7 = vcmp.ge.f32.partialorder %v2887_v50, 0.0 }
 0x2f3   :  { %3988 = vst [vmem:[#allocation19_spill] sm:$0xff] %v3075_v21  ;;  %3989 = vst [vmem:[#allocation21_spill] sm:$0xff] %v3079_v30  ;;  %v3095_v14 = vadd.f32 %v2819_v57, %v3993_v6  ;;  %v3995_v21 = vld [vmem:[#allocation8_spill] sm:$0xff]  ;;  %v3115_v6 = vadd.f32 %v2819_v57, %v2859_v7  ;;  %vm1373_vm8 = vcmp.ge.f32.partialorder %v2891_v8, 0.0  ;;  %vm1374_vm9 = vcmp.ge.f32.partialorder %v2895_v36, 0.0 }
 0x2f4   :  { %3990 = vst [vmem:[#allocation23_spill] sm:$0xff] %v3083_v43  ;;  %3991 = vst [vmem:[#allocation14_spill] sm:$0xff] %v3087_v54  ;;  %v3099_v35 = vadd.f32 %v2819_v57, %v3995_v21  ;;  %v3119_v21 = vadd.f32 %v2819_v57, %v2863_v0  ;;  %vm1375_vm10 = vcmp.ge.f32.partialorder %v2899_v1, 0.0  ;;  %vm1376_vm11 = vcmp.ge.f32.partialorder %v2903_v22, 0.0  ;;  %v4007_v54 = vld [vmem:[#allocation10_spill] sm:$0xff] }
 0x2f5   :  { %3992 = vst [vmem:[#allocation16_spill] sm:$0xff] %v3091_v3  ;;  %3994 = vst [vmem:[#allocation18_spill] sm:$0xff] %v3095_v14  ;;  %vm1377_vm12 = vcmp.ge.f32.partialorder %v2907_v18, 0.0  ;;  %v3132_v17 = vadd.f32 %v2819_v57, %v2867_v38  ;;  %vm1378_vm13 = vcmp.ge.f32.partialorder %v2911_v39, 0.0  ;;  %v1433_v28 = vmul.f32 0.2, %v2875_v9 }
 0x2f6   :  { %3996 = vst [vmem:[#allocation20_spill] sm:$0xff] %v3099_v35  ;;  %3997 = vst [vmem:[#allocation22_spill] sm:$0xff] %v3103_v46  ;;  %v1434_v59 = vmul.f32 0.2, %v2879_v58  ;;  %v1435_v7 = vmul.f32 0.2, %v2883_v37  ;;  %v3140_v0 = vadd.f32 %v2819_v57, %v2871_v4 }
 0x2f7   :  { %3998 = vst [vmem:[#allocation24_spill] sm:$0xff] %v3107_v61  ;;  %3999 = vst [vmem:[#allocation2_spill] sm:$0xff] %v3111_v12  ;;  %vm1379_vm14 = vcmp.ge.f32.partialorder %v2915_v24, 0.0  ;;  %v1438_v38 = vmul.f32 0.2, %v2895_v36  ;;  %vm1380_vm15 = vcmp.ge.f32.partialorder %v2919_v10, 0.0  ;;  %v1497_v57 = vsel %vm1369_vm4, %v2875_v9, %v1433_v28 }
 0x2f8   :  { %4000 = vst [vmem:[#allocation3_spill] sm:$0xff] %v3115_v6  ;;  %4001 = vst [vmem:[#allocation4_spill] sm:$0xff] %v3119_v21  ;;  %v1436_v21 = vmul.f32 0.2, %v2887_v50  ;;  %v1437_v6 = vmul.f32 0.2, %v2891_v8  ;;  %v1498_v35 = vsel %vm1370_vm5, %v2879_v58, %v1434_v59  ;;  %v1499_v58 = vsel %vm1371_vm6, %v2883_v37, %v1435_v7 }
 0x2f9   :  { %4002 = vst [vmem:[#allocation5_spill] sm:$0xff] %v3132_v17  ;;  %4003 = vst [vmem:[#allocation6_spill] sm:$0xff] %v3140_v0  ;;  %v1439_v17 = vmul.f32 0.2, %v2899_v1  ;;  %v1440_v12 = vmul.f32 0.2, %v2903_v22 }
 0x2fa   :  { %v1441_v61 = vmul.f32 0.2, %v2907_v18  ;;  %vm1381_vm0 = vcmp.ge.f32.partialorder %v2923_v15, 0.0  ;;  %v1442_v4 = vmul.f32 0.2, %v2911_v39  ;;  %1561 = vst.msk [vmem:[%s3871_s4] sm:$0xff] %vm828_vm1, %v1497_v57  ;;  %v1500_v37 = vsel %vm1372_vm7, %v2887_v50, %v1436_v21 }
 0x2fb   :  { %v3156_v0 = vmul.f32 0.2, %v2915_v24  ;;  %v3159_v46 = vmul.f32 0.2, %v2919_v10  ;;  %vm1382_vm2 = vcmp.ge.f32.partialorder %v2927_v26, 0.0  ;;  %1562 = vst.msk [vmem:[%s3871_s4 + $0x8] sm:$0xff] %vm828_vm1, %v1498_v35  ;;  %v1501_v50 = vsel %vm1373_vm8, %v2891_v8, %v1437_v6 }
 0x2fc   :  { %v3170_v9 = vmul.f32 0.2, %v2923_v15  ;;  %v3173_v28 = vmul.f32 0.2, %v2927_v26  ;;  %v3176_v14 = vmul.f32 0.2, %v2931_v33  ;;  %v1502_v8 = vsel %vm1374_vm9, %v2895_v36, %v1438_v38 }
 0x2fd   :  { %vm1383_vm3 = vcmp.ge.f32.partialorder %v2931_v33, 0.0  ;;  %v3187_v59 = vmul.f32 0.2, %v2935_v44  ;;  %v4005_v57 = vld [vmem:[#allocation9_spill] sm:$0xff]  ;;  %v3193_v43 = vmul.f32 0.2, %v4007_v54  ;;  %v1503_v36 = vsel %vm1375_vm10, %v2899_v1, %v1439_v17 }
 0x2fe   :  { %v3190_v3 = vmul.f32 0.2, %v4005_v57  ;;  %1563 = vst.msk [vmem:[%s3871_s4 + $0x10] sm:$0xff] %vm828_vm1, %v1499_v58  ;;  %vm1384_vm4 = vcmp.ge.f32.partialorder %v2935_v44, 0.0  ;;  %v4008_v35 = vld [vmem:[#allocation11_spill] sm:$0xff]  ;;  %1564 = vst.msk [vmem:[%s3871_s4 + $0x18] sm:$0xff] %vm828_vm1, %v1500_v37  ;;  %v1504_v1 = vsel %vm1376_vm11, %v2903_v22, %v1440_v12  ;;  %v1505_v22 = vsel %vm1377_vm12, %v2907_v18, %v1441_v61 }
 0x2ff   :  { %4004 = vst [vmem:[#allocation7_spill] sm:$0xff] %v3187_v59  ;;  %v3204_v7 = vmul.f32 0.2, %v4008_v35  ;;  %v4009_v59 = vld [vmem:[#allocation12_spill] sm:$0xff]  ;;  %vm1385_vm5 = vcmp.ge.f32.partialorder %v4005_v57, 0.0  ;;  %1565 = vst.msk [vmem:[%s3871_s4 + $0x20] sm:$0xff] %vm828_vm1, %v1501_v50  ;;  %v1506_v61 = vsel %vm1378_vm13, %v2911_v39, %v1442_v4  ;;  %v1507_v4 = vsel %vm1379_vm14, %v2915_v24, %v3156_v0 }
 0x300   :  { %4006 = vst [vmem:[#allocation8_spill] sm:$0xff] %v3190_v3  ;;  %v3207_v30 = vmul.f32 0.2, %v4009_v59  ;;  %v3210_v3 = vmul.f32 0.2, %v2955_v29  ;;  %vm1386_vm6 = vcmp.ge.f32.partialorder %v4007_v54, 0.0  ;;  %v1508_v0 = vsel %vm1380_vm15, %v2919_v10, %v3159_v46 }
 0x301   :  { %v3221_v21 = vmul.f32 0.2, %v2959_v53  ;;  %v3224_v58 = vmul.f32 0.2, %v2963_v2  ;;  %v3238_v6 = vmul.f32 0.2, %v2971_v19  ;;  %v1509_v46 = vsel %vm1381_vm0, %v2923_v15, %v3170_v9 }
 0x302   :  { %4010 = vst [vmem:[#allocation9_spill] sm:$0xff] %v3207_v30  ;;  %v3227_v30 = vmul.f32 0.2, %v2967_v13  ;;  %v3241_v37 = vmul.f32 0.2, %v2975_v49  ;;  %1566 = vst.msk [vmem:[%s3871_s4 + $0x28] sm:$0xff] %vm828_vm1, %v1502_v8  ;;  %v1510_v9 = vsel %vm1382_vm2, %v2927_v26, %v3173_v28 }
 0x303   :  { %4011 = vst [vmem:[#allocation10_spill] sm:$0xff] %v3224_v58  ;;  %v3244_v58 = vmul.f32 0.2, %v2979_v42  ;;  %vm1387_vm7 = vcmp.ge.f32.partialorder %v4008_v35, 0.0  ;;  %v3255_v38 = vmul.f32 0.2, %v2983_v51 }
 0x304   :  { %4012 = vst [vmem:[#allocation11_spill] sm:$0xff] %v3241_v37  ;;  %v3258_v50 = vmul.f32 0.2, %v2987_v62  ;;  %v3261_v37 = vmul.f32 0.2, %v2991_v5  ;;  %1567 = vst.msk [vmem:[%s3871_s4 + $0x30] sm:$0xff] %vm828_vm1, %v1503_v36 }
 0x305   :  { %v3274_v17 = vmul.f32 0.2, %v2995_v20  ;;  %v3277_v8 = vmul.f32 0.2, %v2999_v41  ;;  %1568 = vst.msk [vmem:[%s3871_s4 + $0x38] sm:$0xff] %vm828_vm1, %v1504_v1  ;;  %vm1391_vm11 = vcmp.ge.f32.partialorder %v2963_v2, 0.0 }
 0x306   :  { %4013 = vst [vmem:[#allocation12_spill] sm:$0xff] %v3261_v37  ;;  %v3280_v37 = vmul.f32 0.2, %v3003_v48  ;;  %v3294_v12 = vmul.f32 0.2, %v3007_v47  ;;  %1569 = vst.msk [vmem:[%s3871_s4 + $0x40] sm:$0xff] %vm828_vm1, %v1505_v22 }
 0x307   :  { %v3297_v36 = vmul.f32 0.2, %v3011_v31  ;;  %v3300_v18 = vmul.f32 0.2, %v3015_v55  ;;  %vm1395_vm12 = vcmp.ge.f32.partialorder %v2979_v42, 0.0  ;;  %1570 = vst.msk [vmem:[%s3871_s4 + $0x48] sm:$0xff] %vm828_vm1, %v1506_v61 }
 0x308   :  { %v3314_v1 = vmul.f32 0.2, %v3019_v32  ;;  %v3320_v39 = vmul.f32 0.2, %v3027_v40  ;;  %vm1399_vm13 = vcmp.ge.f32.partialorder %v2995_v20, 0.0  ;;  %1571 = vst.msk [vmem:[%s3871_s4 + $0x50] sm:$0xff] %vm828_vm1, %v1507_v4 }
 0x309   :  { %4014 = vst [vmem:[#allocation25_spill] sm:$0xff] %v3300_v18  ;;  %v3317_v18 = vmul.f32 0.2, %v3023_v56  ;;  %v3335_v22 = vmul.f32 0.2, %v3031_v60  ;;  %vm1403_vm14 = vcmp.ge.f32.partialorder %v3011_v31, 0.0 }
 0x30a   :  { %4015 = vst [vmem:[#allocation26_spill] sm:$0xff] %v3320_v39  ;;  %v3338_v39 = vmul.f32 0.2, %v3035_v25  ;;  %v3341_v24 = vmul.f32 0.2, %v3039_v23  ;;  %1572 = vst.msk [vmem:[%s3871_s4 + $0x58] sm:$0xff] %vm828_vm1, %v1508_v0 }
 0x30b   :  { %v3356_v61 = vmul.f32 0.2, %v3043_v11  ;;  %v3362_v10 = vmul.f32 0.2, %v3051_v27  ;;  %vm1407_vm15 = vcmp.ge.f32.partialorder %v3027_v40, 0.0  ;;  %1573 = vst.msk [vmem:[%s3871_s4 + $0x60] sm:$0xff] %vm828_vm1, %v1509_v46  ;;  %v1511_v46 = vsel %vm1383_vm3, %v2931_v33, %v3176_v14 }
 0x30c   :  { %4016 = vst [vmem:[#allocation27_spill] sm:$0xff] %v3341_v24  ;;  %v3359_v24 = vmul.f32 0.2, %v3047_v16  ;;  %v3377_v4 = vmul.f32 0.2, %v3055_v34  ;;  %vm1411_vm0 = vcmp.ge.f32.partialorder %v3043_v11, 0.0 }
 0x30d   :  { %4017 = vst [vmem:[#allocation28_spill] sm:$0xff] %v3362_v10  ;;  %v3380_v10 = vmul.f32 0.2, %v3059_v45  ;;  %v3383_v15 = vmul.f32 0.2, %v3063_v52  ;;  %v4024_v26 = vld [vmem:[#allocation19_spill] sm:$0xff] }
 0x30e   :  { %4018 = vst [vmem:[#allocation29_spill] sm:$0xff] %v3377_v4  ;;  %v3398_v0 = vmul.f32 0.2, %v3067_v63  ;;  %v3404_v28 = vmul.f32 0.2, %v4024_v26  ;;  %1574 = vst.msk [vmem:[%s3871_s4 + $0x68] sm:$0xff] %vm828_vm1, %v1510_v9 }
 0x30f   :  { %4019 = vst [vmem:[#allocation30_spill] sm:$0xff] %v3380_v10  ;;  %4020 = vst [vmem:[#allocation31_spill] sm:$0xff] %v3383_v15  ;;  %v4022_v15 = vld [vmem:[#allocation17_spill] sm:$0xff]  ;;  %vm1415_vm2 = vcmp.ge.f32.partialorder %v3059_v45, 0.0  ;;  %v4030_v33 = vld [vmem:[#allocation14_spill] sm:$0xff]  ;;  %vm1419_vm3 = vcmp.ge.f32.partialorder %v4024_v26, 0.0 }
 0x310   :  { %4021 = vst [vmem:[#allocation32_spill] sm:$0xff] %v3398_v0  ;;  %v3401_v10 = vmul.f32 0.2, %v4022_v15  ;;  %4025 = vst [vmem:[#allocation19_spill] sm:$0xff] %v3404_v28  ;;  %v4028_v0 = vld [vmem:[#allocation23_spill] sm:$0xff]  ;;  %v4039_v63 = vld [vmem:[#allocation8_spill] sm:$0xff] }
 0x311   :  { %v3422_v34 = vmul.f32 0.2, %v4028_v0  ;;  %v3425_v14 = vmul.f32 0.2, %v4030_v33  ;;  %v4032_v4 = vld [vmem:[#allocation7_spill] sm:$0xff]  ;;  %1575 = vst.msk [vmem:[%s3871_s4 + $0x70] sm:$0xff] %vm828_vm1, %v1511_v46  ;;  %v1513_v46 = vsel %vm1385_vm5, %v4005_v57, %v4039_v63 }
 0x312   :  { %4023 = vst [vmem:[#allocation33_spill] sm:$0xff] %v3401_v10  ;;  %v4026_v10 = vld [vmem:[#allocation21_spill] sm:$0xff]  ;;  %v1512_v9 = vsel %vm1384_vm4, %v2935_v44, %v4032_v4  ;;  %v4037_v44 = vld [vmem:[#allocation20_spill] sm:$0xff]  ;;  %v4044_v63 = vld [vmem:[#allocation2_spill] sm:$0xff]  ;;  %vm4053_vm9 = vcmp.ge.f32.partialorder %v4009_v59, 0.0  ;;  %vm4055_vm8 = vcmp.ge.f32.partialorder %v2959_v53, 0.0 }
 0x313   :  { %v3419_v28 = vmul.f32 0.2, %v4026_v10  ;;  %4029 = vst [vmem:[#allocation23_spill] sm:$0xff] %v3422_v34  ;;  %4031 = vst [vmem:[#allocation34_spill] sm:$0xff] %v3425_v14  ;;  %v4033_v34 = vld [vmem:[#allocation16_spill] sm:$0xff] }
 0x314   :  { %v3440_v14 = vmul.f32 0.2, %v4033_v34  ;;  %v3446_v4 = vmul.f32 0.2, %v4037_v44  ;;  %1576 = vst.msk [vmem:[%s3871_s4 + $0x78] sm:$0xff] %vm828_vm1, %v1512_v9  ;;  %vm1423_vm4 = vcmp.ge.f32.partialorder %v4033_v34, 0.0  ;;  %v1514_v9 = vsel %vm1386_vm6, %v4007_v54, %v3193_v43 }
 0x315   :  { %4027 = vst [vmem:[#allocation21_spill] sm:$0xff] %v3419_v28  ;;  %v4035_v28 = vld [vmem:[#allocation18_spill] sm:$0xff]  ;;  %v3467_v57 = vmul.f32 0.2, %v4044_v63  ;;  %1577 = vst.msk [vmem:[%s3871_s4 + $0x80] sm:$0xff] %vm828_vm1, %v1513_v46  ;;  %v4049_v43 = vld [vmem:[#allocation5_spill] sm:$0xff]  ;;  %v1515_v46 = vsel %vm1387_vm7, %v4008_v35, %v3204_v7  ;;  %v1518_v7 = vsel %vm4055_vm8, %v2959_v53, %v3221_v21 }
 0x316   :  { %4034 = vst [vmem:[#allocation7_spill] sm:$0xff] %v3440_v14  ;;  %v3443_v15 = vmul.f32 0.2, %v4035_v28  ;;  %4038 = vst [vmem:[#allocation18_spill] sm:$0xff] %v3446_v4  ;;  %v4042_v14 = vld [vmem:[#allocation24_spill] sm:$0xff]  ;;  %vm1431_vm6 = vcmp.ge.f32.partialorder %v4049_v43, 0.0 }
 0x317   :  { %v3464_v33 = vmul.f32 0.2, %v4042_v14  ;;  %4045 = vst [vmem:[#allocation24_spill] sm:$0xff] %v3467_v57  ;;  %vm1427_vm5 = vcmp.ge.f32.partialorder %v4042_v14, 0.0  ;;  %v3488_v54 = vmul.f32 0.2, %v4049_v43 }
 0x318   :  { %4036 = vst [vmem:[#allocation16_spill] sm:$0xff] %v3443_v15  ;;  %v4040_v15 = vld [vmem:[#allocation22_spill] sm:$0xff]  ;;  %1578 = vst.msk [vmem:[%s3871_s4 + $0x88] sm:$0xff] %vm828_vm1, %v1514_v9  ;;  %vm4054_vm7 = vcmp.ge.f32.partialorder %v2955_v29, 0.0  ;;  %vm4060_vm8 = vcmp.ge.f32.partialorder %v2975_v49, 0.0 }
 0x319   :  { %v3461_v4 = vmul.f32 0.2, %v4040_v15  ;;  %4043 = vst [vmem:[#allocation8_spill] sm:$0xff] %v3464_v33  ;;  %v4046_v15 = vld [vmem:[#allocation3_spill] sm:$0xff]  ;;  %v4047_v33 = vld [vmem:[#allocation4_spill] sm:$0xff]  ;;  %4050 = vst [vmem:[#allocation5_spill] sm:$0xff] %v3488_v54  ;;  %v1517_v35 = vsel %vm4054_vm7, %v2955_v29, %v3210_v3 }
 0x31a   :  { %v3482_v57 = vmul.f32 0.2, %v4046_v15  ;;  %v4051_v15 = vld [vmem:[#allocation6_spill] sm:$0xff]  ;;  %1579 = vst.msk [vmem:[%s3871_s4 + $0x90] sm:$0xff] %vm828_vm1, %v1515_v46  ;;  %vm4058_vm7 = vcmp.ge.f32.partialorder %v2971_v19, 0.0  ;;  %v4059_v3 = vld [vmem:[#allocation11_spill] sm:$0xff] }
 0x31b   :  { %4041 = vst [vmem:[#allocation20_spill] sm:$0xff] %v3461_v4  ;;  %v3485_v4 = vmul.f32 0.2, %v4047_v33  ;;  %vm1432_vm10 = vcmp.ge.f32.partialorder %v4051_v15, 0.0  ;;  %v3501_v33 = vmul.f32 0.2, %v4051_v15  ;;  %v1521_v53 = vsel %vm4058_vm7, %v2971_v19, %v3238_v6 }
 0x31c   :  { %v4056_v9 = vld [vmem:[#allocation10_spill] sm:$0xff]  ;;  %v1522_v21 = vsel %vm4060_vm8, %v2975_v49, %v4059_v3  ;;  %1581 = vst.msk [vmem:[%s3871_s4 + $0xa0] sm:$0xff] %vm828_vm1, %v1517_v35  ;;  %1582 = vst.msk [vmem:[%s3871_s4 + $0xa8] sm:$0xff] %vm828_vm1, %v1518_v7  ;;  %v4063_v49 = vld [vmem:[#allocation12_spill] sm:$0xff]  ;;  %vm4064_vm7 = vcmp.ge.f32.partialorder %v2991_v5, 0.0  ;;  %vm4066_vm8 = vcmp.ge.f32.partialorder %v3003_v48, 0.0 }
 0x31d   :  { %4048 = vst [vmem:[#allocation2_spill] sm:$0xff] %v3485_v4  ;;  %v4052_v4 = vld [vmem:[#allocation9_spill] sm:$0xff]  ;;  %1585 = vst.msk [vmem:[%s3871_s4 + $0xc0] sm:$0xff] %vm828_vm1, %v1521_v53  ;;  %v4075_v6 = vld [vmem:[#allocation27_spill] sm:$0xff] }
 0x31e   :  { %v1516_v54 = vsel %vm4053_vm9, %v4009_v59, %v4052_v4  ;;  %v1519_v59 = vsel %vm1391_vm11, %v2963_v2, %v4056_v9  ;;  %vm4057_vm9 = vcmp.ge.f32.partialorder %v2967_v13, 0.0  ;;  %v1523_v2 = vsel %vm1395_vm12, %v2979_v42, %v3244_v58  ;;  %1586 = vst.msk [vmem:[%s3871_s4 + $0xc8] sm:$0xff] %vm828_vm1, %v1522_v21  ;;  %v4095_v4 = vld [vmem:[#allocation23_spill] sm:$0xff]  ;;  %v4097_v46 = vld [vmem:[#allocation34_spill] sm:$0xff] }
 0x31f   :  { %v1520_v29 = vsel %vm4057_vm9, %v2967_v13, %v3227_v30  ;;  %1580 = vst.msk [vmem:[%s3871_s4 + $0x98] sm:$0xff] %vm828_vm1, %v1516_v54  ;;  %vm4061_vm11 = vcmp.ge.f32.partialorder %v2983_v51, 0.0  ;;  %vm4062_vm9 = vcmp.ge.f32.partialorder %v2987_v62, 0.0  ;;  %v1526_v30 = vsel %vm4064_vm7, %v2991_v5, %v4063_v49  ;;  %1583 = vst.msk [vmem:[%s3871_s4 + $0xb0] sm:$0xff] %vm828_vm1, %v1519_v59  ;;  %v4098_v35 = vld [vmem:[#allocation14_spill] sm:$0xff] }
 0x320   :  { %v1524_v13 = vsel %vm4061_vm11, %v2983_v51, %v3255_v38  ;;  %v1525_v19 = vsel %vm4062_vm9, %v2987_v62, %v3258_v50  ;;  %1584 = vst.msk [vmem:[%s3871_s4 + $0xb8] sm:$0xff] %vm828_vm1, %v1520_v29  ;;  %v1527_v42 = vsel %vm1399_vm13, %v2995_v20, %v3274_v17  ;;  %vm4065_vm12 = vcmp.ge.f32.partialorder %v2999_v41, 0.0  ;;  %1587 = vst.msk [vmem:[%s3871_s4 + $0xd0] sm:$0xff] %vm828_vm1, %v1523_v2  ;;  %v4080_v38 = vld [vmem:[#allocation29_spill] sm:$0xff]  ;;  %v4103_v59 = vld [vmem:[#allocation18_spill] sm:$0xff] }
 0x321   :  { %v1528_v51 = vsel %vm4065_vm12, %v2999_v41, %v3277_v8  ;;  %v1529_v62 = vsel %vm4066_vm8, %v3003_v48, %v3280_v37  ;;  %vm4067_vm11 = vcmp.ge.f32.partialorder %v3007_v47, 0.0  ;;  %1588 = vst.msk [vmem:[%s3871_s4 + $0xd8] sm:$0xff] %vm828_vm1, %v1524_v13  ;;  %1589 = vst.msk [vmem:[%s3871_s4 + $0xe0] sm:$0xff] %vm828_vm1, %v1525_v19  ;;  %v1531_v20 = vsel %vm1403_vm14, %v3011_v31, %v3297_v36  ;;  %v4068_v41 = vld [vmem:[#allocation25_spill] sm:$0xff]  ;;  %v4072_v31 = vld [vmem:[#allocation26_spill] sm:$0xff] }
 0x322   :  { %v1530_v5 = vsel %vm4067_vm11, %v3007_v47, %v3294_v12  ;;  %1590 = vst.msk [vmem:[%s3871_s4 + $0xe8] sm:$0xff] %vm828_vm1, %v1526_v30  ;;  %vm4069_vm13 = vcmp.ge.f32.partialorder %v3015_v55, 0.0  ;;  %vm4070_vm9 = vcmp.ge.f32.partialorder %v3019_v32, 0.0  ;;  %vm4071_vm7 = vcmp.ge.f32.partialorder %v3023_v56, 0.0  ;;  %1591 = vst.msk [vmem:[%s3871_s4 + $0xf0] sm:$0xff] %vm828_vm1, %v1527_v42  ;;  %v4081_v50 = vld [vmem:[#allocation13_spill] sm:$0xff] }
 0x323   :  { %v1532_v48 = vsel %vm4069_vm13, %v3015_v55, %v4068_v41  ;;  %v1533_v47 = vsel %vm4070_vm9, %v3019_v32, %v3314_v1  ;;  %v1534_v58 = vsel %vm4071_vm7, %v3023_v56, %v3317_v18  ;;  %1592 = vst.msk [vmem:[%s3871_s4 + $0xf8] sm:$0xff] %vm828_vm1, %v1528_v51  ;;  %1593 = vst.msk [vmem:[%s3871_s4 + $0x100] sm:$0xff] %vm828_vm1, %v1529_v62  ;;  %vm4073_vm14 = vcmp.ge.f32.partialorder %v3031_v60, 0.0  ;;  %v4086_v12 = vld [vmem:[#allocation32_spill] sm:$0xff]  ;;  %v4087_v36 = vld [vmem:[#allocation15_spill] sm:$0xff] }
 0x324   :  { %1594 = vst.msk [vmem:[%s3871_s4 + $0x108] sm:$0xff] %vm828_vm1, %v1530_v5  ;;  %v1535_v55 = vsel %vm1407_vm15, %v3027_v40, %v4072_v31  ;;  %v1536_v32 = vsel %vm4073_vm14, %v3031_v60, %v3335_v22  ;;  %vm4074_vm12 = vcmp.ge.f32.partialorder %v3035_v25, 0.0  ;;  %vm4076_vm8 = vcmp.ge.f32.partialorder %v3039_v23, 0.0  ;;  %1595 = vst.msk [vmem:[%s3871_s4 + $0x110] sm:$0xff] %vm828_vm1, %v1531_v20  ;;  %v4089_v1 = vld [vmem:[#allocation33_spill] sm:$0xff]  ;;  %v4105_v53 = vld [vmem:[#allocation20_spill] sm:$0xff] }
 0x325   :  { %v1537_v56 = vsel %vm4074_vm12, %v3035_v25, %v3338_v39  ;;  %v1538_v37 = vsel %vm4076_vm8, %v3039_v23, %v4075_v6  ;;  %1596 = vst.msk [vmem:[%s3871_s4 + $0x118] sm:$0xff] %vm828_vm1, %v1532_v48  ;;  %1597 = vst.msk [vmem:[%s3871_s4 + $0x120] sm:$0xff] %vm828_vm1, %v1533_v47  ;;  %v1539_v40 = vsel %vm1411_vm0, %v3043_v11, %v3356_v61  ;;  %vm4077_vm15 = vcmp.ge.f32.partialorder %v3047_v16, 0.0  ;;  %v4078_v25 = vld [vmem:[#allocation28_spill] sm:$0xff]  ;;  %v4083_v11 = vld [vmem:[#allocation30_spill] sm:$0xff] }
 0x326   :  { %1598 = vst.msk [vmem:[%s3871_s4 + $0x128] sm:$0xff] %vm828_vm1, %v1534_v58  ;;  %v1540_v60 = vsel %vm4077_vm15, %v3047_v16, %v3359_v24  ;;  %vm4079_vm11 = vcmp.ge.f32.partialorder %v3051_v27, 0.0  ;;  %vm4082_vm13 = vcmp.ge.f32.partialorder %v4081_v50, 0.0  ;;  %1599 = vst.msk [vmem:[%s3871_s4 + $0x130] sm:$0xff] %vm828_vm1, %v1535_v55  ;;  %v1543_v16 = vsel %vm1415_vm2, %v3059_v45, %v4083_v11  ;;  %v4090_v39 = vld [vmem:[#allocation17_spill] sm:$0xff]  ;;  %v4092_v45 = vld [vmem:[#allocation19_spill] sm:$0xff] }
 0x327   :  { %v1541_v23 = vsel %vm4079_vm11, %v3051_v27, %v4078_v25  ;;  %v1542_v17 = vsel %vm4082_vm13, %v4081_v50, %v4080_v38  ;;  %1600 = vst.msk [vmem:[%s3871_s4 + $0x138] sm:$0xff] %vm828_vm1, %v1536_v32  ;;  %1601 = vst.msk [vmem:[%s3871_s4 + $0x140] sm:$0xff] %vm828_vm1, %v1537_v56  ;;  %v4084_v27 = vld [vmem:[#allocation31_spill] sm:$0xff]  ;;  %vm4085_vm0 = vcmp.ge.f32.partialorder %v3063_v52, 0.0  ;;  %vm4088_vm9 = vcmp.ge.f32.partialorder %v4087_v36, 0.0  ;;  %v4093_v24 = vld [vmem:[#allocation21_spill] sm:$0xff] }
 0x328   :  { %1602 = vst.msk [vmem:[%s3871_s4 + $0x148] sm:$0xff] %vm828_vm1, %v1538_v37  ;;  %v1544_v8 = vsel %vm4085_vm0, %v3063_v52, %v4084_v27  ;;  %v1545_v18 = vsel %vm4088_vm9, %v4087_v36, %v4086_v12  ;;  %vm4091_vm7 = vcmp.ge.f32.partialorder %v4090_v39, 0.0  ;;  %1603 = vst.msk [vmem:[%s3871_s4 + $0x150] sm:$0xff] %vm828_vm1, %v1539_v40  ;;  %v1547_v52 = vsel %vm1419_vm3, %v4024_v26, %v4092_v45  ;;  %v4101_v26 = vld [vmem:[#allocation16_spill] sm:$0xff]  ;;  %v4106_v3 = vld [vmem:[#allocation22_spill] sm:$0xff] }
 0x329   :  { %v1546_v22 = vsel %vm4091_vm7, %v4090_v39, %v4089_v1  ;;  %1604 = vst.msk [vmem:[%s3871_s4 + $0x158] sm:$0xff] %vm828_vm1, %v1540_v60  ;;  %1605 = vst.msk [vmem:[%s3871_s4 + $0x160] sm:$0xff] %vm828_vm1, %v1541_v23  ;;  %vm4094_vm2 = vcmp.ge.f32.partialorder %v4026_v10, 0.0  ;;  %vm4096_vm14 = vcmp.ge.f32.partialorder %v4028_v0, 0.0  ;;  %vm4099_vm12 = vcmp.ge.f32.partialorder %v4098_v35, 0.0  ;;  %v4111_v13 = vld [vmem:[#allocation3_spill] sm:$0xff] }
 0x32a   :  { %1606 = vst.msk [vmem:[%s3871_s4 + $0x168] sm:$0xff] %vm828_vm1, %v1542_v17  ;;  %v1548_v61 = vsel %vm4094_vm2, %v4026_v10, %v4093_v24  ;;  %v1549_v54 = vsel %vm4096_vm14, %v4028_v0, %v4095_v4  ;;  %v1550_v7 = vsel %vm4099_vm12, %v4098_v35, %v4097_v46  ;;  %1607 = vst.msk [vmem:[%s3871_s4 + $0x170] sm:$0xff] %vm828_vm1, %v1543_v16  ;;  %v4100_v10 = vld [vmem:[#allocation7_spill] sm:$0xff]  ;;  %vm4102_vm3 = vcmp.ge.f32.partialorder %v4035_v28, 0.0  ;;  %v4113_v49 = vld [vmem:[#allocation2_spill] sm:$0xff] }
 0x32b   :  { %1608 = vst.msk [vmem:[%s3871_s4 + $0x178] sm:$0xff] %vm828_vm1, %v1544_v8  ;;  %1609 = vst.msk [vmem:[%s3871_s4 + $0x180] sm:$0xff] %vm828_vm1, %v1545_v18  ;;  %v1551_v0 = vsel %vm1423_vm4, %v4033_v34, %v4100_v10  ;;  %v1552_v9 = vsel %vm4102_vm3, %v4035_v28, %v4101_v26  ;;  %vm4104_vm8 = vcmp.ge.f32.partialorder %v4037_v44, 0.0  ;;  %vm4107_vm15 = vcmp.ge.f32.partialorder %v4106_v3, 0.0  ;;  %v4108_v34 = vld [vmem:[#allocation8_spill] sm:$0xff] }
 0x32c   :  { %1610 = vst.msk [vmem:[%s3871_s4 + $0x188] sm:$0xff] %vm828_vm1, %v1546_v22  ;;  %v1553_v29 = vsel %vm4104_vm8, %v4037_v44, %v4103_v59  ;;  %v1554_v21 = vsel %vm4107_vm15, %v4106_v3, %v4105_v53  ;;  %1611 = vst.msk [vmem:[%s3871_s4 + $0x190] sm:$0xff] %vm828_vm1, %v1547_v52  ;;  %v1555_v28 = vsel %vm1427_vm5, %v4042_v14, %v4108_v34  ;;  %v4109_v44 = vld [vmem:[#allocation24_spill] sm:$0xff]  ;;  %vm4110_vm4 = vcmp.ge.f32.partialorder %v4044_v63, 0.0  ;;  %v4116_v14 = vld [vmem:[#allocation5_spill] sm:$0xff] }
 0x32d   :  { %1612 = vst.msk [vmem:[%s3871_s4 + $0x198] sm:$0xff] %vm828_vm1, %v1548_v61  ;;  %1613 = vst.msk [vmem:[%s3871_s4 + $0x1a0] sm:$0xff] %vm828_vm1, %v1549_v54  ;;  %v1556_v2 = vsel %vm4110_vm4, %v4044_v63, %v4109_v44  ;;  %vm4112_vm11 = vcmp.ge.f32.partialorder %v4111_v13, 0.0  ;;  %v4114_v30 = vld [vmem:[#allocation4_spill] sm:$0xff]  ;;  %v1559_v63 = vsel %vm1431_vm6, %v4049_v43, %v4116_v14 }
 0x32e   :  { %1614 = vst.msk [vmem:[%s3871_s4 + $0x1a8] sm:$0xff] %vm828_vm1, %v1550_v7  ;;  %v1557_v19 = vsel %vm4112_vm11, %v4111_v13, %v3482_v57  ;;  %vm4115_vm13 = vcmp.ge.f32.partialorder %v4114_v30, 0.0  ;;  %1615 = vst.msk [vmem:[%s3871_s4 + $0x1b0] sm:$0xff] %vm828_vm1, %v1551_v0  ;;  %v1560_v57 = vsel %vm1432_vm10, %v4051_v15, %v3501_v33 }
 0x32f   :  { %v1558_v42 = vsel %vm4115_vm13, %v4114_v30, %v4113_v49  ;;  %1616 = vst.msk [vmem:[%s3871_s4 + $0x1b8] sm:$0xff] %vm828_vm1, %v1552_v9  ;;  %1617 = vst.msk [vmem:[%s3871_s4 + $0x1c0] sm:$0xff] %vm828_vm1, %v1553_v29 }
 0x330   :  { %1618 = vst.msk [vmem:[%s3871_s4 + $0x1c8] sm:$0xff] %vm828_vm1, %v1554_v21  ;;  %1619 = vst.msk [vmem:[%s3871_s4 + $0x1d0] sm:$0xff] %vm828_vm1, %v1555_v28 }
 0x331   :  { %1620 = vst.msk [vmem:[%s3871_s4 + $0x1d8] sm:$0xff] %vm828_vm1, %v1556_v2  ;;  %1621 = vst.msk [vmem:[%s3871_s4 + $0x1e0] sm:$0xff] %vm828_vm1, %v1557_v19 }
 0x332   :  { %1622 = vst.msk [vmem:[%s3871_s4 + $0x1e8] sm:$0xff] %vm828_vm1, %v1558_v42  ;;  %1623 = vst.msk [vmem:[%s3871_s4 + $0x1f0] sm:$0xff] %vm828_vm1, %v1559_v63 }
 0x333   :  { %1624 = vst.msk [vmem:[%s3871_s4 + $0x1f8] sm:$0xff] %vm828_vm1, %v1560_v57 }

// kernel: generator_forward.11
= control target key start
LH: loop header
LB: loop body
LE: loop exit
PB: predicated region body
PF: predicated region fallthrough
CT: control target
= control target key end

     0   :  { %s1022_s12 = smov 0   ;;  %s1329_s0 = inlined_call_operand.vmem [shape: bf16[1792,72], index: 0, kind: input, shape index: {}]   ;;  %s1330_s1 = inlined_call_operand.vmem [shape: bf16[72,8], index: 1, kind: input, shape index: {}]   ;;  %s1331_s2 = inlined_call_operand.vmem [shape: f32[1792,8], index: 2, kind: output, shape index: {0}]   ;;  %s1332_s3 = inlined_call_operand.vmem [shape: f32[7,2,8], index: 3, kind: output, shape index: {1}]  }
   0x1 LB: > { %s1028_s13 = sadd.s32 4294967295, %s1000_s12   ;;  %p845_p0 = scmp.ge.s32.totalorder %s1000_s12, 1  ;;  %s1000_s12 = sphi %s1022_s12, %s14_s12  }
   0x2   : > { %p141_p1 = scmp.lt.s32.totalorder %s1000_s12, 8 }
   0x4   : > { %p142_p2 = pnand %p845_p0, %p141_p1 }
   0x5   : > { %v973_v0 = vld [vmem:[%s1330_s1] sm:$0xff] (!%p142_p2)   ;;  %v974_v1 = vld [vmem:[%s1330_s1 + $0x8] sm:$0xff] (!%p142_p2)   ;;  %s846_s18 = sshll.u32 (!%p142_p2), %s1028_s13, 5  ;;  %v975_v2 = vld [vmem:[%s1330_s1 + $0x10] sm:$0xff] (!%p142_p2)   ;;  %vm334_vm0 = vcmask (!%p142_p2), 588800   ;;  %vm383_vm1 = vcmask (!%p142_p2), 1043456  }
   0x6   : > { %145 = sbr.rel (%p142_p2) target bundleno = 319 (0x13f), region = 28  ;;  %911 = vmatprep.subr.bf16.mxu0 (!%p142_p2), %v973_v0  ;;  %p170_p3 = scmp.lt.s32.totalorder (!%p142_p2), %s846_s18, 223  ;;  %953 = vmatprep.subr.bf16.mxu1 (!%p142_p2), %v973_v0  ;;  %v976_v3 = vld [vmem:[%s1330_s1 + $0x18] sm:$0xff] (!%p142_p2)   ;;  %v977_v5 = vld [vmem:[%s1330_s1 + $0x20] ss:$0 sps:$4 sm:$0xff] (!%p142_p2)   ;;  %vm548_vm2 = vcmask (!%p142_p2), 64512  }
   0x7   : > { %912 = vmatpush3.bf16.msra.mxu0 (!%p142_p2), %v973_v0  ;;  %958 = vmatpush3.bf16.msra.mxu1 (!%p142_p2), %v973_v0  ;;  %v385_v6 = vsel (!%p142_p2), %vm383_vm1, %v977_v5, 0  ;;  %p181_p4 = scmp.lt.s32.totalorder (!%p142_p2), %s1028_s13, 6  ;;  %vm650_vm3 = vcmask (!%p142_p2), 57344  }
   0x8   : > { %913 = vmatprep.subr.bf16.mxu0 (!%p142_p2), %v974_v1  ;;  %954 = vmatprep.subr.bf16.mxu1 (!%p142_p2), %v974_v1 }
   0xb   : > { %914 = vmatpush3.bf16.msra.mxu0 (!%p142_p2), %v974_v1  ;;  %959 = vmatpush3.bf16.msra.mxu1 (!%p142_p2), %v974_v1 }
   0xc   : > { %915 = vmatprep.subr.bf16.mxu0 (!%p142_p2), %v975_v2  ;;  %955 = vmatprep.subr.bf16.mxu1 (!%p142_p2), %v975_v2 }
   0xd   : > { %s1334_s18 = smov (!%p170_p3, %s846_s18), 223  ;;  %s1336_s13 = smov (!%p181_p4, %s1028_s13), 6 }
   0xe   : > { %s847_s21 = sshll.u32 %s1334_s18, 2  ;;  %s849_s29 = sshll.u32 %s1334_s18, 3 }
   0xf   : > { %s1051_s26 = scalar_lea.vmem %s1329_s0, %s847_s21  ;;  %916 = vmatpush3.bf16.msra.mxu0 %v975_v2  ;;  %960 = vmatpush3.bf16.msra.mxu1 %v975_v2  ;;  %s1092_s5 = scalar_lea.vmem %s1331_s2, %s849_s29 }
  0x10   : > { %v978_v4 = vld [vmem:[%s1051_s26] sm:$0xff]   ;;  %917 = vmatprep.subr.bf16.mxu0 %v976_v3  ;;  %956 = vmatprep.subr.bf16.mxu1 %v976_v3  ;;  %v979_v7 = vld [vmem:[%s1051_s26 + $0x8] sm:$0xff]   ;;  %v980_v9 = vld [vmem:[%s1051_s26 + $0x10] sm:$0xff]   ;;  %s850_s6 = sshll.u32 %s1336_s13, 1 }
  0x11   : > { %921 = vmatprep.mubr.msk.bf16.mxu0 %vm334_vm0, %v978_v4  ;;  %v986_v8 = vld [vmem:[%s1051_s26 + $0x40] sm:$0xff]   ;;  %v987_v10 = vld [vmem:[%s1051_s26 + $0x48] sm:$0xff]   ;;  %v988_v11 = vld [vmem:[%s1051_s26 + $0x50] sm:$0xff]   ;;  %s184_s9 = scalar_lea.vmem %s1332_s3, %s850_s6 }
  0x12   : > { %937 = vmatprep.mubr.msk.bf16.mxu1 %vm334_vm0, %v986_v8  ;;  %v981_v12 = vld [vmem:[%s1051_s26 + $0x18] sm:$0xff]   ;;  %v982_v14 = vld [vmem:[%s1051_s26 + $0x20] sm:$0xff]   ;;  %v983_v16 = vld [vmem:[%s1051_s26 + $0x28] sm:$0xff]  }
  0x13   : > { %918 = vmatpush3.bf16.msra.mxu0 %v976_v3  ;;  %961 = vmatpush3.bf16.msra.mxu1 %v976_v3  ;;  %v989_v13 = vld [vmem:[%s1051_s26 + $0x58] sm:$0xff]   ;;  %v990_v15 = vld [vmem:[%s1051_s26 + $0x60] sm:$0xff]   ;;  %v991_v17 = vld [vmem:[%s1051_s26 + $0x68] sm:$0xff]  }
  0x14   : > { %963 = vmatprep.subr.msk.bf16.mxu0 %vm383_vm1, %v977_v5  ;;  %964 = vmatprep.subr.msk.bf16.mxu1 %vm383_vm1, %v977_v5  ;;  %v984_v18 = vld [vmem:[%s1051_s26 + $0x30] sm:$0xff]   ;;  %v985_v20 = vld [vmem:[%s1051_s26 + $0x38] sm:$0xff]  }
  0x15   : > { %v992_v19 = vld [vmem:[%s1051_s26 + $0x70] sm:$0xff]   ;;  %v993_v21 = vld [vmem:[%s1051_s26 + $0x78] sm:$0xff]  }
  0x17   : > { %920 = vmatpush3.bf16.msra.mxu0 %v385_v6  ;;  %962 = vmatpush3.bf16.msra.mxu1 %v385_v6 }
  0x1a   : > { %922 = vmatmul.mubr.msk.bf16.vlgmr.msra.gmra.mrb[0].mxu0 %vm334_vm0, %v979_v7  ;;  %938 = vmatmul.mubr.msk.bf16.vlgmr.msra.gmra.mrb[0].mxu1 %vm334_vm0, %v987_v10 }
  0x1b   : > { %925 = vmatprep.mubr.msk.bf16.mxu0 %vm334_vm0, %v980_v9  ;;  %941 = vmatprep.mubr.msk.bf16.mxu1 %vm334_vm0, %v988_v11 }
  0x22   : > { %926 = vmatmul.mubr.msk.bf16.gmra.mrb[4].mxu0 %vm334_vm0, %v981_v12  ;;  %942 = vmatmul.mubr.msk.bf16.gmra.mrb[4].mxu1 %vm334_vm0, %v989_v13 }
  0x23   : > { %929 = vmatprep.mubr.msk.bf16.mxu0 %vm334_vm0, %v982_v14  ;;  %945 = vmatprep.mubr.msk.bf16.mxu1 %vm334_vm0, %v990_v15 }
  0x2a   : > { %930 = vmatmul.mubr.msk.bf16.gmra.mrb[8].mxu0 %vm334_vm0, %v983_v16  ;;  %946 = vmatmul.mubr.msk.bf16.gmra.mrb[8].mxu1 %vm334_vm0, %v991_v17 }
  0x2b   : > { %933 = vmatprep.mubr.msk.bf16.mxu0 %vm334_vm0, %v984_v18  ;;  %949 = vmatprep.mubr.msk.bf16.mxu1 %vm334_vm0, %v992_v19 }
  0x32   : > { %934 = vmatmul.mubr.msk.bf16.gmra.mrb[12].mxu0 %vm334_vm0, %v985_v20  ;;  %950 = vmatmul.mubr.msk.bf16.gmra.mrb[12].mxu1 %vm334_vm0, %v993_v21 }
  0xed   : > { %v923_v22 = vpop.f32.mrb[0].mxu0  ;;  %v1094_v23 = vpop.f32.mrb[0].mxu1 }
  0xee   : > { %551 = vst.msk [vmem:[%s1092_s5 + $0x10] sm:$0xff] %vm548_vm2, %v923_v22  ;;  %v421_v24 = vpop.f32.mrb[1].mxu0  ;;  %567 = vst.msk [vmem:[%s1092_s5 + $0x90] sm:$0xff] %vm548_vm2, %v1094_v23  ;;  %v1101_v25 = vpop.f32.mrb[1].mxu1  ;;  %v654_v31 = vmul.f32 %v923_v22, %v923_v22  ;;  %v584_v36 = vsel %vm548_vm2, %v923_v22, 0.0 }
  0xef   : > { %549 = vst.msk [vmem:[%s1092_s5] sm:$0xff] %vm548_vm2, %v421_v24  ;;  %v652_v26 = vmul.f32 %v421_v24, %v421_v24  ;;  %v924_v27 = vpop.f32.mrb[2].mxu0  ;;  %565 = vst.msk [vmem:[%s1092_s5 + $0x80] sm:$0xff] %vm548_vm2, %v1101_v25  ;;  %v1108_v28 = vpop.f32.mrb[2].mxu1  ;;  %v581_v32 = vsel %vm548_vm2, %v421_v24, 0.0 }
  0xf0   : > { %552 = vst.msk [vmem:[%s1092_s5 + $0x18] sm:$0xff] %vm548_vm2, %v924_v27  ;;  %v424_v29 = vpop.f32.mrb[3].mxu0  ;;  %568 = vst.msk [vmem:[%s1092_s5 + $0x98] sm:$0xff] %vm548_vm2, %v1108_v28  ;;  %v1115_v30 = vpop.f32.mrb[3].mxu1  ;;  %v655_v38 = vmul.f32 %v924_v27, %v924_v27  ;;  %v687_v42 = vsel %vm548_vm2, %v654_v31, 0.0  ;;  %v586_v43 = vsel %vm548_vm2, %v924_v27, 0.0 }
  0xf1   : > { %550 = vst.msk [vmem:[%s1092_s5 + $0x8] sm:$0xff] %vm548_vm2, %v424_v29  ;;  %v582_v33 = vsel %vm548_vm2, %v424_v29, 0.0  ;;  %v653_v34 = vmul.f32 %v424_v29, %v424_v29  ;;  %566 = vst.msk [vmem:[%s1092_s5 + $0x88] sm:$0xff] %vm548_vm2, %v1115_v30  ;;  %v684_v37 = vsel %vm548_vm2, %v652_v26, 0.0 }
  0xf2   : > { %v583_v35 = vadd.f32 %v582_v33, %v581_v32  ;;  %v689_v50 = vsel %vm548_vm2, %v655_v38, 0.0 }
  0xf3   : > { %v685_v39 = vsel %vm548_vm2, %v653_v34, 0.0 }
  0xf4   : > { %v585_v40 = vadd.f32 %v584_v36, %v583_v35  ;;  %v686_v41 = vadd.f32 %v685_v39, %v684_v37 }
  0xf5   : > { %v927_v44 = vpop.f32.mrb[4].mxu0  ;;  %v1129_v45 = vpop.f32.mrb[4].mxu1 }
  0xf6   : > { %v688_v46 = vadd.f32 %v687_v42, %v686_v41  ;;  %555 = vst.msk [vmem:[%s1092_s5 + $0x30] sm:$0xff] %vm548_vm2, %v927_v44  ;;  %v437_v47 = vpop.f32.mrb[5].mxu0  ;;  %v587_v48 = vadd.f32 %v586_v43, %v585_v40  ;;  %571 = vst.msk [vmem:[%s1092_s5 + $0xb0] sm:$0xff] %vm548_vm2, %v1129_v45  ;;  %v1136_v49 = vpop.f32.mrb[5].mxu1  ;;  %v658_v59 = vmul.f32 %v927_v44, %v927_v44  ;;  %v592_v1 = vsel %vm548_vm2, %v927_v44, 0.0 }
  0xf7   : > { %553 = vst.msk [vmem:[%s1092_s5 + $0x20] sm:$0xff] %vm548_vm2, %v437_v47  ;;  %v588_v51 = vsel %vm548_vm2, %v437_v47, 0.0  ;;  %v656_v52 = vmul.f32 %v437_v47, %v437_v47  ;;  %v928_v53 = vpop.f32.mrb[6].mxu0  ;;  %569 = vst.msk [vmem:[%s1092_s5 + $0xa0] sm:$0xff] %vm548_vm2, %v1136_v49  ;;  %v1145_v54 = vpop.f32.mrb[6].mxu1 }
  0xf8   : > { %v589_v55 = vadd.f32 %v588_v51, %v587_v48  ;;  %v690_v56 = vadd.f32 %v689_v50, %v688_v46  ;;  %556 = vst.msk [vmem:[%s1092_s5 + $0x38] sm:$0xff] %vm548_vm2, %v928_v53  ;;  %v440_v57 = vpop.f32.mrb[7].mxu0  ;;  %572 = vst.msk [vmem:[%s1092_s5 + $0xb8] sm:$0xff] %vm548_vm2, %v1145_v54  ;;  %v1152_v58 = vpop.f32.mrb[7].mxu1  ;;  %v659_v2 = vmul.f32 %v928_v53, %v928_v53  ;;  %v695_v6 = vsel %vm548_vm2, %v658_v59, 0.0 }
  0xf9   : > { %v691_v60 = vsel %vm548_vm2, %v656_v52, 0.0  ;;  %554 = vst.msk [vmem:[%s1092_s5 + $0x28] sm:$0xff] %vm548_vm2, %v440_v57  ;;  %v590_v61 = vsel %vm548_vm2, %v440_v57, 0.0  ;;  %v657_v62 = vmul.f32 %v440_v57, %v440_v57  ;;  %570 = vst.msk [vmem:[%s1092_s5 + $0xa8] sm:$0xff] %vm548_vm2, %v1152_v58  ;;  %v594_v7 = vsel %vm548_vm2, %v928_v53, 0.0 }
  0xfa   : > { %v692_v63 = vadd.f32 %v691_v60, %v690_v56  ;;  %v591_v0 = vadd.f32 %v590_v61, %v589_v55  ;;  %v697_v14 = vsel %vm548_vm2, %v659_v2, 0.0 }
  0xfb   : > { %v693_v3 = vsel %vm548_vm2, %v657_v62, 0.0 }
  0xfc   : > { %v593_v4 = vadd.f32 %v592_v1, %v591_v0  ;;  %v694_v5 = vadd.f32 %v693_v3, %v692_v63 }
  0xfd   : > { %v931_v8 = vpop.f32.mrb[8].mxu0  ;;  %v1165_v9 = vpop.f32.mrb[8].mxu1 }
  0xfe   : > { %v696_v10 = vadd.f32 %v695_v6, %v694_v5  ;;  %559 = vst.msk [vmem:[%s1092_s5 + $0x50] sm:$0xff] %vm548_vm2, %v931_v8  ;;  %v453_v11 = vpop.f32.mrb[9].mxu0  ;;  %v595_v12 = vadd.f32 %v594_v7, %v593_v4  ;;  %575 = vst.msk [vmem:[%s1092_s5 + $0xd0] sm:$0xff] %vm548_vm2, %v1165_v9  ;;  %v1172_v13 = vpop.f32.mrb[9].mxu1  ;;  %v662_v24 = vmul.f32 %v931_v8, %v931_v8  ;;  %v600_v33 = vsel %vm548_vm2, %v931_v8, 0.0 }
  0xff   : > { %557 = vst.msk [vmem:[%s1092_s5 + $0x40] sm:$0xff] %vm548_vm2, %v453_v11  ;;  %v596_v15 = vsel %vm548_vm2, %v453_v11, 0.0  ;;  %v660_v16 = vmul.f32 %v453_v11, %v453_v11  ;;  %v932_v17 = vpop.f32.mrb[10].mxu0  ;;  %573 = vst.msk [vmem:[%s1092_s5 + $0xc0] sm:$0xff] %vm548_vm2, %v1172_v13  ;;  %v1181_v18 = vpop.f32.mrb[10].mxu1  ;;  %v668_v4 = vmul.f32 %v1101_v25, %v1101_v25 }
 0x100   : > { %v597_v19 = vadd.f32 %v596_v15, %v595_v12  ;;  %v698_v20 = vadd.f32 %v697_v14, %v696_v10  ;;  %560 = vst.msk [vmem:[%s1092_s5 + $0x58] sm:$0xff] %vm548_vm2, %v932_v17  ;;  %v456_v21 = vpop.f32.mrb[11].mxu0  ;;  %576 = vst.msk [vmem:[%s1092_s5 + $0xd8] sm:$0xff] %vm548_vm2, %v1181_v18  ;;  %v1188_v22 = vpop.f32.mrb[11].mxu1  ;;  %v663_v34 = vmul.f32 %v932_v17, %v932_v17  ;;  %v703_v38 = vsel %vm548_vm2, %v662_v24, 0.0 }
 0x101   : > { %v699_v26 = vsel %vm548_vm2, %v660_v16, 0.0  ;;  %558 = vst.msk [vmem:[%s1092_s5 + $0x48] sm:$0xff] %vm548_vm2, %v456_v21  ;;  %v598_v27 = vsel %vm548_vm2, %v456_v21, 0.0  ;;  %v661_v29 = vmul.f32 %v456_v21, %v456_v21  ;;  %574 = vst.msk [vmem:[%s1092_s5 + $0xc8] sm:$0xff] %vm548_vm2, %v1188_v22  ;;  %v602_v39 = vsel %vm548_vm2, %v932_v17, 0.0 }
 0x102   : > { %v700_v31 = vadd.f32 %v699_v26, %v698_v20  ;;  %v599_v32 = vadd.f32 %v598_v27, %v597_v19  ;;  %v705_v47 = vsel %vm548_vm2, %v663_v34, 0.0  ;;  %v612_v10 = vsel %vm548_vm2, %v1101_v25, 0.0 }
 0x103   : > { %v701_v35 = vsel %vm548_vm2, %v661_v29, 0.0  ;;  %v715_v16 = vsel %vm548_vm2, %v668_v4, 0.0  ;;  %v669_v17 = vmul.f32 %v1115_v30, %v1115_v30  ;;  %v670_v25 = vmul.f32 %v1094_v23, %v1094_v23 }
 0x104   : > { %v601_v36 = vadd.f32 %v600_v33, %v599_v32  ;;  %v702_v37 = vadd.f32 %v701_v35, %v700_v31  ;;  %v614_v24 = vsel %vm548_vm2, %v1115_v30, 0.0  ;;  %v616_v29 = vsel %vm548_vm2, %v1094_v23, 0.0 }
 0x105   : > { %v935_v40 = vpop.f32.mrb[12].mxu0  ;;  %v1201_v41 = vpop.f32.mrb[12].mxu1  ;;  %v671_v31 = vmul.f32 %v1108_v28, %v1108_v28  ;;  %v717_v32 = vsel %vm548_vm2, %v669_v17, 0.0  ;;  %v672_v33 = vmul.f32 %v1136_v49, %v1136_v49  ;;  %v618_v30 = vsel %vm548_vm2, %v1108_v28, 0.0 }
 0x106   : > { %v704_v42 = vadd.f32 %v703_v38, %v702_v37  ;;  %563 = vst.msk [vmem:[%s1092_s5 + $0x70] sm:$0xff] %vm548_vm2, %v935_v40  ;;  %v469_v43 = vpop.f32.mrb[13].mxu0  ;;  %v603_v44 = vadd.f32 %v602_v39, %v601_v36  ;;  %579 = vst.msk [vmem:[%s1092_s5 + $0xf0] sm:$0xff] %vm548_vm2, %v1201_v41  ;;  %v1208_v46 = vpop.f32.mrb[13].mxu1  ;;  %v666_v59 = vmul.f32 %v935_v40, %v935_v40  ;;  %v608_v1 = vsel %vm548_vm2, %v935_v40, 0.0 }
 0x107   : > { %561 = vst.msk [vmem:[%s1092_s5 + $0x60] sm:$0xff] %vm548_vm2, %v469_v43  ;;  %v604_v48 = vsel %vm548_vm2, %v469_v43, 0.0  ;;  %v664_v50 = vmul.f32 %v469_v43, %v469_v43  ;;  %v936_v51 = vpop.f32.mrb[14].mxu0  ;;  %577 = vst.msk [vmem:[%s1092_s5 + $0xe0] sm:$0xff] %vm548_vm2, %v1208_v46  ;;  %v1217_v52 = vpop.f32.mrb[14].mxu1  ;;  %v719_v36 = vsel %vm548_vm2, %v670_v25, 0.0  ;;  %v678_v4 = vmul.f32 %v1165_v9, %v1165_v9 }
 0x108   : > { %v605_v53 = vadd.f32 %v604_v48, %v603_v44  ;;  %v706_v55 = vadd.f32 %v705_v47, %v704_v42  ;;  %564 = vst.msk [vmem:[%s1092_s5 + $0x78] sm:$0xff] %vm548_vm2, %v936_v51  ;;  %v472_v56 = vpop.f32.mrb[15].mxu0  ;;  %580 = vst.msk [vmem:[%s1092_s5 + $0xf8] sm:$0xff] %vm548_vm2, %v1217_v52  ;;  %v1224_v57 = vpop.f32.mrb[15].mxu1  ;;  %v667_v2 = vmul.f32 %v936_v51, %v936_v51  ;;  %v711_v7 = vsel %vm548_vm2, %v666_v59, 0.0 }
 0x109   : > { %v707_v60 = vsel %vm548_vm2, %v664_v50, 0.0  ;;  %562 = vst.msk [vmem:[%s1092_s5 + $0x68] sm:$0xff] %vm548_vm2, %v472_v56  ;;  %v606_v61 = vsel %vm548_vm2, %v472_v56, 0.0  ;;  %v665_v62 = vmul.f32 %v472_v56, %v472_v56  ;;  %578 = vst.msk [vmem:[%s1092_s5 + $0xe8] sm:$0xff] %vm548_vm2, %v1224_v57  ;;  %v610_v8 = vsel %vm548_vm2, %v936_v51, 0.0 }
 0x10a   : > { %v708_v63 = vadd.f32 %v707_v60, %v706_v55  ;;  %v607_v0 = vadd.f32 %v606_v61, %v605_v53  ;;  %v683_v11 = vmul.f32 %v1217_v52, %v1217_v52  ;;  %v713_v15 = vsel %vm548_vm2, %v667_v2, 0.0 }
 0x10b   : > { %v709_v3 = vsel %vm548_vm2, %v665_v62, 0.0  ;;  %v620_v37 = vsel %vm548_vm2, %v1136_v49, 0.0  ;;  %v721_v39 = vsel %vm548_vm2, %v671_v31, 0.0  ;;  %v723_v40 = vsel %vm548_vm2, %v672_v33, 0.0 }
 0x10c   : > { %v609_v5 = vadd.f32 %v608_v1, %v607_v0  ;;  %v710_v6 = vadd.f32 %v709_v3, %v708_v63  ;;  %v1248_v19 = vsel %vm548_vm2, %v683_v11, 0.0  ;;  %v673_v42 = vmul.f32 %v1152_v58, %v1152_v58 }
 0x10d   : > { %v674_v47 = vmul.f32 %v1129_v45, %v1129_v45  ;;  %v622_v28 = vsel %vm548_vm2, %v1152_v58, 0.0  ;;  %v624_v49 = vsel %vm548_vm2, %v1129_v45, 0.0  ;;  %v675_v51 = vmul.f32 %v1145_v54, %v1145_v54 }
 0x10e   : > { %v712_v12 = vadd.f32 %v711_v7, %v710_v6  ;;  %v611_v14 = vadd.f32 %v610_v8, %v609_v5  ;;  %v725_v53 = vsel %vm548_vm2, %v673_v42, 0.0  ;;  %v676_v55 = vmul.f32 %v1172_v13, %v1172_v13 }
 0x10f   : > { %v727_v60 = vsel %vm548_vm2, %v674_v47, 0.0  ;;  %v626_v58 = vsel %vm548_vm2, %v1145_v54, 0.0  ;;  %v628_v61 = vsel %vm548_vm2, %v1172_v13, 0.0  ;;  %v729_v63 = vsel %vm548_vm2, %v675_v51, 0.0 }
 0x110   : > { %v613_v20 = vadd.f32 %v612_v10, %v611_v14  ;;  %v714_v21 = vadd.f32 %v713_v15, %v712_v12  ;;  %v731_v0 = vsel %vm548_vm2, %v676_v55, 0.0  ;;  %v677_v1 = vmul.f32 %v1188_v22, %v1188_v22 }
 0x111   : > { %v630_v54 = vsel %vm548_vm2, %v1188_v22, 0.0  ;;  %v632_v13 = vsel %vm548_vm2, %v1165_v9, 0.0  ;;  %v679_v7 = vmul.f32 %v1181_v18, %v1181_v18  ;;  %v680_v10 = vmul.f32 %v1208_v46, %v1208_v46 }
 0x112   : > { %v716_v26 = vadd.f32 %v715_v16, %v714_v21  ;;  %v615_v27 = vadd.f32 %v614_v24, %v613_v20  ;;  %v733_v8 = vsel %vm548_vm2, %v677_v1, 0.0  ;;  %v735_v14 = vsel %vm548_vm2, %v678_v4, 0.0 }
 0x113   : > { %v634_v22 = vsel %vm548_vm2, %v1181_v18, 0.0  ;;  %v636_v15 = vsel %vm548_vm2, %v1208_v46, 0.0  ;;  %v737_v17 = vsel %vm548_vm2, %v679_v7, 0.0  ;;  %v739_v20 = vsel %vm548_vm2, %v680_v10, 0.0 }
 0x114   : > { %v617_v34 = vadd.f32 %v616_v29, %v615_v27  ;;  %v718_v35 = vadd.f32 %v717_v32, %v716_v26  ;;  %v681_v21 = vmul.f32 %v1224_v57, %v1224_v57  ;;  %v682_v26 = vmul.f32 %v1201_v41, %v1201_v41 }
 0x115   : > { %v638_v18 = vsel %vm548_vm2, %v1224_v57, 0.0  ;;  %v640_v29 = vsel %vm548_vm2, %v1201_v41, 0.0 }
 0x116   : > { %v720_v38 = vadd.f32 %v719_v36, %v718_v35  ;;  %v619_v23 = vadd.f32 %v618_v30, %v617_v34  ;;  %v741_v31 = vsel %vm548_vm2, %v681_v21, 0.0  ;;  %v743_v34 = vsel %vm548_vm2, %v682_v26, 0.0 }
 0x117   : > { %v642_v35 = vsel %vm548_vm2, %v1217_v52, 0.0 }
 0x118   : > { %v621_v43 = vadd.f32 %v620_v37, %v619_v23  ;;  %v722_v44 = vadd.f32 %v721_v39, %v720_v38 }
 0x11a   : > { %v724_v48 = vadd.f32 %v723_v40, %v722_v44  ;;  %v623_v50 = vadd.f32 %v622_v28, %v621_v43 }
 0x11c   : > { %v625_v56 = vadd.f32 %v624_v49, %v623_v50  ;;  %v726_v59 = vadd.f32 %v725_v53, %v724_v48 }
 0x11e   : > { %v728_v62 = vadd.f32 %v727_v60, %v726_v59  ;;  %v627_v45 = vadd.f32 %v626_v58, %v625_v56 }
 0x120   : > { %v629_v2 = vadd.f32 %v628_v61, %v627_v45  ;;  %v730_v3 = vadd.f32 %v729_v63, %v728_v62 }
 0x122   : > { %v732_v5 = vadd.f32 %v731_v0, %v730_v3  ;;  %v631_v6 = vadd.f32 %v630_v54, %v629_v2 }
 0x124   : > { %v633_v11 = vadd.f32 %v632_v13, %v631_v6  ;;  %v734_v12 = vadd.f32 %v733_v8, %v732_v5 }
 0x126   : > { %v736_v16 = vadd.f32 %v735_v14, %v734_v12  ;;  %v635_v9 = vadd.f32 %v634_v22, %v633_v11 }
 0x128   : > { %v637_v25 = vadd.f32 %v636_v15, %v635_v9  ;;  %v738_v24 = vadd.f32 %v737_v17, %v736_v16 }
 0x12a   : > { %v740_v46 = vadd.f32 %v739_v20, %v738_v24  ;;  %v639_v27 = vadd.f32 %v638_v18, %v637_v25 }
 0x12c   : > { %v641_v32 = vadd.f32 %v640_v29, %v639_v27  ;;  %v742_v33 = vadd.f32 %v741_v31, %v740_v46 }
 0x12e   : > { %v643_v36 = vadd.f32 %v642_v35, %v641_v32  ;;  %v744_v30 = vadd.f32 %v743_v34, %v742_v33 }
 0x130   : > { %v644_v37 = vrot.slane %v643_v36, 4  ;;  %v746_v57 = vadd.f32 %v1248_v19, %v744_v30 }
 0x132   : > { %v645_v38 = vadd.f32 %v644_v37, %v643_v36  ;;  %v747_v23 = vrot.slane %v746_v57, 4 }
 0x134   : > { %v646_v39 = vrot.slane %v645_v38, 2  ;;  %v748_v41 = vadd.f32 %v747_v23, %v746_v57 }
 0x136   : > { %v647_v40 = vadd.f32 %v646_v39, %v645_v38  ;;  %v749_v42 = vrot.slane %v748_v41, 2 }
 0x138   : > { %v648_v43 = vrot.slane %v647_v40, 1  ;;  %v750_v44 = vadd.f32 %v749_v42, %v748_v41 }
 0x13a   : > { %v649_v52 = vadd.f32 %v648_v43, %v647_v40  ;;  %v751_v47 = vrot.slane %v750_v44, 1 }
 0x13c   : > { %651 = vst.msk [vmem:[%s184_s9] sm:$0x1] %vm650_vm3, %v649_v52  ;;  %v752_v28 = vadd.f32 %v751_v47, %v750_v44 }
 0x13e   : > { %753 = vst.msk [vmem:[%s184_s9 + $0x1] sm:$0x1] %vm650_vm3, %v752_v28 }
 0x13f PF: > { %s14_s12 = sadd.s32 1, %s1000_s12  }
 0x140   : > { %p11_p5 = scmp.ge.s32.totalorder %s14_s12, 9  }
 0x142   :  { %13 = sbr.rel (!%p11_p5) target bundleno = 1 (0x1), region = 70 }

// kernel: generator_forward.12
= control target key start
LH: loop header
LB: loop body
LE: loop exit
PB: predicated region body
PF: predicated region fallthrough
CT: control target
= control target key end

     0   :  { %s518_s12 = smov 0   ;;  %s712_s0 = inlined_call_operand.vmem [shape: f32[1792,8], index: 0, kind: input, shape index: {}]   ;;  %s713_s1 = inlined_call_operand.vmem [shape: f32[1,8], index: 1, kind: input, shape index: {}]   ;;  %s714_s2 = inlined_call_operand.vmem [shape: f32[1,8], index: 2, kind: input, shape index: {}]   ;;  %s715_s3 = inlined_call_operand.vmem [shape: f32[1792,8], index: 3, kind: output, shape index: {}]  }
   0x1 LB: > { %s469_s13 = sadd.s32 4294967295, %s496_s12   ;;  %p473_p0 = scmp.ge.s32.totalorder %s496_s12, 1  ;;  %s496_s12 = sphi %s518_s12, %s13_s12  }
   0x2   : > { %p138_p1 = scmp.lt.s32.totalorder %s496_s12, 8 }
   0x4   : > { %p139_p2 = pnand %p473_p0, %p138_p1 }
   0x5   : > { %s474_s14 = sshll.u32 (!%p139_p2), %s469_s13, 5  ;;  %v532_v0 = vld [vmem:[%s713_s1] ss:$0 sm:$0xff] (!%p139_p2)  ;;  %vm380_vm0 = vcmask (!%p139_p2), 64512  }
   0x6   : > { %142 = sbr.rel (%p139_p2) target bundleno = 62 (0x3e), region = 32  ;;  %p163_p3 = scmp.lt.s32.totalorder (!%p139_p2), %s474_s14, 223  ;;  %v542_v1 = vld [vmem:[%s714_s2] ss:$0 sm:$0xff] (!%p139_p2) }
   0xd   : > { %s717_s14 = smov (!%p163_p3, %s474_s14), 223 }
   0xe   : > { %s475_s15 = sshll.u32 %s717_s14, 3 }
   0xf   : > { %s537_s20 = scalar_lea.vmem %s712_s0, %s475_s15  ;;  %s570_s25 = scalar_lea.vmem %s715_s3, %s475_s15 }
  0x10   : > { %v174_v2 = vld [vmem:[%s537_s20] sm:$0xff]  ;;  %v175_v3 = vld [vmem:[%s537_s20 + $0x8] sm:$0xff]  ;;  %v176_v4 = vld [vmem:[%s537_s20 + $0x10] sm:$0xff] }
  0x11   : > { %v213_v5 = vmul.f32 %v532_v0, %v174_v2  ;;  %v214_v6 = vmul.f32 %v532_v0, %v175_v3  ;;  %v215_v7 = vmul.f32 %v532_v0, %v176_v4  ;;  %v177_v8 = vld [vmem:[%s537_s20 + $0x18] sm:$0xff]  ;;  %v178_v9 = vld [vmem:[%s537_s20 + $0x20] sm:$0xff]  ;;  %v179_v10 = vld [vmem:[%s537_s20 + $0x28] sm:$0xff] }
  0x12   : > { %v216_v11 = vmul.f32 %v532_v0, %v177_v8  ;;  %v217_v12 = vmul.f32 %v532_v0, %v178_v9  ;;  %v218_v13 = vmul.f32 %v532_v0, %v179_v10  ;;  %v180_v14 = vld [vmem:[%s537_s20 + $0x30] sm:$0xff]  ;;  %v181_v15 = vld [vmem:[%s537_s20 + $0x38] sm:$0xff]  ;;  %v182_v24 = vld [vmem:[%s537_s20 + $0x40] sm:$0xff] }
  0x13   : > { %v252_v16 = vadd.f32 %v542_v1, %v213_v5  ;;  %v253_v17 = vadd.f32 %v542_v1, %v214_v6  ;;  %v254_v18 = vadd.f32 %v542_v1, %v215_v7  ;;  %v219_v19 = vmul.f32 %v532_v0, %v180_v14  ;;  %v183_v32 = vld [vmem:[%s537_s20 + $0x48] sm:$0xff]  ;;  %v184_v33 = vld [vmem:[%s537_s20 + $0x50] sm:$0xff]  ;;  %v185_v34 = vld [vmem:[%s537_s20 + $0x58] sm:$0xff] }
  0x14   : > { %v255_v20 = vadd.f32 %v542_v1, %v216_v11  ;;  %v256_v21 = vadd.f32 %v542_v1, %v217_v12  ;;  %v257_v22 = vadd.f32 %v542_v1, %v218_v13  ;;  %v220_v23 = vmul.f32 %v532_v0, %v181_v15  ;;  %v186_v46 = vld [vmem:[%s537_s20 + $0x60] sm:$0xff]  ;;  %v187_v47 = vld [vmem:[%s537_s20 + $0x68] sm:$0xff]  ;;  %v188_v58 = vld [vmem:[%s537_s20 + $0x70] sm:$0xff] }
  0x15   : > { %vm284_vm1 = vcmp.ge.f32.partialorder %v252_v16, 0.0  ;;  %v316_v25 = vmul.f32 0.2, %v252_v16  ;;  %vm285_vm2 = vcmp.ge.f32.partialorder %v253_v17, 0.0  ;;  %v317_v26 = vmul.f32 0.2, %v253_v17 }
  0x16   : > { %vm286_vm3 = vcmp.ge.f32.partialorder %v254_v18, 0.0  ;;  %v318_v27 = vmul.f32 0.2, %v254_v18  ;;  %vm287_vm4 = vcmp.ge.f32.partialorder %v255_v20, 0.0  ;;  %v319_v28 = vmul.f32 0.2, %v255_v20 }
  0x17   : > { %v348_v29 = vsel %vm284_vm1, %v252_v16, %v316_v25  ;;  %v349_v30 = vsel %vm285_vm2, %v253_v17, %v317_v26  ;;  %vm288_vm5 = vcmp.ge.f32.partialorder %v256_v21, 0.0  ;;  %v320_v31 = vmul.f32 0.2, %v256_v21  ;;  %v189_v59 = vld [vmem:[%s537_s20 + $0x78] sm:$0xff]  ;;  %v190_v6 = vld [vmem:[%s537_s20 + $0x80] sm:$0xff]  ;;  %v191_v7 = vld [vmem:[%s537_s20 + $0x88] sm:$0xff] }
  0x18   : > { %381 = vst.msk [vmem:[%s570_s25] sm:$0xff] %vm380_vm0, %v348_v29  ;;  %382 = vst.msk [vmem:[%s570_s25 + $0x8] sm:$0xff] %vm380_vm0, %v349_v30  ;;  %v350_v35 = vsel %vm286_vm3, %v254_v18, %v318_v27  ;;  %v351_v36 = vsel %vm287_vm4, %v255_v20, %v319_v28  ;;  %vm289_vm6 = vcmp.ge.f32.partialorder %v257_v22, 0.0  ;;  %v321_v37 = vmul.f32 0.2, %v257_v22  ;;  %v192_v12 = vld [vmem:[%s537_s20 + $0x90] sm:$0xff] }
  0x19   : > { %383 = vst.msk [vmem:[%s570_s25 + $0x10] sm:$0xff] %vm380_vm0, %v350_v35  ;;  %384 = vst.msk [vmem:[%s570_s25 + $0x18] sm:$0xff] %vm380_vm0, %v351_v36  ;;  %v352_v38 = vsel %vm288_vm5, %v256_v21, %v320_v31  ;;  %v258_v39 = vadd.f32 %v542_v1, %v219_v19  ;;  %v259_v40 = vadd.f32 %v542_v1, %v220_v23  ;;  %v193_v13 = vld [vmem:[%s537_s20 + $0x98] sm:$0xff]  ;;  %v195_v25 = vld [vmem:[%s537_s20 + $0xa8] sm:$0xff] }
  0x1a   : > { %v221_v41 = vmul.f32 %v532_v0, %v182_v24  ;;  %385 = vst.msk [vmem:[%s570_s25 + $0x20] sm:$0xff] %vm380_vm0, %v352_v38  ;;  %v353_v42 = vsel %vm289_vm6, %v257_v22, %v321_v37  ;;  %v222_v43 = vmul.f32 %v532_v0, %v183_v32  ;;  %v223_v44 = vmul.f32 %v532_v0, %v184_v33  ;;  %v194_v24 = vld [vmem:[%s537_s20 + $0xa0] sm:$0xff]  ;;  %v196_v36 = vld [vmem:[%s537_s20 + $0xb0] sm:$0xff]  ;;  %v197_v37 = vld [vmem:[%s537_s20 + $0xb8] sm:$0xff] }
  0x1b   : > { %v224_v45 = vmul.f32 %v532_v0, %v185_v34  ;;  %386 = vst.msk [vmem:[%s570_s25 + $0x28] sm:$0xff] %vm380_vm0, %v353_v42  ;;  %vm290_vm7 = vcmp.ge.f32.partialorder %v258_v39, 0.0  ;;  %v322_v48 = vmul.f32 0.2, %v258_v39  ;;  %vm291_vm8 = vcmp.ge.f32.partialorder %v259_v40, 0.0 }
  0x1c   : > { %v323_v49 = vmul.f32 0.2, %v259_v40  ;;  %v260_v50 = vadd.f32 %v542_v1, %v221_v41  ;;  %v261_v51 = vadd.f32 %v542_v1, %v222_v43  ;;  %v262_v52 = vadd.f32 %v542_v1, %v223_v44 }
  0x1d   : > { %v263_v53 = vadd.f32 %v542_v1, %v224_v45  ;;  %v354_v54 = vsel %vm290_vm7, %v258_v39, %v322_v48  ;;  %v225_v56 = vmul.f32 %v532_v0, %v186_v46  ;;  %v226_v57 = vmul.f32 %v532_v0, %v187_v47  ;;  %v198_v46 = vld [vmem:[%s537_s20 + $0xc0] sm:$0xff]  ;;  %v199_v47 = vld [vmem:[%s537_s20 + $0xc8] sm:$0xff] }
  0x1e   : > { %v355_v55 = vsel %vm291_vm8, %v259_v40, %v323_v49  ;;  %387 = vst.msk [vmem:[%s570_s25 + $0x30] sm:$0xff] %vm380_vm0, %v354_v54  ;;  %vm292_vm9 = vcmp.ge.f32.partialorder %v260_v50, 0.0  ;;  %v324_v60 = vmul.f32 0.2, %v260_v50  ;;  %vm293_vm10 = vcmp.ge.f32.partialorder %v261_v51, 0.0 }
  0x1f   : > { %388 = vst.msk [vmem:[%s570_s25 + $0x38] sm:$0xff] %vm380_vm0, %v355_v55  ;;  %v325_v61 = vmul.f32 0.2, %v261_v51  ;;  %vm294_vm11 = vcmp.ge.f32.partialorder %v262_v52, 0.0  ;;  %v326_v62 = vmul.f32 0.2, %v262_v52  ;;  %v264_v4 = vadd.f32 %v542_v1, %v225_v56 }
  0x20   : > { %vm295_vm12 = vcmp.ge.f32.partialorder %v263_v53, 0.0  ;;  %v327_v63 = vmul.f32 0.2, %v263_v53  ;;  %v356_v2 = vsel %vm292_vm9, %v260_v50, %v324_v60  ;;  %v265_v5 = vadd.f32 %v542_v1, %v226_v57 }
  0x21   : > { %v357_v3 = vsel %vm293_vm10, %v261_v51, %v325_v61  ;;  %389 = vst.msk [vmem:[%s570_s25 + $0x40] sm:$0xff] %vm380_vm0, %v356_v2  ;;  %v358_v8 = vsel %vm294_vm11, %v262_v52, %v326_v62  ;;  %v227_v10 = vmul.f32 %v532_v0, %v188_v58  ;;  %v228_v11 = vmul.f32 %v532_v0, %v189_v59  ;;  %v200_v52 = vld [vmem:[%s537_s20 + $0xd0] sm:$0xff]  ;;  %v202_v2 = vld [vmem:[%s537_s20 + $0xe0] sm:$0xff] }
  0x22   : > { %390 = vst.msk [vmem:[%s570_s25 + $0x48] sm:$0xff] %vm380_vm0, %v357_v3  ;;  %v359_v9 = vsel %vm295_vm12, %v263_v53, %v327_v63  ;;  %391 = vst.msk [vmem:[%s570_s25 + $0x50] sm:$0xff] %vm380_vm0, %v358_v8  ;;  %vm296_vm13 = vcmp.ge.f32.partialorder %v264_v4, 0.0  ;;  %v328_v14 = vmul.f32 0.2, %v264_v4  ;;  %vm297_vm14 = vcmp.ge.f32.partialorder %v265_v5, 0.0 }
  0x23   : > { %392 = vst.msk [vmem:[%s570_s25 + $0x58] sm:$0xff] %vm380_vm0, %v359_v9  ;;  %v329_v15 = vmul.f32 0.2, %v265_v5  ;;  %v266_v16 = vadd.f32 %v542_v1, %v227_v10  ;;  %v267_v17 = vadd.f32 %v542_v1, %v228_v11  ;;  %v229_v18 = vmul.f32 %v532_v0, %v190_v6  ;;  %v201_v53 = vld [vmem:[%s537_s20 + $0xd8] sm:$0xff]  ;;  %v203_v3 = vld [vmem:[%s537_s20 + $0xe8] sm:$0xff] }
  0x24   : > { %v230_v19 = vmul.f32 %v532_v0, %v191_v7  ;;  %v360_v20 = vsel %vm296_vm13, %v264_v4, %v328_v14  ;;  %v231_v22 = vmul.f32 %v532_v0, %v192_v12  ;;  %v232_v23 = vmul.f32 %v532_v0, %v193_v13  ;;  %v204_v14 = vld [vmem:[%s537_s20 + $0xf0] sm:$0xff] }
  0x25   : > { %v361_v21 = vsel %vm297_vm14, %v265_v5, %v329_v15  ;;  %393 = vst.msk [vmem:[%s570_s25 + $0x60] sm:$0xff] %vm380_vm0, %v360_v20  ;;  %vm298_vm15 = vcmp.ge.f32.partialorder %v266_v16, 0.0  ;;  %v330_v26 = vmul.f32 0.2, %v266_v16  ;;  %vm299_vm1 = vcmp.ge.f32.partialorder %v267_v17, 0.0  ;;  %v205_v15 = vld [vmem:[%s537_s20 + $0xf8] sm:$0xff] }
  0x26   : > { %394 = vst.msk [vmem:[%s570_s25 + $0x68] sm:$0xff] %vm380_vm0, %v361_v21  ;;  %v331_v27 = vmul.f32 0.2, %v267_v17  ;;  %v268_v28 = vadd.f32 %v542_v1, %v229_v18  ;;  %v269_v29 = vadd.f32 %v542_v1, %v230_v19  ;;  %v270_v30 = vadd.f32 %v542_v1, %v231_v22 }
  0x27   : > { %v271_v31 = vadd.f32 %v542_v1, %v232_v23  ;;  %v362_v32 = vsel %vm298_vm15, %v266_v16, %v330_v26  ;;  %v233_v34 = vmul.f32 %v532_v0, %v194_v24  ;;  %v234_v35 = vmul.f32 %v532_v0, %v195_v25 }
  0x28   : > { %v363_v33 = vsel %vm299_vm1, %v267_v17, %v331_v27  ;;  %395 = vst.msk [vmem:[%s570_s25 + $0x70] sm:$0xff] %vm380_vm0, %v362_v32  ;;  %vm300_vm2 = vcmp.ge.f32.partialorder %v268_v28, 0.0  ;;  %v332_v38 = vmul.f32 0.2, %v268_v28  ;;  %vm301_vm3 = vcmp.ge.f32.partialorder %v269_v29, 0.0 }
  0x29   : > { %396 = vst.msk [vmem:[%s570_s25 + $0x78] sm:$0xff] %vm380_vm0, %v363_v33  ;;  %v333_v39 = vmul.f32 0.2, %v269_v29  ;;  %vm302_vm4 = vcmp.ge.f32.partialorder %v270_v30, 0.0  ;;  %v334_v40 = vmul.f32 0.2, %v270_v30  ;;  %v272_v44 = vadd.f32 %v542_v1, %v233_v34 }
  0x2a   : > { %vm303_vm5 = vcmp.ge.f32.partialorder %v271_v31, 0.0  ;;  %v335_v41 = vmul.f32 0.2, %v271_v31  ;;  %v364_v42 = vsel %vm300_vm2, %v268_v28, %v332_v38  ;;  %v273_v45 = vadd.f32 %v542_v1, %v234_v35 }
  0x2b   : > { %v365_v43 = vsel %vm301_vm3, %v269_v29, %v333_v39  ;;  %397 = vst.msk [vmem:[%s570_s25 + $0x80] sm:$0xff] %vm380_vm0, %v364_v42  ;;  %v366_v48 = vsel %vm302_vm4, %v270_v30, %v334_v40  ;;  %v235_v50 = vmul.f32 %v532_v0, %v196_v36  ;;  %v236_v51 = vmul.f32 %v532_v0, %v197_v37 }
  0x2c   : > { %398 = vst.msk [vmem:[%s570_s25 + $0x88] sm:$0xff] %vm380_vm0, %v365_v43  ;;  %v367_v49 = vsel %vm303_vm5, %v271_v31, %v335_v41  ;;  %399 = vst.msk [vmem:[%s570_s25 + $0x90] sm:$0xff] %vm380_vm0, %v366_v48  ;;  %vm304_vm6 = vcmp.ge.f32.partialorder %v272_v44, 0.0  ;;  %v336_v54 = vmul.f32 0.2, %v272_v44  ;;  %vm305_vm7 = vcmp.ge.f32.partialorder %v273_v45, 0.0 }
  0x2d   : > { %400 = vst.msk [vmem:[%s570_s25 + $0x98] sm:$0xff] %vm380_vm0, %v367_v49  ;;  %v337_v55 = vmul.f32 0.2, %v273_v45  ;;  %v274_v56 = vadd.f32 %v542_v1, %v235_v50  ;;  %v275_v57 = vadd.f32 %v542_v1, %v236_v51  ;;  %v237_v58 = vmul.f32 %v532_v0, %v198_v46 }
  0x2e   : > { %v238_v59 = vmul.f32 %v532_v0, %v199_v47  ;;  %v368_v60 = vsel %vm304_vm6, %v272_v44, %v336_v54  ;;  %v239_v62 = vmul.f32 %v532_v0, %v200_v52  ;;  %v240_v63 = vmul.f32 %v532_v0, %v201_v53 }
  0x2f   : > { %v369_v61 = vsel %vm305_vm7, %v273_v45, %v337_v55  ;;  %401 = vst.msk [vmem:[%s570_s25 + $0xa0] sm:$0xff] %vm380_vm0, %v368_v60  ;;  %vm306_vm8 = vcmp.ge.f32.partialorder %v274_v56, 0.0  ;;  %v338_v4 = vmul.f32 0.2, %v274_v56  ;;  %vm307_vm9 = vcmp.ge.f32.partialorder %v275_v57, 0.0 }
  0x30   : > { %402 = vst.msk [vmem:[%s570_s25 + $0xa8] sm:$0xff] %vm380_vm0, %v369_v61  ;;  %v339_v5 = vmul.f32 0.2, %v275_v57  ;;  %v276_v6 = vadd.f32 %v542_v1, %v237_v58  ;;  %v277_v7 = vadd.f32 %v542_v1, %v238_v59  ;;  %v278_v8 = vadd.f32 %v542_v1, %v239_v62 }
  0x31   : > { %v279_v9 = vadd.f32 %v542_v1, %v240_v63  ;;  %v370_v10 = vsel %vm306_vm8, %v274_v56, %v338_v4  ;;  %v241_v12 = vmul.f32 %v532_v0, %v202_v2  ;;  %v242_v13 = vmul.f32 %v532_v0, %v203_v3 }
  0x32   : > { %v371_v11 = vsel %vm307_vm9, %v275_v57, %v339_v5  ;;  %403 = vst.msk [vmem:[%s570_s25 + $0xb0] sm:$0xff] %vm380_vm0, %v370_v10  ;;  %vm308_vm10 = vcmp.ge.f32.partialorder %v276_v6, 0.0  ;;  %v340_v16 = vmul.f32 0.2, %v276_v6  ;;  %vm309_vm11 = vcmp.ge.f32.partialorder %v277_v7, 0.0 }
  0x33   : > { %404 = vst.msk [vmem:[%s570_s25 + $0xb8] sm:$0xff] %vm380_vm0, %v371_v11  ;;  %v341_v17 = vmul.f32 0.2, %v277_v7  ;;  %vm310_vm12 = vcmp.ge.f32.partialorder %v278_v8, 0.0  ;;  %v342_v18 = vmul.f32 0.2, %v278_v8  ;;  %v280_v22 = vadd.f32 %v542_v1, %v241_v12 }
  0x34   : > { %vm311_vm13 = vcmp.ge.f32.partialorder %v279_v9, 0.0  ;;  %v343_v19 = vmul.f32 0.2, %v279_v9  ;;  %v372_v20 = vsel %vm308_vm10, %v276_v6, %v340_v16  ;;  %v281_v23 = vadd.f32 %v542_v1, %v242_v13 }
  0x35   : > { %v373_v21 = vsel %vm309_vm11, %v277_v7, %v341_v17  ;;  %405 = vst.msk [vmem:[%s570_s25 + $0xc0] sm:$0xff] %vm380_vm0, %v372_v20  ;;  %v374_v24 = vsel %vm310_vm12, %v278_v8, %v342_v18  ;;  %v243_v26 = vmul.f32 %v532_v0, %v204_v14  ;;  %v244_v27 = vmul.f32 %v532_v0, %v205_v15 }
  0x36   : > { %406 = vst.msk [vmem:[%s570_s25 + $0xc8] sm:$0xff] %vm380_vm0, %v373_v21  ;;  %v375_v25 = vsel %vm311_vm13, %v279_v9, %v343_v19  ;;  %407 = vst.msk [vmem:[%s570_s25 + $0xd0] sm:$0xff] %vm380_vm0, %v374_v24  ;;  %vm312_vm14 = vcmp.ge.f32.partialorder %v280_v22, 0.0  ;;  %v344_v28 = vmul.f32 0.2, %v280_v22  ;;  %vm313_vm15 = vcmp.ge.f32.partialorder %v281_v23, 0.0 }
  0x37   : > { %408 = vst.msk [vmem:[%s570_s25 + $0xd8] sm:$0xff] %vm380_vm0, %v375_v25  ;;  %v345_v29 = vmul.f32 0.2, %v281_v23  ;;  %v282_v30 = vadd.f32 %v542_v1, %v243_v26  ;;  %v283_v31 = vadd.f32 %v542_v1, %v244_v27 }
  0x38   : > { %v376_v32 = vsel %vm312_vm14, %v280_v22, %v344_v28 }
  0x39   : > { %v377_v33 = vsel %vm313_vm15, %v281_v23, %v345_v29  ;;  %409 = vst.msk [vmem:[%s570_s25 + $0xe0] sm:$0xff] %vm380_vm0, %v376_v32  ;;  %vm314_vm1 = vcmp.ge.f32.partialorder %v282_v30, 0.0  ;;  %v346_v0 = vmul.f32 0.2, %v282_v30  ;;  %vm315_vm2 = vcmp.ge.f32.partialorder %v283_v31, 0.0 }
  0x3a   : > { %410 = vst.msk [vmem:[%s570_s25 + $0xe8] sm:$0xff] %vm380_vm0, %v377_v33  ;;  %v347_v34 = vmul.f32 0.2, %v283_v31 }
  0x3b   : > { %v378_v35 = vsel %vm314_vm1, %v282_v30, %v346_v0 }
  0x3c   : > { %v379_v36 = vsel %vm315_vm2, %v283_v31, %v347_v34  ;;  %411 = vst.msk [vmem:[%s570_s25 + $0xf0] sm:$0xff] %vm380_vm0, %v378_v35 }
  0x3d   : > { %412 = vst.msk [vmem:[%s570_s25 + $0xf8] sm:$0xff] %vm380_vm0, %v379_v36 }
  0x3e PF: > { %s13_s12 = sadd.s32 1, %s496_s12  }
  0x3f   : > { %p10_p4 = scmp.ge.s32.totalorder %s13_s12, 9  }
  0x41   :  { %12 = sbr.rel (!%p10_p4) target bundleno = 1 (0x1), region = 62 }

// kernel: generator_forward.13
= control target key start
LH: loop header
LB: loop body
LE: loop exit
PB: predicated region body
PF: predicated region fallthrough
CT: control target
= control target key end

     0   :  { %s910_s12 = smov 0   ;;  %s1083_s0 = inlined_call_operand.vmem [shape: bf16[1792,72], index: 0, kind: input, shape index: {}]   ;;  %s1084_s1 = inlined_call_operand.vmem [shape: bf16[72,3], index: 1, kind: input, shape index: {}]   ;;  %s1085_s2 = inlined_call_operand.vmem [shape: f32[1,3], index: 2, kind: input, shape index: {}]   ;;  %s1086_s3 = inlined_call_operand.vmem [shape: f32[1792,3], index: 3, kind: output, shape index: {}]  }
   0x1 LB: > { %s665_s13 = sadd.s32 4294967295, %s888_s12   ;;  %p669_p0 = scmp.ge.s32.totalorder %s888_s12, 1  ;;  %s888_s12 = sphi %s910_s12, %s13_s12  }
   0x2   : > { %p138_p1 = scmp.lt.s32.totalorder %s888_s12, 8 }
   0x4   : > { %p139_p2 = pnand %p669_p0, %p138_p1 }
   0x5   : > { %v797_v0 = vld [vmem:[%s1084_s1] sm:$0xff] (!%p139_p2)   ;;  %v798_v1 = vld [vmem:[%s1084_s1 + $0x8] sm:$0xff] (!%p139_p2)   ;;  %s670_s18 = sshll.u32 (!%p139_p2), %s665_s13, 5  ;;  %v799_v2 = vld [vmem:[%s1084_s1 + $0x10] sm:$0xff] (!%p139_p2)   ;;  %vm330_vm0 = vcmask (!%p139_p2), 588800   ;;  %vm379_vm1 = vcmask (!%p139_p2), 1043456  }
   0x6   : > { %142 = sbr.rel (%p139_p2) target bundleno = 286 (0x11e), region = 32  ;;  %735 = vmatprep.subr.bf16.mxu0 (!%p139_p2), %v797_v0  ;;  %777 = vmatprep.subr.bf16.mxu1 (!%p139_p2), %v797_v0  ;;  %p163_p3 = scmp.lt.s32.totalorder (!%p139_p2), %s670_s18, 223  ;;  %v800_v3 = vld [vmem:[%s1084_s1 + $0x18] sm:$0xff] (!%p139_p2)   ;;  %v801_v6 = vld [vmem:[%s1084_s1 + $0x20] ss:$0 sps:$4 sm:$0xff] (!%p139_p2)   ;;  %vm576_vm2 = vcmask (!%p139_p2), 23552  }
   0x7   : > { %736 = vmatpush3.bf16.msra.mxu0 (!%p139_p2), %v797_v0  ;;  %782 = vmatpush3.bf16.msra.mxu1 (!%p139_p2), %v797_v0  ;;  %v381_v7 = vsel (!%p139_p2), %vm379_vm1, %v801_v6, 0  ;;  %v976_v22 = vld [vmem:[%s1085_s2] ss:$0 sm:$0xff] (!%p139_p2) }
   0x8   : > { %737 = vmatprep.subr.bf16.mxu0 (!%p139_p2), %v798_v1  ;;  %778 = vmatprep.subr.bf16.mxu1 (!%p139_p2), %v798_v1 }
   0xb   : > { %738 = vmatpush3.bf16.msra.mxu0 (!%p139_p2), %v798_v1  ;;  %783 = vmatpush3.bf16.msra.mxu1 (!%p139_p2), %v798_v1 }
   0xc   : > { %739 = vmatprep.subr.bf16.mxu0 (!%p139_p2), %v799_v2  ;;  %779 = vmatprep.subr.bf16.mxu1 (!%p139_p2), %v799_v2 }
   0xd   : > { %s1088_s18 = smov (!%p163_p3, %s670_s18), 223 }
   0xe   : > { %s671_s21 = sshll.u32 %s1088_s18, 2  ;;  %s673_s4 = sshll.u32 %s1088_s18, 3 }
   0xf   : > { %s936_s26 = scalar_lea.vmem %s1083_s0, %s671_s21  ;;  %740 = vmatpush3.bf16.msra.mxu0 %v799_v2  ;;  %784 = vmatpush3.bf16.msra.mxu1 %v799_v2  ;;  %s994_s7 = scalar_lea.vmem %s1086_s3, %s673_s4 }
  0x10   : > { %v802_v4 = vld [vmem:[%s936_s26] sm:$0xff]   ;;  %741 = vmatprep.subr.bf16.mxu0 %v800_v3  ;;  %780 = vmatprep.subr.bf16.mxu1 %v800_v3  ;;  %v804_v8 = vld [vmem:[%s936_s26 + $0x8] sm:$0xff]   ;;  %v806_v10 = vld [vmem:[%s936_s26 + $0x10] sm:$0xff]  }
  0x11   : > { %v803_v5 = vld [vmem:[%s936_s26 + $0x40] sm:$0xff]   ;;  %745 = vmatprep.mubr.msk.bf16.mxu0 %vm330_vm0, %v802_v4  ;;  %v805_v9 = vld [vmem:[%s936_s26 + $0x48] sm:$0xff]   ;;  %v807_v11 = vld [vmem:[%s936_s26 + $0x50] sm:$0xff]  }
  0x12   : > { %761 = vmatprep.mubr.msk.bf16.mxu1 %vm330_vm0, %v803_v5  ;;  %v808_v12 = vld [vmem:[%s936_s26 + $0x18] sm:$0xff]   ;;  %v810_v14 = vld [vmem:[%s936_s26 + $0x20] sm:$0xff]   ;;  %v812_v16 = vld [vmem:[%s936_s26 + $0x28] sm:$0xff]  }
  0x13   : > { %742 = vmatpush3.bf16.msra.mxu0 %v800_v3  ;;  %785 = vmatpush3.bf16.msra.mxu1 %v800_v3  ;;  %v809_v13 = vld [vmem:[%s936_s26 + $0x58] sm:$0xff]   ;;  %v811_v15 = vld [vmem:[%s936_s26 + $0x60] sm:$0xff]   ;;  %v813_v17 = vld [vmem:[%s936_s26 + $0x68] sm:$0xff]  }
  0x14   : > { %787 = vmatprep.subr.msk.bf16.mxu0 %vm379_vm1, %v801_v6  ;;  %788 = vmatprep.subr.msk.bf16.mxu1 %vm379_vm1, %v801_v6  ;;  %v814_v18 = vld [vmem:[%s936_s26 + $0x30] sm:$0xff]   ;;  %v816_v20 = vld [vmem:[%s936_s26 + $0x38] sm:$0xff]  }
  0x15   : > { %v815_v19 = vld [vmem:[%s936_s26 + $0x70] sm:$0xff]   ;;  %v817_v21 = vld [vmem:[%s936_s26 + $0x78] sm:$0xff]  }
  0x17   : > { %744 = vmatpush3.bf16.msra.mxu0 %v381_v7  ;;  %786 = vmatpush3.bf16.msra.mxu1 %v381_v7 }
  0x1a   : > { %746 = vmatmul.mubr.msk.bf16.vlgmr.msra.gmra.mrb[0].mxu0 %vm330_vm0, %v804_v8  ;;  %762 = vmatmul.mubr.msk.bf16.vlgmr.msra.gmra.mrb[0].mxu1 %vm330_vm0, %v805_v9 }
  0x1b   : > { %749 = vmatprep.mubr.msk.bf16.mxu0 %vm330_vm0, %v806_v10  ;;  %765 = vmatprep.mubr.msk.bf16.mxu1 %vm330_vm0, %v807_v11 }
  0x22   : > { %750 = vmatmul.mubr.msk.bf16.gmra.mrb[4].mxu0 %vm330_vm0, %v808_v12  ;;  %766 = vmatmul.mubr.msk.bf16.gmra.mrb[4].mxu1 %vm330_vm0, %v809_v13 }
  0x23   : > { %753 = vmatprep.mubr.msk.bf16.mxu0 %vm330_vm0, %v810_v14  ;;  %769 = vmatprep.mubr.msk.bf16.mxu1 %vm330_vm0, %v811_v15 }
  0x2a   : > { %754 = vmatmul.mubr.msk.bf16.gmra.mrb[8].mxu0 %vm330_vm0, %v812_v16  ;;  %770 = vmatmul.mubr.msk.bf16.gmra.mrb[8].mxu1 %vm330_vm0, %v813_v17 }
  0x2b   : > { %757 = vmatprep.mubr.msk.bf16.mxu0 %vm330_vm0, %v814_v18  ;;  %773 = vmatprep.mubr.msk.bf16.mxu1 %vm330_vm0, %v815_v19 }
  0x32   : > { %758 = vmatmul.mubr.msk.bf16.gmra.mrb[12].mxu0 %vm330_vm0, %v816_v20  ;;  %774 = vmatmul.mubr.msk.bf16.gmra.mrb[12].mxu1 %vm330_vm0, %v817_v21 }
  0xed   : > { %v747_v23 = vpop.f32.mrb[0].mxu0  ;;  %v763_v24 = vpop.f32.mrb[0].mxu1 }
  0xee   : > { %v426_v25 = vadd.f32 %v747_v23, %v976_v22  ;;  %v490_v26 = vadd.f32 %v763_v24, %v976_v22  ;;  %v417_v27 = vpop.f32.mrb[1].mxu0  ;;  %v481_v28 = vpop.f32.mrb[1].mxu1 }
  0xef   : > { %v418_v29 = vadd.f32 %v976_v22, %v417_v27  ;;  %v482_v30 = vadd.f32 %v976_v22, %v481_v28  ;;  %v748_v31 = vpop.f32.mrb[2].mxu0  ;;  %v764_v32 = vpop.f32.mrb[2].mxu1 }
  0xf0   : > { %818 = vtanh.f32 %v426_v25  ;;  %v429_v33 = vadd.f32 %v748_v31, %v976_v22  ;;  %v420_v34 = vpop.f32.mrb[3].mxu0  ;;  %v484_v35 = vpop.f32.mrb[3].mxu1  ;;  %v493_v36 = vadd.f32 %v764_v32, %v976_v22 }
  0xf1   : > { %820 = vtanh.f32 %v490_v26  ;;  %v421_v37 = vadd.f32 %v976_v22, %v420_v34  ;;  %v485_v38 = vadd.f32 %v976_v22, %v484_v35 }
  0xf2   : > { %822 = vtanh.f32 %v418_v29 }
  0xf3   : > { %824 = vtanh.f32 %v482_v30 }
  0xf4   : > { %826 = vtanh.f32 %v429_v33 }
  0xf5   : > { %828 = vtanh.f32 %v493_v36  ;;  %v751_v39 = vpop.f32.mrb[4].mxu0  ;;  %v767_v40 = vpop.f32.mrb[4].mxu1 }
  0xf6   : > { %830 = vtanh.f32 %v421_v37  ;;  %v442_v41 = vadd.f32 %v751_v39, %v976_v22  ;;  %v506_v42 = vadd.f32 %v767_v40, %v976_v22  ;;  %v433_v43 = vpop.f32.mrb[5].mxu0  ;;  %v497_v44 = vpop.f32.mrb[5].mxu1 }
  0xf7   : > { %832 = vtanh.f32 %v485_v38  ;;  %v434_v45 = vadd.f32 %v976_v22, %v433_v43  ;;  %v498_v46 = vadd.f32 %v976_v22, %v497_v44  ;;  %v752_v47 = vpop.f32.mrb[6].mxu0  ;;  %v768_v48 = vpop.f32.mrb[6].mxu1 }
  0xf8   : > { %834 = vtanh.f32 %v442_v41  ;;  %v445_v49 = vadd.f32 %v752_v47, %v976_v22  ;;  %v436_v50 = vpop.f32.mrb[7].mxu0  ;;  %v500_v51 = vpop.f32.mrb[7].mxu1  ;;  %v509_v52 = vadd.f32 %v768_v48, %v976_v22 }
  0xf9   : > { %836 = vtanh.f32 %v506_v42  ;;  %v437_v54 = vadd.f32 %v976_v22, %v436_v50  ;;  %v501_v56 = vadd.f32 %v976_v22, %v500_v51 }
  0xfa   : > { %v819_v53 = vpop.eup %818  ;;  %838 = vtanh.f32 %v434_v45 }
  0xfb   : > { %v821_v55 = vpop.eup %820  ;;  %579 = vst.msk [vmem:[%s994_s7 + $0x10] sm:$0xff] %vm576_vm2, %v819_v53  ;;  %840 = vtanh.f32 %v498_v46 }
  0xfc   : > { %v823_v57 = vpop.eup %822  ;;  %595 = vst.msk [vmem:[%s994_s7 + $0x90] sm:$0xff] %vm576_vm2, %v821_v55  ;;  %842 = vtanh.f32 %v445_v49 }
  0xfd   : > { %v825_v58 = vpop.eup %824  ;;  %577 = vst.msk [vmem:[%s994_s7] sm:$0xff] %vm576_vm2, %v823_v57  ;;  %844 = vtanh.f32 %v509_v52  ;;  %v755_v59 = vpop.f32.mrb[8].mxu0 }
  0xfe   : > { %v771_v60 = vpop.f32.mrb[8].mxu1  ;;  %v827_v61 = vpop.eup %826  ;;  %593 = vst.msk [vmem:[%s994_s7 + $0x80] sm:$0xff] %vm576_vm2, %v825_v58  ;;  %846 = vtanh.f32 %v437_v54  ;;  %v458_v62 = vadd.f32 %v755_v59, %v976_v22 }
  0xff   : > { %v522_v63 = vadd.f32 %v771_v60, %v976_v22  ;;  %v449_v0 = vpop.f32.mrb[9].mxu0  ;;  %v513_v1 = vpop.f32.mrb[9].mxu1  ;;  %580 = vst.msk [vmem:[%s994_s7 + $0x18] sm:$0xff] %vm576_vm2, %v827_v61  ;;  %848 = vtanh.f32 %v501_v56 }
 0x100   : > { %v829_v2 = vpop.eup %828  ;;  %v450_v3 = vadd.f32 %v976_v22, %v449_v0  ;;  %v514_v4 = vadd.f32 %v976_v22, %v513_v1  ;;  %v756_v5 = vpop.f32.mrb[10].mxu0  ;;  %850 = vtanh.f32 %v458_v62 }
 0x101   : > { %v772_v6 = vpop.f32.mrb[10].mxu1  ;;  %v831_v7 = vpop.eup %830  ;;  %596 = vst.msk [vmem:[%s994_s7 + $0x98] sm:$0xff] %vm576_vm2, %v829_v2  ;;  %v461_v8 = vadd.f32 %v756_v5, %v976_v22  ;;  %852 = vtanh.f32 %v522_v63 }
 0x102   : > { %v452_v9 = vpop.f32.mrb[11].mxu0  ;;  %v516_v10 = vpop.f32.mrb[11].mxu1  ;;  %578 = vst.msk [vmem:[%s994_s7 + $0x8] sm:$0xff] %vm576_vm2, %v831_v7  ;;  %v525_v12 = vadd.f32 %v772_v6, %v976_v22  ;;  %854 = vtanh.f32 %v450_v3 }
 0x103   : > { %v833_v11 = vpop.eup %832  ;;  %v453_v14 = vadd.f32 %v976_v22, %v452_v9  ;;  %856 = vtanh.f32 %v514_v4  ;;  %v517_v16 = vadd.f32 %v976_v22, %v516_v10 }
 0x104   : > { %v835_v13 = vpop.eup %834  ;;  %594 = vst.msk [vmem:[%s994_s7 + $0x88] sm:$0xff] %vm576_vm2, %v833_v11  ;;  %858 = vtanh.f32 %v461_v8 }
 0x105   : > { %v837_v15 = vpop.eup %836  ;;  %583 = vst.msk [vmem:[%s994_s7 + $0x30] sm:$0xff] %vm576_vm2, %v835_v13  ;;  %860 = vtanh.f32 %v525_v12  ;;  %v759_v19 = vpop.f32.mrb[12].mxu0 }
 0x106   : > { %v839_v17 = vpop.eup %838  ;;  %599 = vst.msk [vmem:[%s994_s7 + $0xb0] sm:$0xff] %vm576_vm2, %v837_v15  ;;  %v775_v20 = vpop.f32.mrb[12].mxu1  ;;  %862 = vtanh.f32 %v453_v14  ;;  %v474_v23 = vadd.f32 %v759_v19, %v976_v22 }
 0x107   : > { %v841_v18 = vpop.eup %840  ;;  %581 = vst.msk [vmem:[%s994_s7 + $0x20] sm:$0xff] %vm576_vm2, %v839_v17  ;;  %v538_v24 = vadd.f32 %v775_v20, %v976_v22  ;;  %v465_v25 = vpop.f32.mrb[13].mxu0  ;;  %864 = vtanh.f32 %v517_v16 }
 0x108   : > { %v843_v21 = vpop.eup %842  ;;  %597 = vst.msk [vmem:[%s994_s7 + $0xa0] sm:$0xff] %vm576_vm2, %v841_v18  ;;  %v529_v26 = vpop.f32.mrb[13].mxu1  ;;  %v466_v28 = vadd.f32 %v976_v22, %v465_v25  ;;  %866 = vtanh.f32 %v474_v23 }
 0x109   : > { %v845_v27 = vpop.eup %844  ;;  %584 = vst.msk [vmem:[%s994_s7 + $0x38] sm:$0xff] %vm576_vm2, %v843_v21  ;;  %v530_v29 = vadd.f32 %v976_v22, %v529_v26  ;;  %v760_v30 = vpop.f32.mrb[14].mxu0  ;;  %868 = vtanh.f32 %v538_v24 }
 0x10a   : > { %v776_v31 = vpop.f32.mrb[14].mxu1  ;;  %v847_v32 = vpop.eup %846  ;;  %600 = vst.msk [vmem:[%s994_s7 + $0xb8] sm:$0xff] %vm576_vm2, %v845_v27  ;;  %v477_v33 = vadd.f32 %v760_v30, %v976_v22  ;;  %870 = vtanh.f32 %v466_v28 }
 0x10b   : > { %v468_v34 = vpop.f32.mrb[15].mxu0  ;;  %v532_v35 = vpop.f32.mrb[15].mxu1  ;;  %582 = vst.msk [vmem:[%s994_s7 + $0x28] sm:$0xff] %vm576_vm2, %v847_v32  ;;  %v541_v37 = vadd.f32 %v776_v31, %v976_v22  ;;  %872 = vtanh.f32 %v530_v29 }
 0x10c   : > { %v849_v36 = vpop.eup %848  ;;  %v469_v39 = vadd.f32 %v976_v22, %v468_v34  ;;  %v533_v41 = vadd.f32 %v976_v22, %v532_v35  ;;  %874 = vtanh.f32 %v477_v33 }
 0x10d   : > { %v851_v38 = vpop.eup %850  ;;  %598 = vst.msk [vmem:[%s994_s7 + $0xa8] sm:$0xff] %vm576_vm2, %v849_v36  ;;  %876 = vtanh.f32 %v541_v37 }
 0x10e   : > { %v853_v40 = vpop.eup %852  ;;  %587 = vst.msk [vmem:[%s994_s7 + $0x50] sm:$0xff] %vm576_vm2, %v851_v38  ;;  %878 = vtanh.f32 %v469_v39 }
 0x10f   : > { %v855_v42 = vpop.eup %854  ;;  %603 = vst.msk [vmem:[%s994_s7 + $0xd0] sm:$0xff] %vm576_vm2, %v853_v40  ;;  %880 = vtanh.f32 %v533_v41 }
 0x110   : > { %v857_v43 = vpop.eup %856  ;;  %585 = vst.msk [vmem:[%s994_s7 + $0x40] sm:$0xff] %vm576_vm2, %v855_v42 }
 0x111   : > { %v859_v44 = vpop.eup %858  ;;  %601 = vst.msk [vmem:[%s994_s7 + $0xc0] sm:$0xff] %vm576_vm2, %v857_v43 }
 0x112   : > { %v861_v45 = vpop.eup %860  ;;  %588 = vst.msk [vmem:[%s994_s7 + $0x58] sm:$0xff] %vm576_vm2, %v859_v44 }
 0x113   : > { %v863_v22 = vpop.eup %862  ;;  %604 = vst.msk [vmem:[%s994_s7 + $0xd8] sm:$0xff] %vm576_vm2, %v861_v45 }
 0x114   : > { %v865_v46 = vpop.eup %864  ;;  %586 = vst.msk [vmem:[%s994_s7 + $0x48] sm:$0xff] %vm576_vm2, %v863_v22 }
 0x115   : > { %v867_v47 = vpop.eup %866  ;;  %602 = vst.msk [vmem:[%s994_s7 + $0xc8] sm:$0xff] %vm576_vm2, %v865_v46 }
 0x116   : > { %v869_v48 = vpop.eup %868  ;;  %591 = vst.msk [vmem:[%s994_s7 + $0x70] sm:$0xff] %vm576_vm2, %v867_v47 }
 0x117   : > { %v871_v49 = vpop.eup %870  ;;  %607 = vst.msk [vmem:[%s994_s7 + $0xf0] sm:$0xff] %vm576_vm2, %v869_v48 }
 0x118   : > { %v873_v50 = vpop.eup %872  ;;  %589 = vst.msk [vmem:[%s994_s7 + $0x60] sm:$0xff] %vm576_vm2, %v871_v49 }
 0x119   : > { %v875_v51 = vpop.eup %874  ;;  %605 = vst.msk [vmem:[%s994_s7 + $0xe0] sm:$0xff] %vm576_vm2, %v873_v50 }
 0x11a   : > { %v877_v52 = vpop.eup %876  ;;  %592 = vst.msk [vmem:[%s994_s7 + $0x78] sm:$0xff] %vm576_vm2, %v875_v51 }
 0x11b   : > { %v879_v53 = vpop.eup %878  ;;  %608 = vst.msk [vmem:[%s994_s7 + $0xf8] sm:$0xff] %vm576_vm2, %v877_v52 }
 0x11c   : > { %v881_v54 = vpop.eup %880  ;;  %590 = vst.msk [vmem:[%s994_s7 + $0x68] sm:$0xff] %vm576_vm2, %v879_v53 }
 0x11d   : > { %606 = vst.msk [vmem:[%s994_s7 + $0xe8] sm:$0xff] %vm576_vm2, %v881_v54 }
 0x11e PF: > { %s13_s12 = sadd.s32 1, %s888_s12  }
 0x11f   : > { %p10_p4 = scmp.ge.s32.totalorder %s13_s12, 9  }
 0x121   :  { %12 = sbr.rel (!%p10_p4) target bundleno = 1 (0x1), region = 62 }

</bundles_post_ra>
